<compile_context>
chip_gen: v5e
topology: v5e:2x2
jax: 0.10.0
libtpu: 0.0.40
codegen_flags: <defaults>
</compile_context>

<pallas_src>
import functools

import jax
import jax.numpy as jnp
from jax.experimental import pallas as pl
from jax.experimental.pallas import tpu as pltpu


# ----------------------------------------------------------------------------
# Small helpers
# ----------------------------------------------------------------------------
def _round_up(v, mult):
    return (v + mult - 1) // mult * mult


def _vmem_block_bytes(shape, itemsize):
    """Rough VMEM footprint of a block, padded to the (8, 128) vreg tiling."""
    if len(shape) == 1:
        return _round_up(shape[0] * itemsize, 512)
    lead = 1
    for d in shape[:-2]:
        lead *= int(d)
    return lead * _round_up(int(shape[-2]), 8) * _round_up(int(shape[-1]), 128) * itemsize


def _vmem_capacity_bytes():
    """Physical VMEM of the current TPU generation (conservative fallback)."""
    try:
        info = pltpu.get_tpu_info()
        cap = getattr(info, "vmem_capacity_bytes", None)
        if cap:
            return int(cap)
    except Exception:
        pass
    return 64 << 20  # v7x-sized conservative fallback


def _choose_row_tile(ho, wo, kdim, itemsize, scratch_budget):
    """Pick a divisor th of ho for the output-row tile.

    Preference (per perf review):
      1. m = th*wo multiple of 128 (unmasked lane-dense stores) with
         512 <= m <= 2048 (amortize ~0.35us/step overhead, keep MXU streaming).
      2. largest 128-aligned m <= 2048 that fits the scratch budget.
      3. largest m <= 2048 that fits (masked stores).
    Both im2col scratch buffers (padded to the vreg tiling) must fit in
    `scratch_budget` bytes; there is no unbounded th = ho fallback.
    """
    kdim_pad = max(_round_up(kdim, 128), 128)
    wo_pad = max(_round_up(wo, 8), 8)

    def scratch_bytes(t):
        return 2 * t * wo_pad * kdim_pad * itemsize

    divisors = [t for t in range(1, ho + 1) if ho % t == 0]
    fitting = [t for t in divisors if scratch_bytes(t) <= scratch_budget]
    if not fitting:
        # TODO(synk): also tile the output width for extremely wide rows.
        fitting = [1]
    aligned = [t for t in fitting if (t * wo) % 128 == 0]
    preferred = [t for t in aligned if 512 <= t * wo <= 2048]
    if preferred:
        return max(preferred)
    if aligned:
        small = [t for t in aligned if t * wo <= 2048]
        return max(small) if small else min(aligned)
    # TODO(synk): if wo % 8 != 0 the (th, wo, kdim)->(m, kdim) reshape may
    # relayout; pad the image width so wo is 8-aligned for such shapes.
    small = [t for t in fitting if t * wo <= 2048]
    return max(small) if small else min(fitting)


# ----------------------------------------------------------------------------
# Pallas kernel: one (batch, output-row-tile) grid step.
# ----------------------------------------------------------------------------
def _dq_conv_kernel(x_ref, wab_ref, b_ref, o_ref, ptop_ref, pbot_ref, *,
                    ksize_h, ksize_w, th, wo, stride, dilation, ch, coh):
    # x_ref    : (1, Hp, Wp, 2*ch)   padded NHWC image (same block for all row tiles)
    # wab_ref  : (KH*KW*ch, 2*coh)   [A | B], rows ordered (kh, kw, c)
    # b_ref    : (1, 2*coh)          bias (f32)
    # o_ref    : (1, 2*coh, th*wo)   lane-dense output tile (channels on sublanes)
    # ptop_ref : (th, wo, KH*KW*ch)  im2col scratch, top input-channel half
    # pbot_ref : (th, wo, KH*KW*ch)  im2col scratch, bottom input-channel half
    t = pl.program_id(1)
    row0 = t * (th * stride)                     # first padded-input row of this tile
    if (th * stride) % 8 == 0:
        row0 = pl.multiple_of(row0, 8)

    # ---- im2col build: one ref-sliced window per tap, split into channel halves.
    for tap in range(ksize_h * ksize_w):
        kh, kw = divmod(tap, ksize_w)
        if stride == 1:
            win = x_ref[0,
                        pl.ds(row0 + kh * dilation, th),
                        pl.ds(kw * dilation, wo), :]
        else:
            # Strided ref slice: loads exactly th x wo taps (no oversized window
            # + in-vreg subsample).
            win = x_ref[0,
                        pl.ds(row0 + kh * dilation, th, stride=stride),
                        pl.ds(kw * dilation, wo, stride=stride), :]
        # win: (th, wo, 2*ch)
        ptop_ref[:, :, tap * ch:(tap + 1) * ch] = win[:, :, :ch]
        pbot_ref[:, :, tap * ch:(tap + 1) * ch] = win[:, :, ch:]

    m = th * wo
    kdim = ksize_h * ksize_w * ch
    ptop = ptop_ref[...].reshape(m, kdim)
    pbot = pbot_ref[...].reshape(m, kdim)
    wab = wab_ref[...]

    # ---- dual-quaternion structured matmuls (widened-N first matmul, f32 acc).
    oc = jnp.dot(ptop, wab, preferred_element_type=jnp.float32)          # [P@A | P@B]
    ob = jnp.dot(pbot, wab[:, :coh], preferred_element_type=jnp.float32)  # P_bot @ A
    out = jnp.concatenate([oc[:, :coh], oc[:, coh:] + ob], axis=-1)       # (m, 2*coh)

    # ---- epilogue once per tile: bias, cast, single lane-dense store.
    out = out + b_ref[...]
    o_ref[0] = out.T.astype(o_ref.dtype)


# ----------------------------------------------------------------------------
# Wrapper
# ----------------------------------------------------------------------------
def dual_quaternion_conv2d(x_nchw, a_blk, b_blk, bias, *, stride=1, padding=0,
                           dilation=1, compute_dtype=None):
    """conv2d(x, [[A,0],[B,A]], bias) with PyTorch NCHW semantics; compute in Pallas.

    compute_dtype: optional MXU input dtype (e.g. jnp.bfloat16); accumulation is
    always f32. Default keeps the input dtype (exact f32 semantics).
    """
    n, cin, h, w = x_nchw.shape
    coh, ch, ksize_h, ksize_w = a_blk.shape
    cout = 2 * coh
    assert cin == 2 * ch, "channel mismatch (groups != 1 not supported)"

    out_dtype = x_nchw.dtype
    cdt = jnp.dtype(compute_dtype) if compute_dtype is not None else jnp.dtype(out_dtype)

    hp, wp = h + 2 * padding, w + 2 * padding
    ho = (hp - dilation * (ksize_h - 1) - 1) // stride + 1
    wo = (wp - dilation * (ksize_w - 1) - 1) // stride + 1
    assert ho > 0 and wo > 0, "empty output spatial extent"

    kdim = ksize_h * ksize_w * ch
    itemsize = cdt.itemsize

    # Generation-aware VMEM budgets (128 MiB v5e/v6e, 64 MiB v7x physical).
    vmem_cap = _vmem_capacity_bytes()
    vmem_cap_limit = int(vmem_cap * 3 // 4)       # ~96 MiB v5e/v6e, ~48 MiB v7x
    scratch_budget = vmem_cap // 8                # ~16 MiB / ~8 MiB for im2col scratch

    th = _choose_row_tile(ho, wo, kdim, itemsize, scratch_budget)
    n_tiles = ho // th
    m = th * wo

    # Glue: layout + pad (+ optional bf16 cast of activations/weights).
    # TODO(synk): fuse pad/transpose with the producer to avoid this extra HBM pass.
    x_nhwc = jnp.transpose(x_nchw, (0, 2, 3, 1))
    x_pad = jnp.pad(x_nhwc, ((0, 0), (padding, padding), (padding, padding), (0, 0)))
    x_pad = x_pad.astype(cdt)

    # Weight blocks flattened to (kdim, coh), rows ordered (kh, kw, c) to match the
    # im2col column order; A and B concatenated along N -> one wide RHS block.
    wa = jnp.transpose(a_blk, (2, 3, 1, 0)).reshape(kdim, coh)
    wb = jnp.transpose(b_blk, (2, 3, 1, 0)).reshape(kdim, coh)
    wab = jnp.concatenate([wa, wb], axis=1).astype(cdt)
    b2 = (bias if bias is not None else jnp.zeros((cout,), jnp.float32))
    b2 = b2.astype(jnp.float32).reshape(1, cout)

    kernel = functools.partial(
        _dq_conv_kernel, ksize_h=ksize_h, ksize_w=ksize_w, th=th, wo=wo,
        stride=stride, dilation=dilation, ch=ch, coh=coh)

    # VMEM estimate: pipelined blocks double-buffered, scratch single-buffered.
    est = (2 * (_vmem_block_bytes((1, hp, wp, cin), itemsize)
                + _vmem_block_bytes((kdim, cout), itemsize)
                + _vmem_block_bytes((1, cout), 4)
                + _vmem_block_bytes((1, cout, m), jnp.dtype(out_dtype).itemsize))
           + 2 * _vmem_block_bytes((th, wo, kdim), itemsize))
    vmem_limit = int(min(max(est + est // 2 + (8 << 20), 16 << 20), vmem_cap_limit))
    if est > vmem_limit:
        # Do NOT silently clamp below the actual need.
        # TODO(synk): switch the input to a halo'd row-tile block (manual DMA /
        # Element-offset index_map) so very large images fit v7x's 64 MiB VMEM.
        raise ValueError(
            f"dual_quaternion_conv2d: estimated VMEM {est} B exceeds the "
            f"{vmem_limit} B budget; image too large for the whole-image input block.")

    flops = 2 * n * ho * wo * kdim * coh * 3          # three half-size matmuls' worth
    bytes_accessed = (itemsize * (n * hp * wp * cin + kdim * cout) + 4 * cout
                      + jnp.dtype(out_dtype).itemsize * n * cout * ho * wo)

    out_flat = pl.pallas_call(
        kernel,
        out_shape=jax.ShapeDtypeStruct((n, cout, ho * wo), out_dtype),
        grid_spec=pltpu.PrefetchScalarGridSpec(
            num_scalar_prefetch=0,
            # Batch first so megacore / dual-TC splitting duplicates weights,
            # not the per-image input block.
            grid=(n, n_tiles),
            in_specs=[
                # Whole padded image, indexed by batch only: constant block index
                # across row tiles -> not re-DMA'd per tile.
                # TODO(synk): halo'd row-tile input block for very large images.
                pl.BlockSpec((1, hp, wp, cin), lambda b, t: (b, 0, 0, 0)),
                # Weights / bias: constant index maps -> fetched once.
                # TODO(synk): pipeline_mode=pl.Buffered(1) would drop their second
                # buffer; left off pending API stability on all generations.
                pl.BlockSpec((kdim, cout), lambda b, t: (0, 0)),
                pl.BlockSpec((1, cout), lambda b, t: (0, 0)),
            ],
            out_specs=pl.BlockSpec((1, cout, m), lambda b, t: (b, 0, t)),
            scratch_shapes=[pltpu.VMEM((th, wo, kdim), cdt),
                            pltpu.VMEM((th, wo, kdim), cdt)],
        ),
        compiler_params=pltpu.CompilerParams(
            dimension_semantics=("parallel", "parallel"),
            vmem_limit_bytes=vmem_limit,
        ),
        cost_estimate=pl.CostEstimate(flops=int(flops), transcendentals=0,
                                      bytes_accessed=int(bytes_accessed)),
    )(x_pad, wab, b2)

    # (N, Cout, Ho*Wo) -> NCHW is a free reshape (no transpose needed).
    return out_flat.reshape(n, cout, ho, wo)


# ----------------------------------------------------------------------------
# Dual-quaternion weight assembly (plain-JAX glue, mirrors dual_quaternion_conv)
# ----------------------------------------------------------------------------
def _quaternion_block(r, i, j, k):
    # each component: (Co, Ci, kH, kW) -> block: (4*Co, 4*Ci, kH, kW)
    row_r = jnp.concatenate([r, -i, -j, -k], axis=1)
    row_i = jnp.concatenate([i,  r, -k,  j], axis=1)
    row_j = jnp.concatenate([j,  k,  r, -i], axis=1)
    row_k = jnp.concatenate([k, -j,  i,  r], axis=1)
    return jnp.concatenate([row_r, row_i, row_j, row_k], axis=0)


def build_dual_quaternion_weight(r, i, j, k, r2, i2, j2, k2):
    """Dense (out, in, kH, kW) weight, used only for the reference cross-check."""
    a = _quaternion_block(r, i, j, k)
    b = _quaternion_block(r2, i2, j2, k2)
    zero = jnp.zeros_like(a)
    top = jnp.concatenate([a, zero], axis=1)
    bot = jnp.concatenate([b, a], axis=1)
    return jnp.concatenate([top, bot], axis=0)


class DualQuaternionConvPallas:
    """Forward-only JAX/Pallas port of DualQuaternionConv (operation='convolution2d')."""

    def __init__(self, in_channels, out_channels, kernel_size, stride,
                 dilatation=1, padding=0, bias=True, key=None):
        assert in_channels % 8 == 0 and out_channels % 8 == 0
        self.in_channels = in_channels // 8
        self.out_channels = out_channels // 8
        self.kernel_size = (kernel_size, kernel_size)
        self.stride = stride
        self.padding = padding
        self.dilatation = dilatation

        key = key if key is not None else jax.random.PRNGKey(0)
        w_shape = (self.out_channels, self.in_channels) + self.kernel_size
        fan_in = self.in_channels * kernel_size * kernel_size
        fan_out = self.out_channels * kernel_size * kernel_size
        limit = (6.0 / (fan_in + fan_out)) ** 0.5
        keys = jax.random.split(key, 8)
        # TODO(synk): the exact quaternion_init polar-form initializer is not
        # reproduced; glorot-uniform weights of the correct shape are used
        # (forward-pass structure is identical).
        (self.r_weight, self.i_weight, self.j_weight, self.k_weight,
         self.r_weight_2, self.i_weight_2, self.j_weight_2, self.k_weight_2) = [
            jax.random.uniform(kk, w_shape, jnp.float32, -limit, limit) for kk in keys
        ]
        # reset_parameters() zeroes the bias.
        self.bias = jnp.zeros((out_channels,), jnp.float32) if bias else None

    def __call__(self, x_nchw, compute_dtype=None):
        a_blk = _quaternion_block(self.r_weight, self.i_weight,
                                  self.j_weight, self.k_weight)
        b_blk = _quaternion_block(self.r_weight_2, self.i_weight_2,
                                  self.j_weight_2, self.k_weight_2)
        return dual_quaternion_conv2d(
            x_nchw, a_blk, b_blk, self.bias,
            stride=self.stride, padding=self.padding, dilation=self.dilatation,
            compute_dtype=compute_dtype)


if __name__ == "__main__":
    key = jax.random.PRNGKey(0)
    k_x, k_w, k_b = jax.random.split(key, 3)

    # Small shapes consistent with the module: channels divisible by 8.
    N, C_IN, H, W = 2, 16, 16, 16
    C_OUT, K, STRIDE, PAD = 16, 3, 1, 1

    x = jax.random.normal(k_x, (N, C_IN, H, W), jnp.float32)

    layer = DualQuaternionConvPallas(C_IN, C_OUT, K, STRIDE, padding=PAD,
                                     bias=True, key=k_w)
    # Exercise the bias path (reset_parameters() zeroes it in the reference module).
    layer.bias = 0.1 * jax.random.normal(k_b, (C_OUT,), jnp.float32)

    out = jax.block_until_ready(layer(x))

    # Cross-check against XLA's conv with the dense dual-quaternion weight.
    w_full = build_dual_quaternion_weight(
        layer.r_weight, layer.i_weight, layer.j_weight, layer.k_weight,
        layer.r_weight_2, layer.i_weight_2, layer.j_weight_2, layer.k_weight_2,
    )
    ref = jax.lax.conv_general_dilated(
        x, w_full, window_strides=(STRIDE, STRIDE),
        padding=[(PAD, PAD), (PAD, PAD)],
        rhs_dilation=(layer.dilatation, layer.dilatation),
        dimension_numbers=("NCHW", "OIHW", "NCHW"),
    ) + layer.bias[None, :, None, None]

    assert out.shape == (N, C_OUT, H, W), out.shape
    max_err = float(jnp.max(jnp.abs(out - ref)))
    assert jnp.allclose(out, ref, atol=1e-3, rtol=1e-3), max_err

    # Opt-in bf16 MXU path (f32 accumulation): loose sanity check only, since
    # bf16 input/weight rounding changes numerics slightly.
    out_bf16 = jax.block_until_ready(layer(x, compute_dtype=jnp.bfloat16))
    assert out_bf16.shape == (N, C_OUT, H, W), out_bf16.shape
    max_err_bf16 = float(jnp.max(jnp.abs(out_bf16 - ref)))
    assert jnp.allclose(out_bf16, ref, atol=3e-1, rtol=1e-1), max_err_bf16

    print("KERNEL_OK")
</pallas_src>

<mosaic_0001>
module attributes {stable_mosaic.version = 11 : i64} {
  func.func @_dq_conv_kernel(%arg0: i32, %arg1: i32, %arg2: memref<1x18x18x16xf32, #tpu.memory_space<vmem>>, %arg3: memref<72x16xf32, #tpu.memory_space<vmem>>, %arg4: memref<1x16xf32, #tpu.memory_space<vmem>>, %arg5: memref<1x16x256xf32, #tpu.memory_space<vmem>>, %arg6: memref<16x16x72xf32, #tpu.memory_space<vmem>>, %arg7: memref<16x16x72xf32, #tpu.memory_space<vmem>>) attributes {dimension_semantics = [#tpu.dimension_semantics<parallel>, #tpu.dimension_semantics<parallel>], iteration_bounds = array<i64: 2, 1>, scalar_prefetch = 0 : i64, scratch_operands = 2 : i64, tpu.core_type = #tpu.core_type<tc>, window_params = [{transform_indices = @transform_0, window_bounds = array<i64: 1, 18, 18, 16>}, {pipeline_mode = #tpu.pipeline_mode<synchronous>, transform_indices = @transform_1, window_bounds = array<i64: 72, 16>}, {pipeline_mode = #tpu.pipeline_mode<synchronous>, transform_indices = @transform_2, window_bounds = array<i64: 1, 16>}, {transform_indices = @transform_3, window_bounds = array<i64: 1, 16, 256>}]} {
    %c16_i32 = arith.constant 16 : i32
    %0 = arith.muli %arg1, %c16_i32 : i32
    %1 = tpu.assume_multiple %0, 8 : i32
    %c0_i32 = arith.constant 0 : i32
    %2 = arith.addi %1, %c0_i32 : i32
    %c0 = arith.constant 0 : index
    %3 = arith.index_cast %2 : i32 to index
    %c0_0 = arith.constant 0 : index
    %c0_1 = arith.constant 0 : index
    %4 = vector.load %arg2[%c0, %3, %c0_0, %c0_1] : memref<1x18x18x16xf32, #tpu.memory_space<vmem>>, vector<1x16x16x16xf32>
    %5 = vector.shape_cast %4 : vector<1x16x16x16xf32> to vector<16x16x16xf32>
    %6 = vector.extract_strided_slice %5 {offsets = [0, 0, 0], sizes = [16, 16, 8], strides = [1, 1, 1]} : vector<16x16x16xf32> to vector<16x16x8xf32>
    %c0_2 = arith.constant 0 : index
    %c0_3 = arith.constant 0 : index
    %c0_4 = arith.constant 0 : index
    %7 = vector.load %arg6[%c0_2, %c0_3, %c0_4] : memref<16x16x72xf32, #tpu.memory_space<vmem>>, vector<16x16x8xf32>
    tpu.vector_store %arg6[%c0_2, %c0_3, %c0_4], %6 {strides = array<i32>} : memref<16x16x72xf32, #tpu.memory_space<vmem>>, vector<16x16x8xf32>,
    %8 = vector.extract_strided_slice %5 {offsets = [0, 0, 8], sizes = [16, 16, 8], strides = [1, 1, 1]} : vector<16x16x16xf32> to vector<16x16x8xf32>
    %c0_5 = arith.constant 0 : index
    %c0_6 = arith.constant 0 : index
    %c0_7 = arith.constant 0 : index
    %9 = vector.load %arg7[%c0_5, %c0_6, %c0_7] : memref<16x16x72xf32, #tpu.memory_space<vmem>>, vector<16x16x8xf32>
    tpu.vector_store %arg7[%c0_5, %c0_6, %c0_7], %8 {strides = array<i32>} : memref<16x16x72xf32, #tpu.memory_space<vmem>>, vector<16x16x8xf32>,
    %c0_i32_8 = arith.constant 0 : i32
    %10 = arith.addi %1, %c0_i32_8 : i32
    %c0_9 = arith.constant 0 : index
    %11 = arith.index_cast %10 : i32 to index
    %c1 = arith.constant 1 : index
    %c0_10 = arith.constant 0 : index
    %12 = vector.load %arg2[%c0_9, %11, %c1, %c0_10] : memref<1x18x18x16xf32, #tpu.memory_space<vmem>>, vector<1x16x16x16xf32>
    %13 = vector.shape_cast %12 : vector<1x16x16x16xf32> to vector<16x16x16xf32>
    %14 = vector.extract_strided_slice %13 {offsets = [0, 0, 0], sizes = [16, 16, 8], strides = [1, 1, 1]} : vector<16x16x16xf32> to vector<16x16x8xf32>
    %c0_11 = arith.constant 0 : index
    %c0_12 = arith.constant 0 : index
    %c8 = arith.constant 8 : index
    %15 = vector.load %arg6[%c0_11, %c0_12, %c8] : memref<16x16x72xf32, #tpu.memory_space<vmem>>, vector<16x16x8xf32>
    tpu.vector_store %arg6[%c0_11, %c0_12, %c8], %14 {strides = array<i32>} : memref<16x16x72xf32, #tpu.memory_space<vmem>>, vector<16x16x8xf32>,
    %16 = vector.extract_strided_slice %13 {offsets = [0, 0, 8], sizes = [16, 16, 8], strides = [1, 1, 1]} : vector<16x16x16xf32> to vector<16x16x8xf32>
    %c0_13 = arith.constant 0 : index
    %c0_14 = arith.constant 0 : index
    %c8_15 = arith.constant 8 : index
    %17 = vector.load %arg7[%c0_13, %c0_14, %c8_15] : memref<16x16x72xf32, #tpu.memory_space<vmem>>, vector<16x16x8xf32>
    tpu.vector_store %arg7[%c0_13, %c0_14, %c8_15], %16 {strides = array<i32>} : memref<16x16x72xf32, #tpu.memory_space<vmem>>, vector<16x16x8xf32>,
    %c0_i32_16 = arith.constant 0 : i32
    %18 = arith.addi %1, %c0_i32_16 : i32
    %c0_17 = arith.constant 0 : index
    %19 = arith.index_cast %18 : i32 to index
    %c2 = arith.constant 2 : index
    %c0_18 = arith.constant 0 : index
    %20 = vector.load %arg2[%c0_17, %19, %c2, %c0_18] : memref<1x18x18x16xf32, #tpu.memory_space<vmem>>, vector<1x16x16x16xf32>
    %21 = vector.shape_cast %20 : vector<1x16x16x16xf32> to vector<16x16x16xf32>
    %22 = vector.extract_strided_slice %21 {offsets = [0, 0, 0], sizes = [16, 16, 8], strides = [1, 1, 1]} : vector<16x16x16xf32> to vector<16x16x8xf32>
    %c0_19 = arith.constant 0 : index
    %c0_20 = arith.constant 0 : index
    %c16 = arith.constant 16 : index
    %23 = vector.load %arg6[%c0_19, %c0_20, %c16] : memref<16x16x72xf32, #tpu.memory_space<vmem>>, vector<16x16x8xf32>
    tpu.vector_store %arg6[%c0_19, %c0_20, %c16], %22 {strides = array<i32>} : memref<16x16x72xf32, #tpu.memory_space<vmem>>, vector<16x16x8xf32>,
    %24 = vector.extract_strided_slice %21 {offsets = [0, 0, 8], sizes = [16, 16, 8], strides = [1, 1, 1]} : vector<16x16x16xf32> to vector<16x16x8xf32>
    %c0_21 = arith.constant 0 : index
    %c0_22 = arith.constant 0 : index
    %c16_23 = arith.constant 16 : index
    %25 = vector.load %arg7[%c0_21, %c0_22, %c16_23] : memref<16x16x72xf32, #tpu.memory_space<vmem>>, vector<16x16x8xf32>
    tpu.vector_store %arg7[%c0_21, %c0_22, %c16_23], %24 {strides = array<i32>} : memref<16x16x72xf32, #tpu.memory_space<vmem>>, vector<16x16x8xf32>,
    %c1_i32 = arith.constant 1 : i32
    %26 = arith.addi %1, %c1_i32 : i32
    %c0_24 = arith.constant 0 : index
    %27 = arith.index_cast %26 : i32 to index
    %c0_25 = arith.constant 0 : index
    %c0_26 = arith.constant 0 : index
    %28 = vector.load %arg2[%c0_24, %27, %c0_25, %c0_26] : memref<1x18x18x16xf32, #tpu.memory_space<vmem>>, vector<1x16x16x16xf32>
    %29 = vector.shape_cast %28 : vector<1x16x16x16xf32> to vector<16x16x16xf32>
    %30 = vector.extract_strided_slice %29 {offsets = [0, 0, 0], sizes = [16, 16, 8], strides = [1, 1, 1]} : vector<16x16x16xf32> to vector<16x16x8xf32>
    %c0_27 = arith.constant 0 : index
    %c0_28 = arith.constant 0 : index
    %c24 = arith.constant 24 : index
    %31 = vector.load %arg6[%c0_27, %c0_28, %c24] : memref<16x16x72xf32, #tpu.memory_space<vmem>>, vector<16x16x8xf32>
    tpu.vector_store %arg6[%c0_27, %c0_28, %c24], %30 {strides = array<i32>} : memref<16x16x72xf32, #tpu.memory_space<vmem>>, vector<16x16x8xf32>,
    %32 = vector.extract_strided_slice %29 {offsets = [0, 0, 8], sizes = [16, 16, 8], strides = [1, 1, 1]} : vector<16x16x16xf32> to vector<16x16x8xf32>
    %c0_29 = arith.constant 0 : index
    %c0_30 = arith.constant 0 : index
    %c24_31 = arith.constant 24 : index
    %33 = vector.load %arg7[%c0_29, %c0_30, %c24_31] : memref<16x16x72xf32, #tpu.memory_space<vmem>>, vector<16x16x8xf32>
    tpu.vector_store %arg7[%c0_29, %c0_30, %c24_31], %32 {strides = array<i32>} : memref<16x16x72xf32, #tpu.memory_space<vmem>>, vector<16x16x8xf32>,
    %c1_i32_32 = arith.constant 1 : i32
    %34 = arith.addi %1, %c1_i32_32 : i32
    %c0_33 = arith.constant 0 : index
    %35 = arith.index_cast %34 : i32 to index
    %c1_34 = arith.constant 1 : index
    %c0_35 = arith.constant 0 : index
    %36 = vector.load %arg2[%c0_33, %35, %c1_34, %c0_35] : memref<1x18x18x16xf32, #tpu.memory_space<vmem>>, vector<1x16x16x16xf32>
    %37 = vector.shape_cast %36 : vector<1x16x16x16xf32> to vector<16x16x16xf32>
    %38 = vector.extract_strided_slice %37 {offsets = [0, 0, 0], sizes = [16, 16, 8], strides = [1, 1, 1]} : vector<16x16x16xf32> to vector<16x16x8xf32>
    %c0_36 = arith.constant 0 : index
    %c0_37 = arith.constant 0 : index
    %c32 = arith.constant 32 : index
    %39 = vector.load %arg6[%c0_36, %c0_37, %c32] : memref<16x16x72xf32, #tpu.memory_space<vmem>>, vector<16x16x8xf32>
    tpu.vector_store %arg6[%c0_36, %c0_37, %c32], %38 {strides = array<i32>} : memref<16x16x72xf32, #tpu.memory_space<vmem>>, vector<16x16x8xf32>,
    %40 = vector.extract_strided_slice %37 {offsets = [0, 0, 8], sizes = [16, 16, 8], strides = [1, 1, 1]} : vector<16x16x16xf32> to vector<16x16x8xf32>
    %c0_38 = arith.constant 0 : index
    %c0_39 = arith.constant 0 : index
    %c32_40 = arith.constant 32 : index
    %41 = vector.load %arg7[%c0_38, %c0_39, %c32_40] : memref<16x16x72xf32, #tpu.memory_space<vmem>>, vector<16x16x8xf32>
    tpu.vector_store %arg7[%c0_38, %c0_39, %c32_40], %40 {strides = array<i32>} : memref<16x16x72xf32, #tpu.memory_space<vmem>>, vector<16x16x8xf32>,
    %c1_i32_41 = arith.constant 1 : i32
    %42 = arith.addi %1, %c1_i32_41 : i32
    %c0_42 = arith.constant 0 : index
    %43 = arith.index_cast %42 : i32 to index
    %c2_43 = arith.constant 2 : index
    %c0_44 = arith.constant 0 : index
    %44 = vector.load %arg2[%c0_42, %43, %c2_43, %c0_44] : memref<1x18x18x16xf32, #tpu.memory_space<vmem>>, vector<1x16x16x16xf32>
    %45 = vector.shape_cast %44 : vector<1x16x16x16xf32> to vector<16x16x16xf32>
    %46 = vector.extract_strided_slice %45 {offsets = [0, 0, 0], sizes = [16, 16, 8], strides = [1, 1, 1]} : vector<16x16x16xf32> to vector<16x16x8xf32>
    %c0_45 = arith.constant 0 : index
    %c0_46 = arith.constant 0 : index
    %c40 = arith.constant 40 : index
    %47 = vector.load %arg6[%c0_45, %c0_46, %c40] : memref<16x16x72xf32, #tpu.memory_space<vmem>>, vector<16x16x8xf32>
    tpu.vector_store %arg6[%c0_45, %c0_46, %c40], %46 {strides = array<i32>} : memref<16x16x72xf32, #tpu.memory_space<vmem>>, vector<16x16x8xf32>,
    %48 = vector.extract_strided_slice %45 {offsets = [0, 0, 8], sizes = [16, 16, 8], strides = [1, 1, 1]} : vector<16x16x16xf32> to vector<16x16x8xf32>
    %c0_47 = arith.constant 0 : index
    %c0_48 = arith.constant 0 : index
    %c40_49 = arith.constant 40 : index
    %49 = vector.load %arg7[%c0_47, %c0_48, %c40_49] : memref<16x16x72xf32, #tpu.memory_space<vmem>>, vector<16x16x8xf32>
    tpu.vector_store %arg7[%c0_47, %c0_48, %c40_49], %48 {strides = array<i32>} : memref<16x16x72xf32, #tpu.memory_space<vmem>>, vector<16x16x8xf32>,
    %c2_i32 = arith.constant 2 : i32
    %50 = arith.addi %1, %c2_i32 : i32
    %c0_50 = arith.constant 0 : index
    %51 = arith.index_cast %50 : i32 to index
    %c0_51 = arith.constant 0 : index
    %c0_52 = arith.constant 0 : index
    %52 = vector.load %arg2[%c0_50, %51, %c0_51, %c0_52] : memref<1x18x18x16xf32, #tpu.memory_space<vmem>>, vector<1x16x16x16xf32>
    %53 = vector.shape_cast %52 : vector<1x16x16x16xf32> to vector<16x16x16xf32>
    %54 = vector.extract_strided_slice %53 {offsets = [0, 0, 0], sizes = [16, 16, 8], strides = [1, 1, 1]} : vector<16x16x16xf32> to vector<16x16x8xf32>
    %c0_53 = arith.constant 0 : index
    %c0_54 = arith.constant 0 : index
    %c48 = arith.constant 48 : index
    %55 = vector.load %arg6[%c0_53, %c0_54, %c48] : memref<16x16x72xf32, #tpu.memory_space<vmem>>, vector<16x16x8xf32>
    tpu.vector_store %arg6[%c0_53, %c0_54, %c48], %54 {strides = array<i32>} : memref<16x16x72xf32, #tpu.memory_space<vmem>>, vector<16x16x8xf32>,
    %56 = vector.extract_strided_slice %53 {offsets = [0, 0, 8], sizes = [16, 16, 8], strides = [1, 1, 1]} : vector<16x16x16xf32> to vector<16x16x8xf32>
    %c0_55 = arith.constant 0 : index
    %c0_56 = arith.constant 0 : index
    %c48_57 = arith.constant 48 : index
    %57 = vector.load %arg7[%c0_55, %c0_56, %c48_57] : memref<16x16x72xf32, #tpu.memory_space<vmem>>, vector<16x16x8xf32>
    tpu.vector_store %arg7[%c0_55, %c0_56, %c48_57], %56 {strides = array<i32>} : memref<16x16x72xf32, #tpu.memory_space<vmem>>, vector<16x16x8xf32>,
    %c2_i32_58 = arith.constant 2 : i32
    %58 = arith.addi %1, %c2_i32_58 : i32
    %c0_59 = arith.constant 0 : index
    %59 = arith.index_cast %58 : i32 to index
    %c1_60 = arith.constant 1 : index
    %c0_61 = arith.constant 0 : index
    %60 = vector.load %arg2[%c0_59, %59, %c1_60, %c0_61] : memref<1x18x18x16xf32, #tpu.memory_space<vmem>>, vector<1x16x16x16xf32>
    %61 = vector.shape_cast %60 : vector<1x16x16x16xf32> to vector<16x16x16xf32>
    %62 = vector.extract_strided_slice %61 {offsets = [0, 0, 0], sizes = [16, 16, 8], strides = [1, 1, 1]} : vector<16x16x16xf32> to vector<16x16x8xf32>
    %c0_62 = arith.constant 0 : index
    %c0_63 = arith.constant 0 : index
    %c56 = arith.constant 56 : index
    %63 = vector.load %arg6[%c0_62, %c0_63, %c56] : memref<16x16x72xf32, #tpu.memory_space<vmem>>, vector<16x16x8xf32>
    tpu.vector_store %arg6[%c0_62, %c0_63, %c56], %62 {strides = array<i32>} : memref<16x16x72xf32, #tpu.memory_space<vmem>>, vector<16x16x8xf32>,
    %64 = vector.extract_strided_slice %61 {offsets = [0, 0, 8], sizes = [16, 16, 8], strides = [1, 1, 1]} : vector<16x16x16xf32> to vector<16x16x8xf32>
    %c0_64 = arith.constant 0 : index
    %c0_65 = arith.constant 0 : index
    %c56_66 = arith.constant 56 : index
    %65 = vector.load %arg7[%c0_64, %c0_65, %c56_66] : memref<16x16x72xf32, #tpu.memory_space<vmem>>, vector<16x16x8xf32>
    tpu.vector_store %arg7[%c0_64, %c0_65, %c56_66], %64 {strides = array<i32>} : memref<16x16x72xf32, #tpu.memory_space<vmem>>, vector<16x16x8xf32>,
    %c2_i32_67 = arith.constant 2 : i32
    %66 = arith.addi %1, %c2_i32_67 : i32
    %c0_68 = arith.constant 0 : index
    %67 = arith.index_cast %66 : i32 to index
    %c2_69 = arith.constant 2 : index
    %c0_70 = arith.constant 0 : index
    %68 = vector.load %arg2[%c0_68, %67, %c2_69, %c0_70] : memref<1x18x18x16xf32, #tpu.memory_space<vmem>>, vector<1x16x16x16xf32>
    %69 = vector.shape_cast %68 : vector<1x16x16x16xf32> to vector<16x16x16xf32>
    %70 = vector.extract_strided_slice %69 {offsets = [0, 0, 0], sizes = [16, 16, 8], strides = [1, 1, 1]} : vector<16x16x16xf32> to vector<16x16x8xf32>
    %c0_71 = arith.constant 0 : index
    %c0_72 = arith.constant 0 : index
    %c64 = arith.constant 64 : index
    %71 = vector.load %arg6[%c0_71, %c0_72, %c64] : memref<16x16x72xf32, #tpu.memory_space<vmem>>, vector<16x16x8xf32>
    tpu.vector_store %arg6[%c0_71, %c0_72, %c64], %70 {strides = array<i32>} : memref<16x16x72xf32, #tpu.memory_space<vmem>>, vector<16x16x8xf32>,
    %72 = vector.extract_strided_slice %69 {offsets = [0, 0, 8], sizes = [16, 16, 8], strides = [1, 1, 1]} : vector<16x16x16xf32> to vector<16x16x8xf32>
    %c0_73 = arith.constant 0 : index
    %c0_74 = arith.constant 0 : index
    %c64_75 = arith.constant 64 : index
    %73 = vector.load %arg7[%c0_73, %c0_74, %c64_75] : memref<16x16x72xf32, #tpu.memory_space<vmem>>, vector<16x16x8xf32>
    tpu.vector_store %arg7[%c0_73, %c0_74, %c64_75], %72 {strides = array<i32>} : memref<16x16x72xf32, #tpu.memory_space<vmem>>, vector<16x16x8xf32>,
    %c0_76 = arith.constant 0 : index
    %c0_77 = arith.constant 0 : index
    %c0_78 = arith.constant 0 : index
    %74 = vector.load %arg6[%c0_76, %c0_77, %c0_78] : memref<16x16x72xf32, #tpu.memory_space<vmem>>, vector<16x16x72xf32>
    %75 = vector.shape_cast %74 : vector<16x16x72xf32> to vector<256x72xf32>
    %c0_79 = arith.constant 0 : index
    %c0_80 = arith.constant 0 : index
    %c0_81 = arith.constant 0 : index
    %76 = vector.load %arg7[%c0_79, %c0_80, %c0_81] : memref<16x16x72xf32, #tpu.memory_space<vmem>>, vector<16x16x72xf32>
    %77 = vector.shape_cast %76 : vector<16x16x72xf32> to vector<256x72xf32>
    %c0_82 = arith.constant 0 : index
    %c0_83 = arith.constant 0 : index
    %78 = vector.load %arg3[%c0_82, %c0_83] : memref<72x16xf32, #tpu.memory_space<vmem>>, vector<72x16xf32>
    %cst = arith.constant dense<0.000000e+00> : vector<256x16xf32>
    %79 = tpu.matmul %75, %78, %cst {dimension_numbers = #tpu.dot_dimension_numbers<[1], [0], [0], [1], [0, 0, 1, 1], [], []>} : vector<256x72xf32>, vector<72x16xf32>, vector<256x16xf32> -> vector<256x16xf32>
    %80 = vector.extract_strided_slice %78 {offsets = [0, 0], sizes = [72, 8], strides = [1, 1]} : vector<72x16xf32> to vector<72x8xf32>
    %cst_84 = arith.constant dense<0.000000e+00> : vector<256x8xf32>
    %81 = tpu.matmul %77, %80, %cst_84 {dimension_numbers = #tpu.dot_dimension_numbers<[1], [0], [0], [1], [0, 0, 1, 1], [], []>} : vector<256x72xf32>, vector<72x8xf32>, vector<256x8xf32> -> vector<256x8xf32>
    %82 = vector.extract_strided_slice %79 {offsets = [0, 0], sizes = [256, 8], strides = [1, 1]} : vector<256x16xf32> to vector<256x8xf32>
    %83 = vector.extract_strided_slice %79 {offsets = [0, 8], sizes = [256, 8], strides = [1, 1]} : vector<256x16xf32> to vector<256x8xf32>
    %84 = arith.addf %83, %81 : vector<256x8xf32>
    %85 = tpu.concatenate %82, %84 in 1 : vector<256x8xf32>, vector<256x8xf32> -> vector<256x16xf32>
    %c0_85 = arith.constant 0 : index
    %c0_86 = arith.constant 0 : index
    %86 = vector.load %arg4[%c0_85, %c0_86] : memref<1x16xf32, #tpu.memory_space<vmem>>, vector<1x16xf32>
    %87 = vector.broadcast %86 : vector<1x16xf32> to vector<256x16xf32>
    %88 = arith.addf %85, %87 : vector<256x16xf32>
    %89 = tpu.transpose %88, [1, 0] : vector<256x16xf32> -> vector<16x256xf32>
    %c0_87 = arith.constant 0 : index
    %c0_88 = arith.constant 0 : index
    %c0_89 = arith.constant 0 : index
    %90 = vector.load %arg5[%c0_87, %c0_88, %c0_89] : memref<1x16x256xf32, #tpu.memory_space<vmem>>, vector<1x16x256xf32>
    %91 = vector.shape_cast %90 : vector<1x16x256xf32> to vector<16x256xf32>
    %92 = vector.shape_cast %89 : vector<16x256xf32> to vector<1x16x256xf32>
    tpu.vector_store %arg5[%c0_87, %c0_88, %c0_89], %92 {strides = array<i32>} : memref<1x16x256xf32, #tpu.memory_space<vmem>>, vector<1x16x256xf32>,
    return
  }
  func.func @transform_0(%arg0: i32, %arg1: i32) -> (i32, i32, i32, i32) {
    %c0_i32 = arith.constant 0 : i32
    %c0_i32_0 = arith.constant 0 : i32
    %c0_i32_1 = arith.constant 0 : i32
    %c0_i32_2 = arith.constant 0 : i32
    return %arg0, %c0_i32, %c0_i32_0, %c0_i32_1 : i32, i32, i32, i32
  }
  func.func @transform_1(%arg0: i32, %arg1: i32) -> (i32, i32) {
    %c0_i32 = arith.constant 0 : i32
    %c0_i32_0 = arith.constant 0 : i32
    %c0_i32_1 = arith.constant 0 : i32
    return %c0_i32, %c0_i32_0 : i32, i32
  }
  func.func @transform_2(%arg0: i32, %arg1: i32) -> (i32, i32) {
    %c0_i32 = arith.constant 0 : i32
    %c0_i32_0 = arith.constant 0 : i32
    %c0_i32_1 = arith.constant 0 : i32
    return %c0_i32, %c0_i32_0 : i32, i32
  }
  func.func @transform_3(%arg0: i32, %arg1: i32) -> (i32, i32, i32) {
    %c0_i32 = arith.constant 0 : i32
    %c0_i32_0 = arith.constant 0 : i32
    return %arg0, %c0_i32, %arg1 : i32, i32, i32
  }
}

</mosaic_0001>

<bundles_post_ra>
// kernel: tpu_custom_call.1
= control target key start
LH: loop header
LB: loop body
LE: loop exit
PB: predicated region body
PF: predicated region fallthrough
CT: control target
= control target key end

     0   :  { %8 = vsyncpa [#allocation5], 0  ;;  %s6920_s0 = inlined_call_operand.vmem [shape: f32[2,18,18,16], index: 0, kind: input, shape index: {}]   ;;  %s6921_s1 = inlined_call_operand.vmem [shape: f32[72,16], index: 1, kind: input, shape index: {}]   ;;  %s6922_s2 = inlined_call_operand.vmem [shape: f32[1,16], index: 2, kind: input, shape index: {}]   ;;  %s6923_s3 = inlined_call_operand.hbm [shape: f32[2,16,256], index: 3, kind: output, shape index: {}]  }
   0x1   :  { %10 = vsyncpa [#allocation5 + $0x1], 0  ;;  %s4243_s12 = smov 0   ;;  %s4245_s13 = smov 0  }
   0x2   :  { %s4247_s14 = smov 0   ;;  %s4249_s15 = smov 0  }
   0x3   :  { %s4251_s16 = smov 0   ;;  %s4253_s17 = smov 0  }
   0x4 LB: > { %s3779_s18 = sadd.s32 4294967295, %s4211_s17   ;;  %s3780_s19 = sadd.s32 4294967294, %s4211_s17   ;;  %s4211_s17 = sphi %s4253_s17, %s16_s17   ;;  %s4207_s16 = sphi %s4251_s16, %s6950_s16   ;;  %s4203_s15 = sphi %s4249_s15, %s6949_s15   ;;  %s4199_s14 = sphi %s4247_s14, %s6948_s14   ;;  %s4195_s13 = sphi %s4245_s13, %s6947_s13   ;;  %s4191_s12 = sphi %s4243_s12, %s6946_s12  }
   0x5   : > { %s28_s20 = sadd.s32 1, %s4207_s16  ;;  %s105_s21 = sadd.s32 1, %s4199_s14 }
   0x6   : > { %p30_p0 = scmp.ge.s32.totalorder %s28_s20, 2  ;;  %p115_p1 = scmp.ne.s32.totalorder %s4199_s14, %s4195_s13 }
   0x7   : > { %p116_p2 = scmp.eq.s32.totalorder %s3779_s18, 1  ;;  %p121_p3 = scmp.ne.s32.totalorder %s4195_s13, %s4191_s12 }
   0x8   : > { %s6952_s20 = smov (%p30_p0, %s28_s20), 0  ;;  %p122_p5 = scmp.eq.s32.totalorder %s3780_s19, 1 }
   0x9   : > { %p4283_p4 = por %p116_p2, %p115_p1  ;;  %s100_s23 = ssub.s32 %s4207_s16, %s6952_s20 }
   0xa   : > { %p3783_p6 = scmp.ge.s32.totalorder %s4211_s17, 1  ;;  %p103_p7 = scmp.eq.s32.totalorder %s100_s23, 0 }
   0xb   : > { %p4290_p8 = por %p122_p5, %p121_p3  ;;  %p154_p9 = scmp.lt.s32.totalorder %s4211_s17, 3 }
   0xc   : > { %s4296_s25 = scalar_select %p103_p7, %s4199_s14, %s105_s21  }
   0xd   : > { %p155_p10 = pnand %p3783_p6, %p154_p9 }
   0xf   : > { %158 = sbr.rel (%p155_p10) target bundleno = 1899 (0x76b), region = 32 }
  0x14   : > { %p178_p11 = scmp.lt.s32.totalorder %s4203_s15, 1  ;;  %vm219_vm0 = vcmask 64512   ;;  %s4213_s4 = smov 120   ;;  %vm572_vm1 = vcmask 130112   ;;  %vm797_vm2 = vcmask 195712   ;;  %vm1121_vm3 = vcmask 261312  }
  0x15   : > { %s4214_s5 = smov 8   ;;  %s4215_s6 = smov 16   ;;  %vm1442_vm4 = vcmask 326912   ;;  %vm1763_vm5 = vcmask 392512   ;;  %vm2087_vm6 = vcmask 458112   ;;  %vm2408_vm7 = vcmask 523712  }
  0x16   : > { %s179_s26 = scalar_select %p178_p11, %s4203_s15, 1  ;;  %vm2729_vm8 = vcmask 589312   ;;  %vm2963_vm9 = vcmask 588800  }
  0x17   : > { %s4216_s7 = smov 24   ;;  %s4217_s8 = smov 32  }
  0x18   : > { %s4066_s27 = smul.u32 432, %s179_s26  ;;  %s4218_s9 = smov 40  }
  0x19   : > { %s4219_s10 = smov 48   ;;  %s4220_s11 = smov 56  }
  0x1a   : > { %s4303_s30 = scalar_lea.vmem %s6920_s0, %s4066_s27  ;;  %s4221_s18 = smov 64  }
  0x1b   : > { %v4306_v0 = vld [vmem:[%s4303_s30 + $0x18] sm:$0xff]  ;;  %v187_v1 = vld [vmem:[%s4303_s30] sm:$0xff]  ;;  %v188_v3 = vld [vmem:[%s4303_s30 + $0x8] sm:$0xff]  ;;  %s4153_s28 = scalar_lea.hbm %s6923_s3, 64 }
  0x1c   : > { %288 = vrot.lane.b32.xlu1 %v4306_v0, %s4213_s4  ;;  %222 = vst.msk [vmem:[#allocation2 + $0x10] sm:$0xff] %vm219_vm0, %v4306_v0  ;;  %284 = vrot.lane.b32.xlu0 %v187_v1, %s4213_s4  ;;  %v4316_v2 = vld [vmem:[%s4303_s30 + $0x20] sm:$0xff]  ;;  %v4322_v4 = vld [vmem:[%s4303_s30 + $0x30] sm:$0xff] }
  0x1d   : > { %220 = vst.msk [vmem:[#allocation2] sm:$0xff] %vm219_vm0, %v187_v1  ;;  %v4326_v5 = vld [vmem:[%s4303_s30 + $0x50] sm:$0xff]  ;;  %292 = vrot.lane.b32.xlu2 %v4322_v4, %s4213_s4  ;;  %v4333_v6 = vld [vmem:[%s4303_s30 + $0x48] sm:$0xff]  ;;  %v4338_v7 = vld [vmem:[%s4303_s30 + $0x78] sm:$0xff] }
  0x1e   : > { %223 = vst.msk [vmem:[#allocation2 + $0x18] sm:$0xff] %vm219_vm0, %v4316_v2  ;;  %v4343_v8 = vld [vmem:[%s4303_s30 + $0x68] sm:$0xff]  ;;  %v4353_v9 = vld [vmem:[%s4303_s30 + $0x98] sm:$0xff]  ;;  %v4361_v11 = vld [vmem:[%s4303_s30 + $0x90] sm:$0xff] }
  0x1f   : > { %221 = vst.msk [vmem:[#allocation2 + $0x8] sm:$0xff] %vm219_vm0, %v188_v3  ;;  %v4356_v10 = vld [vmem:[%s4303_s30 + $0x38] sm:$0xff]  ;;  %v4370_v12 = vld [vmem:[%s4303_s30 + $0xc0] sm:$0xff]  ;;  %v4375_v13 = vld [vmem:[%s4303_s30 + $0xb0] sm:$0xff] }
  0x20   : > { %227 = vst.msk [vmem:[#allocation2 + $0x38] sm:$0xff] %vm219_vm0, %v4326_v5  ;;  %v4380_v14 = vld [vmem:[%s4303_s30 + $0x60] sm:$0xff]  ;;  %v4390_v16 = vld [vmem:[%s4303_s30 + $0xd8] sm:$0xff]  ;;  %v4404_v18 = vld [vmem:[%s4303_s30 + $0x108] sm:$0xff] }
  0x21   : > { %226 = vst.msk [vmem:[#allocation2 + $0x30] sm:$0xff] %vm219_vm0, %v4333_v6  ;;  %v4385_v15 = vld [vmem:[%s4303_s30 + $0xe0] sm:$0xff]  ;;  %v4411_v19 = vld [vmem:[%s4303_s30 + $0xf8] sm:$0xff]  ;;  %v4420_v20 = vld [vmem:[%s4303_s30 + $0xa8] sm:$0xff] }
  0x22   : > { %230 = vst.msk [vmem:[#allocation2 + $0x50] sm:$0xff] %vm219_vm0, %v4338_v7  ;;  %v4399_v17 = vld [vmem:[%s4303_s30 + $0x80] sm:$0xff]  ;;  %v4425_v21 = vld [vmem:[%s4303_s30 + $0x128] sm:$0xff]  ;;  %v4446_v24 = vld [vmem:[%s4303_s30 + $0x150] sm:$0xff] }
  0x23   : > { %229 = vst.msk [vmem:[#allocation2 + $0x48] sm:$0xff] %vm219_vm0, %v4343_v8  ;;  %v4432_v22 = vld [vmem:[%s4303_s30 + $0x120] sm:$0xff]  ;;  %v4441_v23 = vld [vmem:[%s4303_s30 + $0xc8] sm:$0xff]  ;;  %v4462_v26 = vld [vmem:[%s4303_s30 + $0xf0] sm:$0xff] }
  0x24   : > { %290 = vrot.lane.b32.xlu1 %v4316_v2, %s4213_s4  ;;  %286 = vrot.lane.b32.xlu0 %v188_v3, %s4213_s4  ;;  %224 = vst.msk [vmem:[#allocation2 + $0x20] sm:$0xff] %vm219_vm0, %v4322_v4  ;;  %v4453_v25 = vld [vmem:[%s4303_s30 + $0x140] sm:$0xff]  ;;  %v4467_v27 = vld [vmem:[%s4303_s30 + $0x170] sm:$0xff] }
  0x25   : > { %233 = vst.msk [vmem:[#allocation2 + $0x68] sm:$0xff] %vm219_vm0, %v4353_v9  ;;  %294 = vrot.lane.b32.xlu2 %v4356_v10, %s4213_s4  ;;  %v4474_v28 = vld [vmem:[%s4303_s30 + $0x168] sm:$0xff]  ;;  %v4483_v29 = vld [vmem:[%s4303_s30 + $0x110] sm:$0xff]  ;;  %v4494_v30 = vld [vmem:[%s4303_s30 + $0x138] sm:$0xff] }
  0x26   : > { %232 = vst.msk [vmem:[#allocation2 + $0x60] sm:$0xff] %vm219_vm0, %v4361_v11  ;;  %v4505_v31 = vld [vmem:[%s4303_s30 + $0x158] sm:$0xff]  ;;  %v4522_v32 = vld [vmem:[%s4303_s30 + $0x1] sm:$0xff]  ;;  %v4530_v34 = vld [vmem:[%s4303_s30 + $0x9] sm:$0xff] }
  0x27   : > { %225 = vst.msk [vmem:[#allocation2 + $0x28] sm:$0xff] %vm219_vm0, %v4356_v10  ;;  %v4527_v33 = vld [vmem:[%s4303_s30 + $0x19] sm:$0xff]  ;;  %v4537_v35 = vld [vmem:[%s4303_s30 + $0x21] sm:$0xff]  ;;  %v4545_v37 = vld [vmem:[%s4303_s30 + $0x31] sm:$0xff] }
  0x28   : > { %236 = vst.msk [vmem:[#allocation2 + $0x80] sm:$0xff] %vm219_vm0, %v4370_v12  ;;  %v4542_v36 = vld [vmem:[%s4303_s30 + $0x39] sm:$0xff]  ;;  %v4553_v39 = vld [vmem:[%s4303_s30 + $0x49] sm:$0xff]  ;;  %v4558_v40 = vld [vmem:[%s4303_s30 + $0x61] sm:$0xff] }
  0x29   : > { %235 = vst.msk [vmem:[#allocation2 + $0x78] sm:$0xff] %vm219_vm0, %v4375_v13  ;;  %v4561_v41 = vld [vmem:[%s4303_s30 + $0x51] sm:$0xff]  ;;  %v4569_v43 = vld [vmem:[%s4303_s30 + $0x69] sm:$0xff]  ;;  %v4574_v44 = vld [vmem:[%s4303_s30 + $0x81] sm:$0xff] }
  0x2a   : > { %228 = vst.msk [vmem:[#allocation2 + $0x40] sm:$0xff] %vm219_vm0, %v4380_v14  ;;  %v4577_v45 = vld [vmem:[%s4303_s30 + $0x79] sm:$0xff]  ;;  %v4585_v47 = vld [vmem:[%s4303_s30 + $0x91] sm:$0xff]  ;;  %v4592_v50 = vld [vmem:[%s4303_s30 + $0xa9] sm:$0xff] }
  0x2b   : > { %239 = vst.msk [vmem:[#allocation2 + $0x98] sm:$0xff] %vm219_vm0, %v4385_v15  ;;  %v4595_v51 = vld [vmem:[%s4303_s30 + $0x99] sm:$0xff]  ;;  %v4603_v53 = vld [vmem:[%s4303_s30 + $0xb1] sm:$0xff]  ;;  %v4610_v56 = vld [vmem:[%s4303_s30 + $0xc9] sm:$0xff] }
  0x2c   : > { %298 = vrot.lane.b32.xlu1 %v4326_v5, %s4213_s4  ;;  %296 = vrot.lane.b32.xlu0 %v4333_v6, %s4213_s4  ;;  %238 = vst.msk [vmem:[#allocation2 + $0x90] sm:$0xff] %vm219_vm0, %v4390_v16  ;;  %v4613_v57 = vld [vmem:[%s4303_s30 + $0xc1] sm:$0xff]  ;;  %v4621_v59 = vld [vmem:[%s4303_s30 + $0xd9] sm:$0xff] }
  0x2d   : > { %231 = vst.msk [vmem:[#allocation2 + $0x58] sm:$0xff] %vm219_vm0, %v4399_v17  ;;  %300 = vrot.lane.b32.xlu2 %v4380_v14, %s4213_s4  ;;  %v4628_v62 = vld [vmem:[%s4303_s30 + $0xf1] sm:$0xff]  ;;  %v4631_v63 = vld [vmem:[%s4303_s30 + $0xe1] sm:$0xff]  ;;  %v4639_v3 = vld [vmem:[%s4303_s30 + $0xf9] sm:$0xff] }
  0x2e   : > { %242 = vst.msk [vmem:[#allocation2 + $0xb0] sm:$0xff] %vm219_vm0, %v4404_v18 }
  0x2f   : > { %241 = vst.msk [vmem:[#allocation2 + $0xa8] sm:$0xff] %vm219_vm0, %v4411_v19 }
  0x30   : > { %234 = vst.msk [vmem:[#allocation2 + $0x70] sm:$0xff] %vm219_vm0, %v4420_v20 }
  0x31   : > { %245 = vst.msk [vmem:[#allocation2 + $0xc8] sm:$0xff] %vm219_vm0, %v4425_v21 }
  0x32   : > { %244 = vst.msk [vmem:[#allocation2 + $0xc0] sm:$0xff] %vm219_vm0, %v4432_v22 }
  0x33   : > { %237 = vst.msk [vmem:[#allocation2 + $0x88] sm:$0xff] %vm219_vm0, %v4441_v23 }
  0x34   : > { %304 = vrot.lane.b32.xlu1 %v4338_v7, %s4213_s4  ;;  %302 = vrot.lane.b32.xlu0 %v4343_v8, %s4213_s4  ;;  %6936 = vst [vmem:[#allocation7_spill] sm:$0xff] %v4446_v24 }
  0x35   : > { %306 = vrot.lane.b32.xlu2 %v4399_v17, %s4213_s4  ;;  %248 = vst.msk [vmem:[#allocation2 + $0xe0] sm:$0xff] %vm219_vm0, %v4446_v24 }
  0x36   : > { %6937 = vst [vmem:[#allocation8_spill] sm:$0xff] %v4453_v25 }
  0x37   : > { %247 = vst.msk [vmem:[#allocation2 + $0xd8] sm:$0xff] %vm219_vm0, %v4453_v25 }
  0x38   : > { %240 = vst.msk [vmem:[#allocation2 + $0xa0] sm:$0xff] %vm219_vm0, %v4462_v26 }
  0x39   : > { %6938 = vst [vmem:[#allocation9_spill] sm:$0xff] %v4467_v27 }
  0x3a   : > { %251 = vst.msk [vmem:[#allocation2 + $0xf8] sm:$0xff] %vm219_vm0, %v4467_v27 }
  0x3b   : > { %6939 = vst [vmem:[#allocation10_spill] sm:$0xff] %v4474_v28 }
  0x3c   : > { %310 = vrot.lane.b32.xlu1 %v4353_v9, %s4213_s4  ;;  %308 = vrot.lane.b32.xlu0 %v4361_v11, %s4213_s4  ;;  %250 = vst.msk [vmem:[#allocation2 + $0xf0] sm:$0xff] %vm219_vm0, %v4474_v28 }
  0x3d   : > { %312 = vrot.lane.b32.xlu2 %v4420_v20, %s4213_s4  ;;  %243 = vst.msk [vmem:[#allocation2 + $0xb8] sm:$0xff] %vm219_vm0, %v4483_v29 }
  0x3e   : > { %246 = vst.msk [vmem:[#allocation2 + $0xd0] sm:$0xff] %vm219_vm0, %v4494_v30 }
  0x3f   : > { %6940 = vst [vmem:[#allocation11_spill] sm:$0xff] %v4505_v31 }
  0x40   : > { %249 = vst.msk [vmem:[#allocation2 + $0xe8] sm:$0xff] %vm219_vm0, %v4505_v31 }
  0x44   : > { %316 = vrot.lane.b32.xlu1 %v4370_v12, %s4213_s4  ;;  %314 = vrot.lane.b32.xlu0 %v4375_v13, %s4213_s4 }
  0x45   : > { %318 = vrot.lane.b32.xlu2 %v4441_v23, %s4213_s4 }
  0x4c   : > { %322 = vrot.lane.b32.xlu1 %v4385_v15, %s4213_s4  ;;  %320 = vrot.lane.b32.xlu0 %v4390_v16, %s4213_s4 }
  0x4d   : > { %324 = vrot.lane.b32.xlu2 %v4462_v26, %s4213_s4 }
  0x54   : > { %328 = vrot.lane.b32.xlu1 %v4404_v18, %s4213_s4  ;;  %326 = vrot.lane.b32.xlu0 %v4411_v19, %s4213_s4 }
  0x55   : > { %330 = vrot.lane.b32.xlu2 %v4483_v29, %s4213_s4 }
  0x5c   : > { %334 = vrot.lane.b32.xlu1 %v4425_v21, %s4213_s4  ;;  %332 = vrot.lane.b32.xlu0 %v4432_v22, %s4213_s4 }
  0x5d   : > { %336 = vrot.lane.b32.xlu2 %v4494_v30, %s4213_s4 }
  0x64   : > { %340 = vrot.lane.b32.xlu1 %v4446_v24, %s4213_s4  ;;  %338 = vrot.lane.b32.xlu0 %v4453_v25, %s4213_s4  ;;  %v4725_v25 = vld [vmem:[%s4303_s30 + $0x1a] sm:$0xff] }
  0x65   : > { %342 = vrot.lane.b32.xlu2 %v4505_v31, %s4213_s4 }
  0x6c   : > { %346 = vrot.lane.b32.xlu1 %v4467_v27, %s4213_s4  ;;  %344 = vrot.lane.b32.xlu0 %v4474_v28, %s4213_s4  ;;  %s4047_s4 = sshll.u32 %s4203_s15, 5 }
  0x6d   : > { %476 = vrot.lane.b32.xlu2 %v4522_v32, %s4214_s5 }
  0x74   : > { %480 = vrot.lane.b32.xlu1 %v4527_v33, %s4214_s5  ;;  %478 = vrot.lane.b32.xlu0 %v4530_v34, %s4214_s5 }
  0x75   : > { %482 = vrot.lane.b32.xlu2 %v4537_v35, %s4214_s5 }
  0x77   : > { %v293_v38 = vpop.permute.xlu2 %292 }
  0x78   : > { %384 = vst.msk [vmem:[#allocation3 + $0x20] sm:$0xff] %vm219_vm0, %v293_v38 }
  0x79   : > { %609 = vst.msk [vmem:[#allocation3 + $0x20] sm:$0xff] %vm572_vm1, %v4545_v37 }
  0x7c   : > { %486 = vrot.lane.b32.xlu1 %v4542_v36, %s4214_s5  ;;  %484 = vrot.lane.b32.xlu0 %v4545_v37, %s4214_s5 }
  0x7d   : > { %488 = vrot.lane.b32.xlu2 %v4553_v39, %s4214_s5 }
  0x7f   : > { %v295_v42 = vpop.permute.xlu2 %294 }
  0x80   : > { %385 = vst.msk [vmem:[#allocation3 + $0x28] sm:$0xff] %vm219_vm0, %v295_v42 }
  0x81   : > { %610 = vst.msk [vmem:[#allocation3 + $0x28] sm:$0xff] %vm572_vm1, %v4542_v36  ;;  %v4772_v36 = vld [vmem:[%s4303_s30 + $0x52] sm:$0xff] }
  0x84   : > { %492 = vrot.lane.b32.xlu1 %v4558_v40, %s4214_s5  ;;  %490 = vrot.lane.b32.xlu0 %v4561_v41, %s4214_s5 }
  0x85   : > { %494 = vrot.lane.b32.xlu2 %v4569_v43, %s4214_s5 }
  0x87   : > { %v301_v46 = vpop.permute.xlu2 %300 }
  0x88   : > { %388 = vst.msk [vmem:[#allocation3 + $0x40] sm:$0xff] %vm219_vm0, %v301_v46  ;;  %v4646_v46 = vld [vmem:[%s4303_s30 + $0x111] sm:$0xff] }
  0x89   : > { %613 = vst.msk [vmem:[#allocation3 + $0x40] sm:$0xff] %vm572_vm1, %v4558_v40  ;;  %v4781_v40 = vld [vmem:[%s4303_s30 + $0x6a] sm:$0xff] }
  0x8c   : > { %498 = vrot.lane.b32.xlu1 %v4574_v44, %s4214_s5  ;;  %496 = vrot.lane.b32.xlu0 %v4577_v45, %s4214_s5 }
  0x8d   : > { %500 = vrot.lane.b32.xlu2 %v4585_v47, %s4214_s5 }
  0x8e   : > { %v289_v48 = vpop.permute.xlu1 %288  ;;  %v285_v49 = vpop.permute.xlu0 %284 }
  0x8f   : > { %382 = vst.msk [vmem:[#allocation3 + $0x10] sm:$0xff] %vm219_vm0, %v289_v48  ;;  %v307_v52 = vpop.permute.xlu2 %306  ;;  %v4649_v48 = vld [vmem:[%s4303_s30 + $0x109] sm:$0xff] }
  0x90   : > { %380 = vst.msk [vmem:[#allocation3] sm:$0xff] %vm219_vm0, %v285_v49 }
  0x91   : > { %391 = vst.msk [vmem:[#allocation3 + $0x58] sm:$0xff] %vm219_vm0, %v307_v52  ;;  %v4657_v52 = vld [vmem:[%s4303_s30 + $0x121] sm:$0xff] }
  0x92   : > { %605 = vst.msk [vmem:[#allocation3] sm:$0xff] %vm572_vm1, %v4522_v32 }
  0x93   : > { %607 = vst.msk [vmem:[#allocation3 + $0x10] sm:$0xff] %vm572_vm1, %v4527_v33  ;;  %v4750_v33 = vld [vmem:[%s4303_s30 + $0x4a] sm:$0xff] }
  0x94   : > { %504 = vrot.lane.b32.xlu1 %v4592_v50, %s4214_s5  ;;  %502 = vrot.lane.b32.xlu0 %v4595_v51, %s4214_s5  ;;  %616 = vst.msk [vmem:[#allocation3 + $0x58] sm:$0xff] %vm572_vm1, %v4574_v44  ;;  %v4801_v44 = vld [vmem:[%s4303_s30 + $0x7a] sm:$0xff] }
  0x95   : > { %506 = vrot.lane.b32.xlu2 %v4603_v53, %s4214_s5 }
  0x96   : > { %v291_v54 = vpop.permute.xlu1 %290  ;;  %v287_v55 = vpop.permute.xlu0 %286 }
  0x97   : > { %383 = vst.msk [vmem:[#allocation3 + $0x18] sm:$0xff] %vm219_vm0, %v291_v54  ;;  %v313_v58 = vpop.permute.xlu2 %312 }
  0x98   : > { %381 = vst.msk [vmem:[#allocation3 + $0x8] sm:$0xff] %vm219_vm0, %v287_v55 }
  0x99   : > { %394 = vst.msk [vmem:[#allocation3 + $0x70] sm:$0xff] %vm219_vm0, %v313_v58  ;;  %v4664_v58 = vld [vmem:[%s4303_s30 + $0x139] sm:$0xff] }
  0x9a   : > { %606 = vst.msk [vmem:[#allocation3 + $0x8] sm:$0xff] %vm572_vm1, %v4530_v34  ;;  %v4753_v34 = vld [vmem:[%s4303_s30 + $0x3a] sm:$0xff] }
  0x9b   : > { %608 = vst.msk [vmem:[#allocation3 + $0x18] sm:$0xff] %vm572_vm1, %v4537_v35 }
  0x9c   : > { %510 = vrot.lane.b32.xlu1 %v4610_v56, %s4214_s5  ;;  %508 = vrot.lane.b32.xlu0 %v4613_v57, %s4214_s5  ;;  %619 = vst.msk [vmem:[#allocation3 + $0x70] sm:$0xff] %vm572_vm1, %v4592_v50  ;;  %v4810_v50 = vld [vmem:[%s4303_s30 + $0x92] sm:$0xff] }
  0x9d   : > { %512 = vrot.lane.b32.xlu2 %v4621_v59, %s4214_s5 }
  0x9e   : > { %v299_v60 = vpop.permute.xlu1 %298  ;;  %v297_v61 = vpop.permute.xlu0 %296 }
  0x9f   : > { %387 = vst.msk [vmem:[#allocation3 + $0x38] sm:$0xff] %vm219_vm0, %v299_v60  ;;  %v319_v1 = vpop.permute.xlu2 %318  ;;  %v4667_v60 = vld [vmem:[%s4303_s30 + $0x129] sm:$0xff] }
  0xa0   : > { %386 = vst.msk [vmem:[#allocation3 + $0x30] sm:$0xff] %vm219_vm0, %v297_v61 }
  0xa1   : > { %397 = vst.msk [vmem:[#allocation3 + $0x88] sm:$0xff] %vm219_vm0, %v319_v1  ;;  %v4675_v1 = vld [vmem:[%s4303_s30 + $0x141] sm:$0xff] }
  0xa2   : > { %611 = vst.msk [vmem:[#allocation3 + $0x30] sm:$0xff] %vm572_vm1, %v4553_v39 }
  0xa3   : > { %612 = vst.msk [vmem:[#allocation3 + $0x38] sm:$0xff] %vm572_vm1, %v4561_v41  ;;  %v4784_v41 = vld [vmem:[%s4303_s30 + $0x62] sm:$0xff] }
  0xa4   : > { %516 = vrot.lane.b32.xlu1 %v4628_v62, %s4214_s5  ;;  %514 = vrot.lane.b32.xlu0 %v4631_v63, %s4214_s5  ;;  %622 = vst.msk [vmem:[#allocation3 + $0x88] sm:$0xff] %vm572_vm1, %v4610_v56  ;;  %v4830_v56 = vld [vmem:[%s4303_s30 + $0x9a] sm:$0xff] }
  0xa5   : > { %518 = vrot.lane.b32.xlu2 %v4639_v3, %s4214_s5 }
  0xa6   : > { %v305_v38 = vpop.permute.xlu1 %304  ;;  %v303_v42 = vpop.permute.xlu0 %302 }
  0xa7   : > { %390 = vst.msk [vmem:[#allocation3 + $0x50] sm:$0xff] %vm219_vm0, %v305_v38  ;;  %v325_v49 = vpop.permute.xlu2 %324 }
  0xa8   : > { %389 = vst.msk [vmem:[#allocation3 + $0x48] sm:$0xff] %vm219_vm0, %v303_v42 }
  0xa9   : > { %400 = vst.msk [vmem:[#allocation3 + $0xa0] sm:$0xff] %vm219_vm0, %v325_v49  ;;  %v4682_v49 = vld [vmem:[%s4303_s30 + $0x159] sm:$0xff] }
  0xaa   : > { %614 = vst.msk [vmem:[#allocation3 + $0x48] sm:$0xff] %vm572_vm1, %v4569_v43 }
  0xab   : > { %615 = vst.msk [vmem:[#allocation3 + $0x50] sm:$0xff] %vm572_vm1, %v4577_v45 }
  0xac   : > { %522 = vrot.lane.b32.xlu1 %v4646_v46, %s4214_s5  ;;  %520 = vrot.lane.b32.xlu0 %v4649_v48, %s4214_s5  ;;  %625 = vst.msk [vmem:[#allocation3 + $0xa0] sm:$0xff] %vm572_vm1, %v4628_v62  ;;  %v4843_v62 = vld [vmem:[%s4303_s30 + $0xb2] sm:$0xff] }
  0xad   : > { %524 = vrot.lane.b32.xlu2 %v4657_v52, %s4214_s5 }
  0xae   : > { %v311_v54 = vpop.permute.xlu1 %310  ;;  %v309_v55 = vpop.permute.xlu0 %308 }
  0xaf   : > { %393 = vst.msk [vmem:[#allocation3 + $0x68] sm:$0xff] %vm219_vm0, %v311_v54  ;;  %v331_v61 = vpop.permute.xlu2 %330  ;;  %v4685_v54 = vld [vmem:[%s4303_s30 + $0x151] sm:$0xff] }
  0xb0   : > { %392 = vst.msk [vmem:[#allocation3 + $0x60] sm:$0xff] %vm219_vm0, %v309_v55 }
  0xb1   : > { %403 = vst.msk [vmem:[#allocation3 + $0xb8] sm:$0xff] %vm219_vm0, %v331_v61  ;;  %v4693_v61 = vld [vmem:[%s4303_s30 + $0x169] sm:$0xff] }
  0xb2   : > { %617 = vst.msk [vmem:[#allocation3 + $0x60] sm:$0xff] %vm572_vm1, %v4585_v47 }
  0xb3   : > { %618 = vst.msk [vmem:[#allocation3 + $0x68] sm:$0xff] %vm572_vm1, %v4595_v51  ;;  %v4813_v51 = vld [vmem:[%s4303_s30 + $0x82] sm:$0xff] }
  0xb4   : > { %528 = vrot.lane.b32.xlu1 %v4664_v58, %s4214_s5  ;;  %526 = vrot.lane.b32.xlu0 %v4667_v60, %s4214_s5  ;;  %628 = vst.msk [vmem:[#allocation3 + $0xb8] sm:$0xff] %vm572_vm1, %v4646_v46  ;;  %v4861_v46 = vld [vmem:[%s4303_s30 + $0xc2] sm:$0xff] }
  0xb5   : > { %530 = vrot.lane.b32.xlu2 %v4675_v1, %s4214_s5 }
  0xb6   : > { %v317_v38 = vpop.permute.xlu1 %316  ;;  %v315_v42 = vpop.permute.xlu0 %314 }
  0xb7   : > { %396 = vst.msk [vmem:[#allocation3 + $0x80] sm:$0xff] %vm219_vm0, %v317_v38  ;;  %v337_v55 = vpop.permute.xlu2 %336 }
  0xb8   : > { %395 = vst.msk [vmem:[#allocation3 + $0x78] sm:$0xff] %vm219_vm0, %v315_v42  ;;  %v4700_v42 = vld [vmem:[%s4303_s30 + $0x2] sm:$0xff] }
  0xb9   : > { %406 = vst.msk [vmem:[#allocation3 + $0xd0] sm:$0xff] %vm219_vm0, %v337_v55  ;;  %v4703_v55 = vld [vmem:[%s4303_s30 + $0x171] sm:$0xff] }
  0xba   : > { %620 = vst.msk [vmem:[#allocation3 + $0x78] sm:$0xff] %vm572_vm1, %v4603_v53 }
  0xbb   : > { %621 = vst.msk [vmem:[#allocation3 + $0x80] sm:$0xff] %vm572_vm1, %v4613_v57 }
  0xbc   : > { %534 = vrot.lane.b32.xlu1 %v4682_v49, %s4214_s5  ;;  %532 = vrot.lane.b32.xlu0 %v4685_v54, %s4214_s5  ;;  %631 = vst.msk [vmem:[#allocation3 + $0xd0] sm:$0xff] %vm572_vm1, %v4664_v58  ;;  %v4871_v58 = vld [vmem:[%s4303_s30 + $0xda] sm:$0xff] }
  0xbd   : > { %536 = vrot.lane.b32.xlu2 %v4693_v61, %s4214_s5 }
  0xbe   : > { %v323_v38 = vpop.permute.xlu1 %322  ;;  %v321_v28 = vpop.permute.xlu0 %320 }
  0xbf   : > { %399 = vst.msk [vmem:[#allocation3 + $0x98] sm:$0xff] %vm219_vm0, %v323_v38  ;;  %v343_v27 = vpop.permute.xlu2 %342  ;;  %v4711_v38 = vld [vmem:[%s4303_s30 + $0xa] sm:$0xff] }
  0xc0   : > { %398 = vst.msk [vmem:[#allocation3 + $0x90] sm:$0xff] %vm219_vm0, %v321_v28 }
  0xc1   : > { %409 = vst.msk [vmem:[#allocation3 + $0xe8] sm:$0xff] %vm219_vm0, %v343_v27  ;;  %v4722_v27 = vld [vmem:[%s4303_s30 + $0x22] sm:$0xff] }
  0xc2   : > { %623 = vst.msk [vmem:[#allocation3 + $0x90] sm:$0xff] %vm572_vm1, %v4621_v59 }
  0xc3   : > { %624 = vst.msk [vmem:[#allocation3 + $0x98] sm:$0xff] %vm572_vm1, %v4631_v63  ;;  %v4846_v63 = vld [vmem:[%s4303_s30 + $0xaa] sm:$0xff] }
  0xc4   : > { %701 = vrot.lane.b32.xlu1 %v4700_v42, %s4215_s6  ;;  %538 = vrot.lane.b32.xlu0 %v4703_v55, %s4214_s5  ;;  %634 = vst.msk [vmem:[#allocation3 + $0xe8] sm:$0xff] %vm572_vm1, %v4682_v49  ;;  %v4885_v49 = vld [vmem:[%s4303_s30 + $0xe2] sm:$0xff] }
  0xc5   : > { %703 = vrot.lane.b32.xlu2 %v4711_v38, %s4215_s6 }
  0xc6   : > { %v329_v28 = vpop.permute.xlu1 %328  ;;  %v327_v31 = vpop.permute.xlu0 %326 }
  0xc7   : > { %402 = vst.msk [vmem:[#allocation3 + $0xb0] sm:$0xff] %vm219_vm0, %v329_v28  ;;  %v477_v24 = vpop.permute.xlu2 %476  ;;  %v4896_v28 = vld [vmem:[%s4303_s30 + $0xf2] sm:$0xff] }
  0xc8   : > { %401 = vst.msk [vmem:[#allocation3 + $0xa8] sm:$0xff] %vm219_vm0, %v327_v31 }
  0xc9   : > { %573 = vst.msk [vmem:[#allocation2] sm:$0xff] %vm572_vm1, %v477_v24  ;;  %v4744_v24 = vld [vmem:[%s4303_s30 + $0x32] sm:$0xff] }
  0xca   : > { %626 = vst.msk [vmem:[#allocation3 + $0xa8] sm:$0xff] %vm572_vm1, %v4639_v3 }
  0xcb   : > { %627 = vst.msk [vmem:[#allocation3 + $0xb0] sm:$0xff] %vm572_vm1, %v4649_v48 }
  0xcc   : > { %707 = vrot.lane.b32.xlu1 %v4722_v27, %s4215_s6  ;;  %705 = vrot.lane.b32.xlu0 %v4725_v25, %s4215_s6 }
  0xcd   : > { %709 = vrot.lane.b32.xlu2 %v4744_v24, %s4215_s6 }
  0xce   : > { %v335_v31 = vpop.permute.xlu1 %334  ;;  %v333_v32 = vpop.permute.xlu0 %332 }
  0xcf   : > { %405 = vst.msk [vmem:[#allocation3 + $0xc8] sm:$0xff] %vm219_vm0, %v335_v31  ;;  %v4757_v35 = vpop.permute.xlu2 %482 }
  0xd0   : > { %404 = vst.msk [vmem:[#allocation3 + $0xc0] sm:$0xff] %vm219_vm0, %v333_v32  ;;  %v4904_v32 = vld [vmem:[%s4303_s30 + $0x10a] sm:$0xff] }
  0xd1   : > { %629 = vst.msk [vmem:[#allocation3 + $0xc0] sm:$0xff] %vm572_vm1, %v4657_v52 }
  0xd2   : > { %630 = vst.msk [vmem:[#allocation3 + $0xc8] sm:$0xff] %vm572_vm1, %v4667_v60  ;;  %v4874_v60 = vld [vmem:[%s4303_s30 + $0xca] sm:$0xff] }
  0xd3   : > { %576 = vst.msk [vmem:[#allocation2 + $0x18] sm:$0xff] %vm572_vm1, %v4757_v35 }
  0xd4   : > { %713 = vrot.lane.b32.xlu1 %v4750_v33, %s4215_s6  ;;  %711 = vrot.lane.b32.xlu0 %v4753_v34, %s4215_s6 }
  0xd5   : > { %715 = vrot.lane.b32.xlu2 %v4772_v36, %s4215_s6 }
  0xd6   : > { %v341_v37 = vpop.permute.xlu1 %340  ;;  %v339_v39 = vpop.permute.xlu0 %338 }
  0xd7   : > { %408 = vst.msk [vmem:[#allocation3 + $0xe0] sm:$0xff] %vm219_vm0, %v341_v37  ;;  %v489_v43 = vpop.permute.xlu2 %488 }
  0xd8   : > { %407 = vst.msk [vmem:[#allocation3 + $0xd8] sm:$0xff] %vm219_vm0, %v339_v39  ;;  %v4911_v39 = vld [vmem:[%s4303_s30 + $0x122] sm:$0xff] }
  0xd9   : > { %632 = vst.msk [vmem:[#allocation3 + $0xd8] sm:$0xff] %vm572_vm1, %v4675_v1 }
  0xda   : > { %633 = vst.msk [vmem:[#allocation3 + $0xe0] sm:$0xff] %vm572_vm1, %v4685_v54 }
  0xdb   : > { %579 = vst.msk [vmem:[#allocation2 + $0x30] sm:$0xff] %vm572_vm1, %v489_v43  ;;  %v4914_v43 = vld [vmem:[%s4303_s30 + $0x112] sm:$0xff] }
  0xdc   : > { %719 = vrot.lane.b32.xlu1 %v4781_v40, %s4215_s6  ;;  %717 = vrot.lane.b32.xlu0 %v4784_v41, %s4215_s6 }
  0xdd   : > { %721 = vrot.lane.b32.xlu2 %v4801_v44, %s4215_s6 }
  0xde   : > { %v347_v45 = vpop.permute.xlu1 %346  ;;  %v345_v47 = vpop.permute.xlu0 %344 }
  0xdf   : > { %411 = vst.msk [vmem:[#allocation3 + $0xf8] sm:$0xff] %vm219_vm0, %v347_v45  ;;  %v495_v53 = vpop.permute.xlu2 %494 }
  0xe0   : > { %410 = vst.msk [vmem:[#allocation3 + $0xf0] sm:$0xff] %vm219_vm0, %v345_v47  ;;  %v4922_v47 = vld [vmem:[%s4303_s30 + $0x12a] sm:$0xff] }
  0xe1   : > { %635 = vst.msk [vmem:[#allocation3 + $0xf0] sm:$0xff] %vm572_vm1, %v4693_v61 }
  0xe2   : > { %636 = vst.msk [vmem:[#allocation3 + $0xf8] sm:$0xff] %vm572_vm1, %v4703_v55  ;;  %v4893_v55 = vld [vmem:[%s4303_s30 + $0xfa] sm:$0xff] }
  0xe3   : > { %582 = vst.msk [vmem:[#allocation2 + $0x48] sm:$0xff] %vm572_vm1, %v495_v53 }
  0xe4   : > { %725 = vrot.lane.b32.xlu1 %v4810_v50, %s4215_s6  ;;  %723 = vrot.lane.b32.xlu0 %v4813_v51, %s4215_s6 }
  0xe5   : > { %727 = vrot.lane.b32.xlu2 %v4830_v56, %s4215_s6 }
  0xe6   : > { %v481_v57 = vpop.permute.xlu1 %480  ;;  %v479_v59 = vpop.permute.xlu0 %478 }
  0xe7   : > { %v501_v3 = vpop.permute.xlu2 %500  ;;  %575 = vst.msk [vmem:[#allocation2 + $0x10] sm:$0xff] %vm572_vm1, %v481_v57 }
  0xe8   : > { %574 = vst.msk [vmem:[#allocation2 + $0x8] sm:$0xff] %vm572_vm1, %v479_v59  ;;  %v4929_v59 = vld [vmem:[%s4303_s30 + $0x142] sm:$0xff] }
  0xe9   : > { %585 = vst.msk [vmem:[#allocation2 + $0x60] sm:$0xff] %vm572_vm1, %v501_v3  ;;  %v4932_v3 = vld [vmem:[%s4303_s30 + $0x13a] sm:$0xff] }
  0xec   : > { %731 = vrot.lane.b32.xlu1 %v4843_v62, %s4215_s6  ;;  %729 = vrot.lane.b32.xlu0 %v4846_v63, %s4215_s6 }
  0xed   : > { %733 = vrot.lane.b32.xlu2 %v4861_v46, %s4215_s6 }
  0xee   : > { %v487_v48 = vpop.permute.xlu1 %486  ;;  %v485_v52 = vpop.permute.xlu0 %484 }
  0xef   : > { %578 = vst.msk [vmem:[#allocation2 + $0x28] sm:$0xff] %vm572_vm1, %v487_v48  ;;  %v507_v1 = vpop.permute.xlu2 %506 }
  0xf0   : > { %577 = vst.msk [vmem:[#allocation2 + $0x20] sm:$0xff] %vm572_vm1, %v485_v52  ;;  %v4940_v52 = vld [vmem:[%s4303_s30 + $0x152] sm:$0xff] }
  0xf1   : > { %588 = vst.msk [vmem:[#allocation2 + $0x78] sm:$0xff] %vm572_vm1, %v507_v1 }
  0xf4   : > { %737 = vrot.lane.b32.xlu1 %v4871_v58, %s4215_s6  ;;  %735 = vrot.lane.b32.xlu0 %v4874_v60, %s4215_s6 }
  0xf5   : > { %739 = vrot.lane.b32.xlu2 %v4885_v49, %s4215_s6 }
  0xf6   : > { %v493_v54 = vpop.permute.xlu1 %492  ;;  %v491_v61 = vpop.permute.xlu0 %490 }
  0xf7   : > { %581 = vst.msk [vmem:[#allocation2 + $0x40] sm:$0xff] %vm572_vm1, %v493_v54  ;;  %v513_v31 = vpop.permute.xlu2 %512 }
  0xf8   : > { %580 = vst.msk [vmem:[#allocation2 + $0x38] sm:$0xff] %vm572_vm1, %v491_v61  ;;  %v4947_v61 = vld [vmem:[%s4303_s30 + $0x16a] sm:$0xff] }
  0xf9   : > { %591 = vst.msk [vmem:[#allocation2 + $0x90] sm:$0xff] %vm572_vm1, %v513_v31  ;;  %v4950_v31 = vld [vmem:[%s4303_s30 + $0x15a] sm:$0xff] }
  0xfc   : > { %743 = vrot.lane.b32.xlu1 %v4893_v55, %s4215_s6  ;;  %741 = vrot.lane.b32.xlu0 %v4896_v28, %s4215_s6 }
  0xfd   : > { %745 = vrot.lane.b32.xlu2 %v4904_v32, %s4215_s6 }
  0xfe   : > { %v499_v35 = vpop.permute.xlu1 %498  ;;  %v497_v37 = vpop.permute.xlu0 %496 }
  0xff   : > { %584 = vst.msk [vmem:[#allocation2 + $0x58] sm:$0xff] %vm572_vm1, %v499_v35  ;;  %v519_v45 = vpop.permute.xlu2 %518 }
 0x100   : > { %583 = vst.msk [vmem:[#allocation2 + $0x50] sm:$0xff] %vm572_vm1, %v497_v37  ;;  %v4958_v37 = vld [vmem:[%s4303_s30 + $0x172] sm:$0xff] }
 0x101   : > { %594 = vst.msk [vmem:[#allocation2 + $0xa8] sm:$0xff] %vm572_vm1, %v519_v45 }
 0x104   : > { %749 = vrot.lane.b32.xlu1 %v4911_v39, %s4215_s6  ;;  %747 = vrot.lane.b32.xlu0 %v4914_v43, %s4215_s6 }
 0x105   : > { %751 = vrot.lane.b32.xlu2 %v4922_v47, %s4215_s6 }
 0x106   : > { %v505_v53 = vpop.permute.xlu1 %504  ;;  %v503_v57 = vpop.permute.xlu0 %502 }
 0x107   : > { %587 = vst.msk [vmem:[#allocation2 + $0x70] sm:$0xff] %vm572_vm1, %v505_v53  ;;  %v525_v48 = vpop.permute.xlu2 %524 }
 0x108   : > { %586 = vst.msk [vmem:[#allocation2 + $0x68] sm:$0xff] %vm572_vm1, %v503_v57 }
 0x109   : > { %597 = vst.msk [vmem:[#allocation2 + $0xc0] sm:$0xff] %vm572_vm1, %v525_v48 }
 0x10c   : > { %755 = vrot.lane.b32.xlu1 %v4929_v59, %s4215_s6  ;;  %753 = vrot.lane.b32.xlu0 %v4932_v3, %s4215_s6 }
 0x10d   : > { %757 = vrot.lane.b32.xlu2 %v4940_v52, %s4215_s6 }
 0x10e   : > { %v511_v1 = vpop.permute.xlu1 %510  ;;  %v509_v54 = vpop.permute.xlu0 %508 }
 0x10f   : > { %590 = vst.msk [vmem:[#allocation2 + $0x88] sm:$0xff] %vm572_vm1, %v511_v1  ;;  %v531_v35 = vpop.permute.xlu2 %530 }
 0x110   : > { %589 = vst.msk [vmem:[#allocation2 + $0x80] sm:$0xff] %vm572_vm1, %v509_v54 }
 0x111   : > { %600 = vst.msk [vmem:[#allocation2 + $0xd8] sm:$0xff] %vm572_vm1, %v531_v35 }
 0x114   : > { %761 = vrot.lane.b32.xlu1 %v4947_v61, %s4215_s6  ;;  %759 = vrot.lane.b32.xlu0 %v4950_v31, %s4215_s6 }
 0x115   : > { %763 = vrot.lane.b32.xlu2 %v4958_v37, %s4215_s6 }
 0x116   : > { %v517_v45 = vpop.permute.xlu1 %516  ;;  %v515_v53 = vpop.permute.xlu0 %514 }
 0x117   : > { %593 = vst.msk [vmem:[#allocation2 + $0xa0] sm:$0xff] %vm572_vm1, %v517_v45  ;;  %v537_v57 = vpop.permute.xlu2 %536 }
 0x118   : > { %592 = vst.msk [vmem:[#allocation2 + $0x98] sm:$0xff] %vm572_vm1, %v515_v53 }
 0x119   : > { %603 = vst.msk [vmem:[#allocation2 + $0xf0] sm:$0xff] %vm572_vm1, %v537_v57 }
 0x11c   : > { %832 = vrot.lane.b32.xlu1 %v4711_v38, %s4214_s5  ;;  %830 = vrot.lane.b32.xlu0 %v4700_v42, %s4214_s5 }
 0x11d   : > { %834 = vrot.lane.b32.xlu2 %v4725_v25, %s4214_s5 }
 0x11e   : > { %v523_v48 = vpop.permute.xlu1 %522  ;;  %v521_v1 = vpop.permute.xlu0 %520 }
 0x11f   : > { %596 = vst.msk [vmem:[#allocation2 + $0xb8] sm:$0xff] %vm572_vm1, %v523_v48  ;;  %v704_v54 = vpop.permute.xlu2 %703 }
 0x120   : > { %595 = vst.msk [vmem:[#allocation2 + $0xb0] sm:$0xff] %vm572_vm1, %v521_v1 }
 0x121   : > { %799 = vst.msk [vmem:[#allocation2 + $0x8] sm:$0xff] %vm797_vm2, %v704_v54 }
 0x124   : > { %838 = vrot.lane.b32.xlu1 %v4744_v24, %s4214_s5  ;;  %836 = vrot.lane.b32.xlu0 %v4722_v27, %s4214_s5 }
 0x125   : > { %840 = vrot.lane.b32.xlu2 %v4753_v34, %s4214_s5 }
 0x126   : > { %v529_v42 = vpop.permute.xlu1 %528  ;;  %v527_v38 = vpop.permute.xlu0 %526 }
 0x127   : > { %599 = vst.msk [vmem:[#allocation2 + $0xd0] sm:$0xff] %vm572_vm1, %v529_v42  ;;  %v710_v25 = vpop.permute.xlu2 %709 }
 0x128   : > { %598 = vst.msk [vmem:[#allocation2 + $0xc8] sm:$0xff] %vm572_vm1, %v527_v38 }
 0x129   : > { %802 = vst.msk [vmem:[#allocation2 + $0x20] sm:$0xff] %vm797_vm2, %v710_v25 }
 0x12c   : > { %844 = vrot.lane.b32.xlu1 %v4772_v36, %s4214_s5  ;;  %842 = vrot.lane.b32.xlu0 %v4750_v33, %s4214_s5 }
 0x12d   : > { %846 = vrot.lane.b32.xlu2 %v4784_v41, %s4214_s5 }
 0x12e   : > { %v535_v24 = vpop.permute.xlu1 %534  ;;  %v533_v27 = vpop.permute.xlu0 %532 }
 0x12f   : > { %602 = vst.msk [vmem:[#allocation2 + $0xe8] sm:$0xff] %vm572_vm1, %v535_v24  ;;  %v716_v35 = vpop.permute.xlu2 %715 }
 0x130   : > { %601 = vst.msk [vmem:[#allocation2 + $0xe0] sm:$0xff] %vm572_vm1, %v533_v27 }
 0x131   : > { %805 = vst.msk [vmem:[#allocation2 + $0x38] sm:$0xff] %vm797_vm2, %v716_v35 }
 0x134   : > { %850 = vrot.lane.b32.xlu1 %v4801_v44, %s4214_s5  ;;  %848 = vrot.lane.b32.xlu0 %v4781_v40, %s4214_s5 }
 0x135   : > { %852 = vrot.lane.b32.xlu2 %v4813_v51, %s4214_s5 }
 0x136   : > { %v702_v34 = vpop.permute.xlu1 %701  ;;  %v539_v33 = vpop.permute.xlu0 %538 }
 0x137   : > { %798 = vst.msk [vmem:[#allocation2] sm:$0xff] %vm797_vm2, %v702_v34  ;;  %v722_v36 = vpop.permute.xlu2 %721 }
 0x138   : > { %604 = vst.msk [vmem:[#allocation2 + $0xf8] sm:$0xff] %vm572_vm1, %v539_v33 }
 0x139   : > { %808 = vst.msk [vmem:[#allocation2 + $0x50] sm:$0xff] %vm797_vm2, %v722_v36 }
 0x13c   : > { %856 = vrot.lane.b32.xlu1 %v4830_v56, %s4214_s5  ;;  %854 = vrot.lane.b32.xlu0 %v4810_v50, %s4214_s5 }
 0x13d   : > { %858 = vrot.lane.b32.xlu2 %v4846_v63, %s4214_s5 }
 0x13e   : > { %v708_v41 = vpop.permute.xlu1 %707  ;;  %v706_v40 = vpop.permute.xlu0 %705 }
 0x13f   : > { %801 = vst.msk [vmem:[#allocation2 + $0x18] sm:$0xff] %vm797_vm2, %v708_v41  ;;  %v728_v44 = vpop.permute.xlu2 %727 }
 0x140   : > { %800 = vst.msk [vmem:[#allocation2 + $0x10] sm:$0xff] %vm797_vm2, %v706_v40 }
 0x141   : > { %811 = vst.msk [vmem:[#allocation2 + $0x68] sm:$0xff] %vm797_vm2, %v728_v44 }
 0x144   : > { %862 = vrot.lane.b32.xlu1 %v4861_v46, %s4214_s5  ;;  %860 = vrot.lane.b32.xlu0 %v4843_v62, %s4214_s5 }
 0x145   : > { %864 = vrot.lane.b32.xlu2 %v4874_v60, %s4214_s5 }
 0x146   : > { %v714_v51 = vpop.permute.xlu1 %713  ;;  %v712_v50 = vpop.permute.xlu0 %711 }
 0x147   : > { %804 = vst.msk [vmem:[#allocation2 + $0x30] sm:$0xff] %vm797_vm2, %v714_v51  ;;  %v734_v56 = vpop.permute.xlu2 %733 }
 0x148   : > { %803 = vst.msk [vmem:[#allocation2 + $0x28] sm:$0xff] %vm797_vm2, %v712_v50 }
 0x149   : > { %814 = vst.msk [vmem:[#allocation2 + $0x80] sm:$0xff] %vm797_vm2, %v734_v56 }
 0x14c   : > { %868 = vrot.lane.b32.xlu1 %v4885_v49, %s4214_s5  ;;  %866 = vrot.lane.b32.xlu0 %v4871_v58, %s4214_s5 }
 0x14d   : > { %870 = vrot.lane.b32.xlu2 %v4896_v28, %s4214_s5 }
 0x14e   : > { %v720_v63 = vpop.permute.xlu1 %719  ;;  %v718_v62 = vpop.permute.xlu0 %717 }
 0x14f   : > { %807 = vst.msk [vmem:[#allocation2 + $0x48] sm:$0xff] %vm797_vm2, %v720_v63  ;;  %v740_v46 = vpop.permute.xlu2 %739  ;;  %v6941_v63 = vld [vmem:[#allocation7_spill] sm:$0xff] }
 0x150   : > { %806 = vst.msk [vmem:[#allocation2 + $0x40] sm:$0xff] %vm797_vm2, %v718_v62  ;;  %v6942_v62 = vld [vmem:[#allocation8_spill] sm:$0xff] }
 0x151   : > { %817 = vst.msk [vmem:[#allocation2 + $0x98] sm:$0xff] %vm797_vm2, %v740_v46 }
 0x154   : > { %874 = vrot.lane.b32.xlu1 %v4904_v32, %s4214_s5  ;;  %872 = vrot.lane.b32.xlu0 %v4893_v55, %s4214_s5 }
 0x155   : > { %876 = vrot.lane.b32.xlu2 %v4914_v43, %s4214_s5 }
 0x156   : > { %v726_v60 = vpop.permute.xlu1 %725  ;;  %v724_v58 = vpop.permute.xlu0 %723 }
 0x157   : > { %810 = vst.msk [vmem:[#allocation2 + $0x60] sm:$0xff] %vm797_vm2, %v726_v60  ;;  %v746_v49 = vpop.permute.xlu2 %745 }
 0x158   : > { %809 = vst.msk [vmem:[#allocation2 + $0x58] sm:$0xff] %vm797_vm2, %v724_v58  ;;  %v6943_v58 = vld [vmem:[#allocation11_spill] sm:$0xff] }
 0x159   : > { %820 = vst.msk [vmem:[#allocation2 + $0xb0] sm:$0xff] %vm797_vm2, %v746_v49 }
 0x15c   : > { %880 = vrot.lane.b32.xlu1 %v4922_v47, %s4214_s5  ;;  %878 = vrot.lane.b32.xlu0 %v4911_v39, %s4214_s5 }
 0x15d   : > { %882 = vrot.lane.b32.xlu2 %v4932_v3, %s4214_s5 }
 0x15e   : > { %v732_v28 = vpop.permute.xlu1 %731  ;;  %v730_v55 = vpop.permute.xlu0 %729 }
 0x15f   : > { %813 = vst.msk [vmem:[#allocation2 + $0x78] sm:$0xff] %vm797_vm2, %v732_v28  ;;  %v752_v32 = vpop.permute.xlu2 %751  ;;  %v6944_v28 = vld [vmem:[#allocation9_spill] sm:$0xff] }
 0x160   : > { %812 = vst.msk [vmem:[#allocation2 + $0x70] sm:$0xff] %vm797_vm2, %v730_v55  ;;  %v6945_v55 = vld [vmem:[#allocation10_spill] sm:$0xff] }
 0x161   : > { %823 = vst.msk [vmem:[#allocation2 + $0xc8] sm:$0xff] %vm797_vm2, %v752_v32  ;;  %v5150_v32 = vld [vmem:[%s4303_s30 + $0x180] sm:$0xff] }
 0x164   : > { %886 = vrot.lane.b32.xlu1 %v4940_v52, %s4214_s5  ;;  %884 = vrot.lane.b32.xlu0 %v4929_v59, %s4214_s5 }
 0x165   : > { %888 = vrot.lane.b32.xlu2 %v4950_v31, %s4214_s5 }
 0x166   : > { %v738_v43 = vpop.permute.xlu1 %737  ;;  %v736_v39 = vpop.permute.xlu0 %735 }
 0x167   : > { %816 = vst.msk [vmem:[#allocation2 + $0x90] sm:$0xff] %vm797_vm2, %v738_v43  ;;  %v758_v47 = vpop.permute.xlu2 %757 }
 0x168   : > { %815 = vst.msk [vmem:[#allocation2 + $0x88] sm:$0xff] %vm797_vm2, %v736_v39 }
 0x169   : > { %826 = vst.msk [vmem:[#allocation2 + $0xe0] sm:$0xff] %vm797_vm2, %v758_v47  ;;  %v5157_v47 = vld [vmem:[%s4303_s30 + $0x188] sm:$0xff] }
 0x16c   : > { %892 = vrot.lane.b32.xlu1 %v4958_v37, %s4214_s5  ;;  %890 = vrot.lane.b32.xlu0 %v4947_v61, %s4214_s5 }
 0x16d   : > { %1025 = vrot.lane.b32.xlu2 %v4306_v0, %s4216_s7 }
 0x16e   : > { %v744_v3 = vpop.permute.xlu1 %743  ;;  %v742_v59 = vpop.permute.xlu0 %741 }
 0x16f   : > { %819 = vst.msk [vmem:[#allocation2 + $0xa8] sm:$0xff] %vm797_vm2, %v744_v3  ;;  %v764_v52 = vpop.permute.xlu2 %763 }
 0x170   : > { %818 = vst.msk [vmem:[#allocation2 + $0xa0] sm:$0xff] %vm797_vm2, %v742_v59 }
 0x171   : > { %829 = vst.msk [vmem:[#allocation2 + $0xf8] sm:$0xff] %vm797_vm2, %v764_v52 }
 0x174   : > { %1029 = vrot.lane.b32.xlu1 %v4322_v4, %s4216_s7  ;;  %1027 = vrot.lane.b32.xlu0 %v4316_v2, %s4216_s7 }
 0x175   : > { %1031 = vrot.lane.b32.xlu2 %v4356_v10, %s4216_s7 }
 0x176   : > { %v750_v61 = vpop.permute.xlu1 %749  ;;  %v748_v31 = vpop.permute.xlu0 %747 }
 0x177   : > { %822 = vst.msk [vmem:[#allocation2 + $0xc0] sm:$0xff] %vm797_vm2, %v750_v61  ;;  %v835_v37 = vpop.permute.xlu2 %834 }
 0x178   : > { %821 = vst.msk [vmem:[#allocation2 + $0xb8] sm:$0xff] %vm797_vm2, %v748_v31 }
 0x179   : > { %928 = vst.msk [vmem:[#allocation3 + $0x10] sm:$0xff] %vm797_vm2, %v835_v37 }
 0x17c   : > { %1035 = vrot.lane.b32.xlu1 %v4326_v5, %s4216_s7  ;;  %1033 = vrot.lane.b32.xlu0 %v4333_v6, %s4216_s7 }
 0x17d   : > { %1037 = vrot.lane.b32.xlu2 %v4380_v14, %s4216_s7 }
 0x17e   : > { %v756_v45 = vpop.permute.xlu1 %755  ;;  %v754_v53 = vpop.permute.xlu0 %753 }
 0x17f   : > { %825 = vst.msk [vmem:[#allocation2 + $0xd8] sm:$0xff] %vm797_vm2, %v756_v45  ;;  %v841_v57 = vpop.permute.xlu2 %840 }
 0x180   : > { %824 = vst.msk [vmem:[#allocation2 + $0xd0] sm:$0xff] %vm797_vm2, %v754_v53 }
 0x181   : > { %931 = vst.msk [vmem:[#allocation3 + $0x28] sm:$0xff] %vm797_vm2, %v841_v57  ;;  %v5259_v57 = vld [vmem:[%s4303_s30 + $0x21] sm:$0xff] }
 0x184   : > { %1041 = vrot.lane.b32.xlu1 %v4338_v7, %s4216_s7  ;;  %1039 = vrot.lane.b32.xlu0 %v4343_v8, %s4216_s7 }
 0x185   : > { %1043 = vrot.lane.b32.xlu2 %v4399_v17, %s4216_s7 }
 0x186   : > { %v762_v48 = vpop.permute.xlu1 %761  ;;  %v760_v1 = vpop.permute.xlu0 %759 }
 0x187   : > { %828 = vst.msk [vmem:[#allocation2 + $0xf0] sm:$0xff] %vm797_vm2, %v762_v48  ;;  %v847_v54 = vpop.permute.xlu2 %846  ;;  %v5262_v48 = vld [vmem:[%s4303_s30 + $0x19] sm:$0xff] }
 0x188   : > { %827 = vst.msk [vmem:[#allocation2 + $0xe8] sm:$0xff] %vm797_vm2, %v760_v1 }
 0x189   : > { %934 = vst.msk [vmem:[#allocation3 + $0x40] sm:$0xff] %vm797_vm2, %v847_v54  ;;  %v5270_v54 = vld [vmem:[%s4303_s30 + $0x31] sm:$0xff] }
 0x18c   : > { %1047 = vrot.lane.b32.xlu1 %v4353_v9, %s4216_s7  ;;  %1045 = vrot.lane.b32.xlu0 %v4361_v11, %s4216_s7 }
 0x18d   : > { %1049 = vrot.lane.b32.xlu2 %v4420_v20, %s4216_s7 }
 0x18e   : > { %v833_v42 = vpop.permute.xlu1 %832  ;;  %v831_v38 = vpop.permute.xlu0 %830 }
 0x18f   : > { %927 = vst.msk [vmem:[#allocation3 + $0x8] sm:$0xff] %vm797_vm2, %v833_v42  ;;  %v853_v25 = vpop.permute.xlu2 %852 }
 0x190   : > { %926 = vst.msk [vmem:[#allocation3] sm:$0xff] %vm797_vm2, %v831_v38 }
 0x191   : > { %937 = vst.msk [vmem:[#allocation3 + $0x58] sm:$0xff] %vm797_vm2, %v853_v25  ;;  %v5277_v25 = vld [vmem:[%s4303_s30 + $0x49] sm:$0xff] }
 0x194   : > { %1053 = vrot.lane.b32.xlu1 %v4370_v12, %s4216_s7  ;;  %1051 = vrot.lane.b32.xlu0 %v4375_v13, %s4216_s7 }
 0x195   : > { %1055 = vrot.lane.b32.xlu2 %v4441_v23, %s4216_s7 }
 0x196   : > { %v839_v24 = vpop.permute.xlu1 %838  ;;  %v837_v27 = vpop.permute.xlu0 %836 }
 0x197   : > { %930 = vst.msk [vmem:[#allocation3 + $0x20] sm:$0xff] %vm797_vm2, %v839_v24  ;;  %v859_v35 = vpop.permute.xlu2 %858  ;;  %v5280_v24 = vld [vmem:[%s4303_s30 + $0x39] sm:$0xff] }
 0x198   : > { %929 = vst.msk [vmem:[#allocation3 + $0x18] sm:$0xff] %vm797_vm2, %v837_v27 }
 0x199   : > { %940 = vst.msk [vmem:[#allocation3 + $0x70] sm:$0xff] %vm797_vm2, %v859_v35  ;;  %v5288_v35 = vld [vmem:[%s4303_s30 + $0x51] sm:$0xff] }
 0x19c   : > { %1059 = vrot.lane.b32.xlu1 %v4385_v15, %s4216_s7  ;;  %1057 = vrot.lane.b32.xlu0 %v4390_v16, %s4216_s7 }
 0x19d   : > { %1061 = vrot.lane.b32.xlu2 %v4462_v26, %s4216_s7 }
 0x19e   : > { %v845_v34 = vpop.permute.xlu1 %844  ;;  %v843_v33 = vpop.permute.xlu0 %842 }
 0x19f   : > { %933 = vst.msk [vmem:[#allocation3 + $0x38] sm:$0xff] %vm797_vm2, %v845_v34  ;;  %v865_v36 = vpop.permute.xlu2 %864 }
 0x1a0   : > { %932 = vst.msk [vmem:[#allocation3 + $0x30] sm:$0xff] %vm797_vm2, %v843_v33 }
 0x1a1   : > { %943 = vst.msk [vmem:[#allocation3 + $0x88] sm:$0xff] %vm797_vm2, %v865_v36  ;;  %v5295_v36 = vld [vmem:[%s4303_s30 + $0x69] sm:$0xff] }
 0x1a4   : > { %1065 = vrot.lane.b32.xlu1 %v4404_v18, %s4216_s7  ;;  %1063 = vrot.lane.b32.xlu0 %v4411_v19, %s4216_s7 }
 0x1a5   : > { %1067 = vrot.lane.b32.xlu2 %v4483_v29, %s4216_s7 }
 0x1a6   : > { %v851_v41 = vpop.permute.xlu1 %850  ;;  %v849_v40 = vpop.permute.xlu0 %848 }
 0x1a7   : > { %936 = vst.msk [vmem:[#allocation3 + $0x50] sm:$0xff] %vm797_vm2, %v851_v41  ;;  %v871_v44 = vpop.permute.xlu2 %870  ;;  %v5298_v41 = vld [vmem:[%s4303_s30 + $0x61] sm:$0xff] }
 0x1a8   : > { %935 = vst.msk [vmem:[#allocation3 + $0x48] sm:$0xff] %vm797_vm2, %v849_v40 }
 0x1a9   : > { %946 = vst.msk [vmem:[#allocation3 + $0xa0] sm:$0xff] %vm797_vm2, %v871_v44  ;;  %v5306_v44 = vld [vmem:[%s4303_s30 + $0x79] sm:$0xff] }
 0x1ac   : > { %1071 = vrot.lane.b32.xlu1 %v4425_v21, %s4216_s7  ;;  %1069 = vrot.lane.b32.xlu0 %v4432_v22, %s4216_s7 }
 0x1ad   : > { %1073 = vrot.lane.b32.xlu2 %v4494_v30, %s4216_s7 }
 0x1ae   : > { %v857_v51 = vpop.permute.xlu1 %856  ;;  %v855_v50 = vpop.permute.xlu0 %854 }
 0x1af   : > { %939 = vst.msk [vmem:[#allocation3 + $0x68] sm:$0xff] %vm797_vm2, %v857_v51  ;;  %v877_v56 = vpop.permute.xlu2 %876 }
 0x1b0   : > { %938 = vst.msk [vmem:[#allocation3 + $0x60] sm:$0xff] %vm797_vm2, %v855_v50 }
 0x1b1   : > { %949 = vst.msk [vmem:[#allocation3 + $0xb8] sm:$0xff] %vm797_vm2, %v877_v56  ;;  %v5313_v56 = vld [vmem:[%s4303_s30 + $0x91] sm:$0xff] }
 0x1b4   : > { %1077 = vrot.lane.b32.xlu1 %v6941_v63, %s4216_s7  ;;  %1075 = vrot.lane.b32.xlu0 %v6942_v62, %s4216_s7 }
 0x1b5   : > { %1079 = vrot.lane.b32.xlu2 %v6943_v58, %s4216_s7 }
 0x1b6   : > { %v863_v46 = vpop.permute.xlu1 %862  ;;  %v861_v60 = vpop.permute.xlu0 %860 }
 0x1b7   : > { %942 = vst.msk [vmem:[#allocation3 + $0x80] sm:$0xff] %vm797_vm2, %v863_v46  ;;  %v883_v49 = vpop.permute.xlu2 %882  ;;  %v5324_v46 = vld [vmem:[%s4303_s30 + $0x99] sm:$0xff] }
 0x1b8   : > { %941 = vst.msk [vmem:[#allocation3 + $0x78] sm:$0xff] %vm797_vm2, %v861_v60 }
 0x1b9   : > { %952 = vst.msk [vmem:[#allocation3 + $0xd0] sm:$0xff] %vm797_vm2, %v883_v49  ;;  %v5331_v49 = vld [vmem:[%s4303_s30 + $0xb1] sm:$0xff] }
 0x1bc   : > { %1083 = vrot.lane.b32.xlu1 %v6944_v28, %s4216_s7  ;;  %1081 = vrot.lane.b32.xlu0 %v6945_v55, %s4216_s7 }
 0x1bd   : > { %1085 = vrot.lane.b32.xlu2 %v5150_v32, %s4216_s7 }
 0x1be   : > { %v869_v43 = vpop.permute.xlu1 %868  ;;  %v867_v39 = vpop.permute.xlu0 %866 }
 0x1bf   : > { %945 = vst.msk [vmem:[#allocation3 + $0x98] sm:$0xff] %vm797_vm2, %v869_v43  ;;  %v889_v3 = vpop.permute.xlu2 %888 }
 0x1c0   : > { %944 = vst.msk [vmem:[#allocation3 + $0x90] sm:$0xff] %vm797_vm2, %v867_v39 }
 0x1c1   : > { %955 = vst.msk [vmem:[#allocation3 + $0xe8] sm:$0xff] %vm797_vm2, %v889_v3  ;;  %v5352_v3 = vld [vmem:[%s4303_s30 + $0xc9] sm:$0xff] }
 0x1c4   : > { %1154 = vrot.lane.b32.xlu1 %v4306_v0, %s4215_s6  ;;  %1087 = vrot.lane.b32.xlu0 %v5157_v47, %s4216_s7 }
 0x1c5   : > { %1156 = vrot.lane.b32.xlu2 %v4316_v2, %s4215_s6 }
 0x1c6   : > { %v875_v59 = vpop.permute.xlu1 %874  ;;  %v873_v52 = vpop.permute.xlu0 %872 }
 0x1c7   : > { %948 = vst.msk [vmem:[#allocation3 + $0xb0] sm:$0xff] %vm797_vm2, %v875_v59  ;;  %v1026_v61 = vpop.permute.xlu2 %1025 }
 0x1c8   : > { %947 = vst.msk [vmem:[#allocation3 + $0xa8] sm:$0xff] %vm797_vm2, %v873_v52  ;;  %v5360_v52 = vld [vmem:[%s4303_s30 + $0xe1] sm:$0xff] }
 0x1c9   : > { %1122 = vst.msk [vmem:[#allocation2] sm:$0xff] %vm1121_vm3, %v1026_v61 }
 0x1cc   : > { %1160 = vrot.lane.b32.xlu1 %v4356_v10, %s4215_s6  ;;  %1158 = vrot.lane.b32.xlu0 %v4322_v4, %s4215_s6 }
 0x1cd   : > { %1162 = vrot.lane.b32.xlu2 %v4333_v6, %s4215_s6 }
 0x1ce   : > { %v881_v0 = vpop.permute.xlu1 %880  ;;  %v879_v31 = vpop.permute.xlu0 %878 }
 0x1cf   : > { %951 = vst.msk [vmem:[#allocation3 + $0xc8] sm:$0xff] %vm797_vm2, %v881_v0  ;;  %v1032_v2 = vpop.permute.xlu2 %1031 }
 0x1d0   : > { %950 = vst.msk [vmem:[#allocation3 + $0xc0] sm:$0xff] %vm797_vm2, %v879_v31  ;;  %v5367_v31 = vld [vmem:[%s4303_s30 + $0xf9] sm:$0xff] }
 0x1d1   : > { %1125 = vst.msk [vmem:[#allocation2 + $0x18] sm:$0xff] %vm1121_vm3, %v1032_v2  ;;  %v5370_v2 = vld [vmem:[%s4303_s30 + $0xf1] sm:$0xff] }
 0x1d4   : > { %1166 = vrot.lane.b32.xlu1 %v4380_v14, %s4215_s6  ;;  %1164 = vrot.lane.b32.xlu0 %v4326_v5, %s4215_s6 }
 0x1d5   : > { %1168 = vrot.lane.b32.xlu2 %v4343_v8, %s4215_s6 }
 0x1d6   : > { %v887_v10 = vpop.permute.xlu1 %886  ;;  %v885_v4 = vpop.permute.xlu0 %884 }
 0x1d7   : > { %954 = vst.msk [vmem:[#allocation3 + $0xe0] sm:$0xff] %vm797_vm2, %v887_v10  ;;  %v1038_v37 = vpop.permute.xlu2 %1037 }
 0x1d8   : > { %953 = vst.msk [vmem:[#allocation3 + $0xd8] sm:$0xff] %vm797_vm2, %v885_v4  ;;  %v5378_v4 = vld [vmem:[%s4303_s30 + $0x109] sm:$0xff] }
 0x1d9   : > { %1128 = vst.msk [vmem:[#allocation2 + $0x30] sm:$0xff] %vm1121_vm3, %v1038_v37 }
 0x1dc   : > { %1172 = vrot.lane.b32.xlu1 %v4399_v17, %s4215_s6  ;;  %1170 = vrot.lane.b32.xlu0 %v4338_v7, %s4215_s6 }
 0x1dd   : > { %1174 = vrot.lane.b32.xlu2 %v4361_v11, %s4215_s6 }
 0x1de   : > { %v893_v6 = vpop.permute.xlu1 %892  ;;  %v891_v5 = vpop.permute.xlu0 %890 }
 0x1df   : > { %957 = vst.msk [vmem:[#allocation3 + $0xf8] sm:$0xff] %vm797_vm2, %v893_v6  ;;  %v1044_v14 = vpop.permute.xlu2 %1043 }
 0x1e0   : > { %956 = vst.msk [vmem:[#allocation3 + $0xf0] sm:$0xff] %vm797_vm2, %v891_v5  ;;  %v5385_v5 = vld [vmem:[%s4303_s30 + $0x121] sm:$0xff] }
 0x1e1   : > { %1131 = vst.msk [vmem:[#allocation2 + $0x48] sm:$0xff] %vm1121_vm3, %v1044_v14  ;;  %v5388_v14 = vld [vmem:[%s4303_s30 + $0x111] sm:$0xff] }
 0x1e4   : > { %1178 = vrot.lane.b32.xlu1 %v4420_v20, %s4215_s6  ;;  %1176 = vrot.lane.b32.xlu0 %v4353_v9, %s4215_s6 }
 0x1e5   : > { %1180 = vrot.lane.b32.xlu2 %v4375_v13, %s4215_s6 }
 0x1e6   : > { %v1030_v8 = vpop.permute.xlu1 %1029  ;;  %v1028_v7 = vpop.permute.xlu0 %1027 }
 0x1e7   : > { %1124 = vst.msk [vmem:[#allocation2 + $0x10] sm:$0xff] %vm1121_vm3, %v1030_v8  ;;  %v1050_v17 = vpop.permute.xlu2 %1049 }
 0x1e8   : > { %1123 = vst.msk [vmem:[#allocation2 + $0x8] sm:$0xff] %vm1121_vm3, %v1028_v7  ;;  %v5396_v7 = vld [vmem:[%s4303_s30 + $0x129] sm:$0xff] }
 0x1e9   : > { %1134 = vst.msk [vmem:[#allocation2 + $0x60] sm:$0xff] %vm1121_vm3, %v1050_v17 }
 0x1ec   : > { %1184 = vrot.lane.b32.xlu1 %v4441_v23, %s4215_s6  ;;  %1182 = vrot.lane.b32.xlu0 %v4370_v12, %s4215_s6 }
 0x1ed   : > { %1186 = vrot.lane.b32.xlu2 %v4390_v16, %s4215_s6 }
 0x1ee   : > { %v1036_v11 = vpop.permute.xlu1 %1035  ;;  %v1034_v9 = vpop.permute.xlu0 %1033 }
 0x1ef   : > { %1127 = vst.msk [vmem:[#allocation2 + $0x28] sm:$0xff] %vm1121_vm3, %v1036_v11  ;;  %v1056_v20 = vpop.permute.xlu2 %1055 }
 0x1f0   : > { %1126 = vst.msk [vmem:[#allocation2 + $0x20] sm:$0xff] %vm1121_vm3, %v1034_v9  ;;  %v5403_v9 = vld [vmem:[%s4303_s30 + $0x141] sm:$0xff] }
 0x1f1   : > { %1137 = vst.msk [vmem:[#allocation2 + $0x78] sm:$0xff] %vm1121_vm3, %v1056_v20  ;;  %v5406_v20 = vld [vmem:[%s4303_s30 + $0x139] sm:$0xff] }
 0x1f4   : > { %1190 = vrot.lane.b32.xlu1 %v4462_v26, %s4215_s6  ;;  %1188 = vrot.lane.b32.xlu0 %v4385_v15, %s4215_s6 }
 0x1f5   : > { %1192 = vrot.lane.b32.xlu2 %v4411_v19, %s4215_s6 }
 0x1f6   : > { %v1042_v13 = vpop.permute.xlu1 %1041  ;;  %v1040_v12 = vpop.permute.xlu0 %1039 }
 0x1f7   : > { %1130 = vst.msk [vmem:[#allocation2 + $0x40] sm:$0xff] %vm1121_vm3, %v1042_v13  ;;  %v1062_v23 = vpop.permute.xlu2 %1061 }
 0x1f8   : > { %1129 = vst.msk [vmem:[#allocation2 + $0x38] sm:$0xff] %vm1121_vm3, %v1040_v12  ;;  %v5414_v12 = vld [vmem:[%s4303_s30 + $0x151] sm:$0xff] }
 0x1f9   : > { %1140 = vst.msk [vmem:[#allocation2 + $0x90] sm:$0xff] %vm1121_vm3, %v1062_v23 }
 0x1fc   : > { %1196 = vrot.lane.b32.xlu1 %v4483_v29, %s4215_s6  ;;  %1194 = vrot.lane.b32.xlu0 %v4404_v18, %s4215_s6 }
 0x1fd   : > { %1198 = vrot.lane.b32.xlu2 %v4432_v22, %s4215_s6 }
 0x1fe   : > { %v1048_v16 = vpop.permute.xlu1 %1047  ;;  %v1046_v15 = vpop.permute.xlu0 %1045 }
 0x1ff   : > { %1133 = vst.msk [vmem:[#allocation2 + $0x58] sm:$0xff] %vm1121_vm3, %v1048_v16  ;;  %v1068_v26 = vpop.permute.xlu2 %1067 }
 0x200   : > { %1132 = vst.msk [vmem:[#allocation2 + $0x50] sm:$0xff] %vm1121_vm3, %v1046_v15  ;;  %v5421_v15 = vld [vmem:[%s4303_s30 + $0x169] sm:$0xff] }
 0x201   : > { %1143 = vst.msk [vmem:[#allocation2 + $0xa8] sm:$0xff] %vm1121_vm3, %v1068_v26  ;;  %v5424_v26 = vld [vmem:[%s4303_s30 + $0x159] sm:$0xff] }
 0x204   : > { %1202 = vrot.lane.b32.xlu1 %v4494_v30, %s4215_s6  ;;  %1200 = vrot.lane.b32.xlu0 %v4425_v21, %s4215_s6 }
 0x205   : > { %1204 = vrot.lane.b32.xlu2 %v6942_v62, %s4215_s6 }
 0x206   : > { %v1054_v19 = vpop.permute.xlu1 %1053  ;;  %v1052_v18 = vpop.permute.xlu0 %1051 }
 0x207   : > { %1136 = vst.msk [vmem:[#allocation2 + $0x70] sm:$0xff] %vm1121_vm3, %v1054_v19  ;;  %v1074_v29 = vpop.permute.xlu2 %1073 }
 0x208   : > { %1135 = vst.msk [vmem:[#allocation2 + $0x68] sm:$0xff] %vm1121_vm3, %v1052_v18  ;;  %v5432_v18 = vld [vmem:[%s4303_s30 + $0x171] sm:$0xff] }
 0x209   : > { %1146 = vst.msk [vmem:[#allocation2 + $0xc0] sm:$0xff] %vm1121_vm3, %v1074_v29 }
 0x20c   : > { %1208 = vrot.lane.b32.xlu1 %v6943_v58, %s4215_s6  ;;  %1206 = vrot.lane.b32.xlu0 %v6941_v63, %s4215_s6  ;;  %v5316_v63 = vld [vmem:[%s4303_s30 + $0x81] sm:$0xff] }
 0x20d   : > { %1210 = vrot.lane.b32.xlu2 %v6945_v55, %s4215_s6 }
 0x20e   : > { %v1060_v21 = vpop.permute.xlu1 %1059  ;;  %v1058_v22 = vpop.permute.xlu0 %1057 }
 0x20f   : > { %1139 = vst.msk [vmem:[#allocation2 + $0x88] sm:$0xff] %vm1121_vm3, %v1060_v21  ;;  %v1080_v30 = vpop.permute.xlu2 %1079 }
 0x210   : > { %1138 = vst.msk [vmem:[#allocation2 + $0x80] sm:$0xff] %vm1121_vm3, %v1058_v22  ;;  %v5439_v22 = vld [vmem:[%s4303_s30 + $0x189] sm:$0xff] }
 0x211   : > { %1149 = vst.msk [vmem:[#allocation2 + $0xd8] sm:$0xff] %vm1121_vm3, %v1080_v30  ;;  %v5442_v30 = vld [vmem:[%s4303_s30 + $0x181] sm:$0xff] }
 0x214   : > { %1214 = vrot.lane.b32.xlu1 %v5150_v32, %s4215_s6  ;;  %1212 = vrot.lane.b32.xlu0 %v6944_v28, %s4215_s6  ;;  %v5334_v28 = vld [vmem:[%s4303_s30 + $0xa9] sm:$0xff]  ;;  %v5342_v32 = vld [vmem:[%s4303_s30 + $0xc1] sm:$0xff] }
 0x215   : > { %1216 = vrot.lane.b32.xlu2 %v5157_v47, %s4215_s6  ;;  %v5349_v47 = vld [vmem:[%s4303_s30 + $0xd9] sm:$0xff] }
 0x216   : > { %v1066_v45 = vpop.permute.xlu1 %1065  ;;  %v1064_v53 = vpop.permute.xlu0 %1063 }
 0x217   : > { %1142 = vst.msk [vmem:[#allocation2 + $0xa0] sm:$0xff] %vm1121_vm3, %v1066_v45  ;;  %v1086_v1 = vpop.permute.xlu2 %1085 }
 0x218   : > { %1141 = vst.msk [vmem:[#allocation2 + $0x98] sm:$0xff] %vm1121_vm3, %v1064_v53 }
 0x219   : > { %1152 = vst.msk [vmem:[#allocation2 + $0xf0] sm:$0xff] %vm1121_vm3, %v1086_v1 }
 0x21c   : > { %1348 = vrot.lane.b32.xlu1 %v5259_v57, %s4217_s8  ;;  %1346 = vrot.lane.b32.xlu0 %v5262_v48, %s4217_s8 }
 0x21d   : > { %1350 = vrot.lane.b32.xlu2 %v5270_v54, %s4217_s8 }
 0x21e   : > { %v1072_v42 = vpop.permute.xlu1 %1071  ;;  %v1070_v38 = vpop.permute.xlu0 %1069 }
 0x21f   : > { %1145 = vst.msk [vmem:[#allocation2 + $0xb8] sm:$0xff] %vm1121_vm3, %v1072_v42  ;;  %v1157_v27 = vpop.permute.xlu2 %1156 }
 0x220   : > { %1144 = vst.msk [vmem:[#allocation2 + $0xb0] sm:$0xff] %vm1121_vm3, %v1070_v38 }
 0x221   : > { %1251 = vst.msk [vmem:[#allocation3 + $0x8] sm:$0xff] %vm1121_vm3, %v1157_v27 }
 0x224   : > { %1354 = vrot.lane.b32.xlu1 %v5277_v25, %s4217_s8  ;;  %1352 = vrot.lane.b32.xlu0 %v5280_v24, %s4217_s8 }
 0x225   : > { %1356 = vrot.lane.b32.xlu2 %v5288_v35, %s4217_s8 }
 0x226   : > { %v1078_v34 = vpop.permute.xlu1 %1077  ;;  %v1076_v33 = vpop.permute.xlu0 %1075 }
 0x227   : > { %1148 = vst.msk [vmem:[#allocation2 + $0xd0] sm:$0xff] %vm1121_vm3, %v1078_v34  ;;  %v1163_v40 = vpop.permute.xlu2 %1162 }
 0x228   : > { %1147 = vst.msk [vmem:[#allocation2 + $0xc8] sm:$0xff] %vm1121_vm3, %v1076_v33 }
 0x229   : > { %1254 = vst.msk [vmem:[#allocation3 + $0x20] sm:$0xff] %vm1121_vm3, %v1163_v40 }
 0x22c   : > { %1360 = vrot.lane.b32.xlu1 %v5295_v36, %s4217_s8  ;;  %1358 = vrot.lane.b32.xlu0 %v5298_v41, %s4217_s8 }
 0x22d   : > { %1362 = vrot.lane.b32.xlu2 %v5306_v44, %s4217_s8 }
 0x22e   : > { %v1084_v51 = vpop.permute.xlu1 %1083  ;;  %v1082_v50 = vpop.permute.xlu0 %1081 }
 0x22f   : > { %1151 = vst.msk [vmem:[#allocation2 + $0xe8] sm:$0xff] %vm1121_vm3, %v1084_v51  ;;  %v1169_v62 = vpop.permute.xlu2 %1168 }
 0x230   : > { %1150 = vst.msk [vmem:[#allocation2 + $0xe0] sm:$0xff] %vm1121_vm3, %v1082_v50 }
 0x231   : > { %1257 = vst.msk [vmem:[#allocation3 + $0x38] sm:$0xff] %vm1121_vm3, %v1169_v62 }
 0x234   : > { %1366 = vrot.lane.b32.xlu1 %v5313_v56, %s4217_s8  ;;  %1364 = vrot.lane.b32.xlu0 %v5316_v63, %s4217_s8 }
 0x235   : > { %1368 = vrot.lane.b32.xlu2 %v5324_v46, %s4217_s8 }
 0x236   : > { %v1155_v60 = vpop.permute.xlu1 %1154  ;;  %v1088_v58 = vpop.permute.xlu0 %1087 }
 0x237   : > { %1250 = vst.msk [vmem:[#allocation3] sm:$0xff] %vm1121_vm3, %v1155_v60  ;;  %v1175_v55 = vpop.permute.xlu2 %1174 }
 0x238   : > { %1153 = vst.msk [vmem:[#allocation2 + $0xf8] sm:$0xff] %vm1121_vm3, %v1088_v58 }
 0x239   : > { %1260 = vst.msk [vmem:[#allocation3 + $0x50] sm:$0xff] %vm1121_vm3, %v1175_v55 }
 0x23c   : > { %1372 = vrot.lane.b32.xlu1 %v5331_v49, %s4217_s8  ;;  %1370 = vrot.lane.b32.xlu0 %v5334_v28, %s4217_s8 }
 0x23d   : > { %1374 = vrot.lane.b32.xlu2 %v5342_v32, %s4217_s8 }
 0x23e   : > { %v1161_v43 = vpop.permute.xlu1 %1160  ;;  %v1159_v39 = vpop.permute.xlu0 %1158 }
 0x23f   : > { %1253 = vst.msk [vmem:[#allocation3 + $0x18] sm:$0xff] %vm1121_vm3, %v1161_v43  ;;  %v1181_v59 = vpop.permute.xlu2 %1180 }
 0x240   : > { %1252 = vst.msk [vmem:[#allocation3 + $0x10] sm:$0xff] %vm1121_vm3, %v1159_v39 }
 0x241   : > { %1263 = vst.msk [vmem:[#allocation3 + $0x68] sm:$0xff] %vm1121_vm3, %v1181_v59 }
 0x244   : > { %1378 = vrot.lane.b32.xlu1 %v5349_v47, %s4217_s8  ;;  %1376 = vrot.lane.b32.xlu0 %v5352_v3, %s4217_s8 }
 0x245   : > { %1380 = vrot.lane.b32.xlu2 %v5360_v52, %s4217_s8 }
 0x246   : > { %v1167_v61 = vpop.permute.xlu1 %1166  ;;  %v1165_v0 = vpop.permute.xlu0 %1164 }
 0x247   : > { %1256 = vst.msk [vmem:[#allocation3 + $0x30] sm:$0xff] %vm1121_vm3, %v1167_v61  ;;  %v1187_v10 = vpop.permute.xlu2 %1186 }
 0x248   : > { %1255 = vst.msk [vmem:[#allocation3 + $0x28] sm:$0xff] %vm1121_vm3, %v1165_v0 }
 0x249   : > { %1266 = vst.msk [vmem:[#allocation3 + $0x80] sm:$0xff] %vm1121_vm3, %v1187_v10 }
 0x24c   : > { %1384 = vrot.lane.b32.xlu1 %v5367_v31, %s4217_s8  ;;  %1382 = vrot.lane.b32.xlu0 %v5370_v2, %s4217_s8 }
 0x24d   : > { %1386 = vrot.lane.b32.xlu2 %v5378_v4, %s4217_s8 }
 0x24e   : > { %v1173_v37 = vpop.permute.xlu1 %1172  ;;  %v1171_v6 = vpop.permute.xlu0 %1170 }
 0x24f   : > { %1259 = vst.msk [vmem:[#allocation3 + $0x48] sm:$0xff] %vm1121_vm3, %v1173_v37  ;;  %v1193_v8 = vpop.permute.xlu2 %1192 }
 0x250   : > { %1258 = vst.msk [vmem:[#allocation3 + $0x40] sm:$0xff] %vm1121_vm3, %v1171_v6 }
 0x251   : > { %1269 = vst.msk [vmem:[#allocation3 + $0x98] sm:$0xff] %vm1121_vm3, %v1193_v8 }
 0x254   : > { %1390 = vrot.lane.b32.xlu1 %v5385_v5, %s4217_s8  ;;  %1388 = vrot.lane.b32.xlu0 %v5388_v14, %s4217_s8 }
 0x255   : > { %1392 = vrot.lane.b32.xlu2 %v5396_v7, %s4217_s8 }
 0x256   : > { %v1179_v17 = vpop.permute.xlu1 %1178  ;;  %v1177_v11 = vpop.permute.xlu0 %1176 }
 0x257   : > { %1262 = vst.msk [vmem:[#allocation3 + $0x60] sm:$0xff] %vm1121_vm3, %v1179_v17  ;;  %v1199_v13 = vpop.permute.xlu2 %1198 }
 0x258   : > { %1261 = vst.msk [vmem:[#allocation3 + $0x58] sm:$0xff] %vm1121_vm3, %v1177_v11 }
 0x259   : > { %1272 = vst.msk [vmem:[#allocation3 + $0xb0] sm:$0xff] %vm1121_vm3, %v1199_v13 }
 0x25c   : > { %1396 = vrot.lane.b32.xlu1 %v5403_v9, %s4217_s8  ;;  %1394 = vrot.lane.b32.xlu0 %v5406_v20, %s4217_s8 }
 0x25d   : > { %1398 = vrot.lane.b32.xlu2 %v5414_v12, %s4217_s8 }
 0x25e   : > { %v1185_v23 = vpop.permute.xlu1 %1184  ;;  %v1183_v16 = vpop.permute.xlu0 %1182 }
 0x25f   : > { %1265 = vst.msk [vmem:[#allocation3 + $0x78] sm:$0xff] %vm1121_vm3, %v1185_v23  ;;  %v1205_v19 = vpop.permute.xlu2 %1204 }
 0x260   : > { %1264 = vst.msk [vmem:[#allocation3 + $0x70] sm:$0xff] %vm1121_vm3, %v1183_v16 }
 0x261   : > { %1275 = vst.msk [vmem:[#allocation3 + $0xc8] sm:$0xff] %vm1121_vm3, %v1205_v19 }
 0x264   : > { %1402 = vrot.lane.b32.xlu1 %v5421_v15, %s4217_s8  ;;  %1400 = vrot.lane.b32.xlu0 %v5424_v26, %s4217_s8 }
 0x265   : > { %1404 = vrot.lane.b32.xlu2 %v5432_v18, %s4217_s8 }
 0x266   : > { %v1191_v29 = vpop.permute.xlu1 %1190  ;;  %v1189_v21 = vpop.permute.xlu0 %1188 }
 0x267   : > { %1268 = vst.msk [vmem:[#allocation3 + $0x90] sm:$0xff] %vm1121_vm3, %v1191_v29  ;;  %v1211_v45 = vpop.permute.xlu2 %1210 }
 0x268   : > { %1267 = vst.msk [vmem:[#allocation3 + $0x88] sm:$0xff] %vm1121_vm3, %v1189_v21 }
 0x269   : > { %1278 = vst.msk [vmem:[#allocation3 + $0xe0] sm:$0xff] %vm1121_vm3, %v1211_v45 }
 0x26c   : > { %1408 = vrot.lane.b32.xlu1 %v5439_v22, %s4217_s8  ;;  %1406 = vrot.lane.b32.xlu0 %v5442_v30, %s4217_s8 }
 0x26d   : > { %1475 = vrot.lane.b32.xlu2 %v5262_v48, %s4216_s7 }
 0x26e   : > { %v1197_v53 = vpop.permute.xlu1 %1196  ;;  %v1195_v1 = vpop.permute.xlu0 %1194 }
 0x26f   : > { %1271 = vst.msk [vmem:[#allocation3 + $0xa8] sm:$0xff] %vm1121_vm3, %v1197_v53  ;;  %v1217_v42 = vpop.permute.xlu2 %1216  ;;  %v5642_v53 = vld [vmem:[%s4303_s30 + $0xda] sm:$0xff] }
 0x270   : > { %1270 = vst.msk [vmem:[#allocation3 + $0xa0] sm:$0xff] %vm1121_vm3, %v1195_v1 }
 0x271   : > { %1281 = vst.msk [vmem:[#allocation3 + $0xf8] sm:$0xff] %vm1121_vm3, %v1217_v42 }
 0x274   : > { %1479 = vrot.lane.b32.xlu1 %v5270_v54, %s4216_s7  ;;  %1477 = vrot.lane.b32.xlu0 %v5259_v57, %s4216_s7 }
 0x275   : > { %1481 = vrot.lane.b32.xlu2 %v5280_v24, %s4216_s7 }
 0x276   : > { %v1203_v38 = vpop.permute.xlu1 %1202  ;;  %v1201_v27 = vpop.permute.xlu0 %1200 }
 0x277   : > { %1274 = vst.msk [vmem:[#allocation3 + $0xc0] sm:$0xff] %vm1121_vm3, %v1203_v38  ;;  %v1351_v48 = vpop.permute.xlu2 %1350  ;;  %v5649_v38 = vld [vmem:[%s4303_s30 + $0xf2] sm:$0xff] }
 0x278   : > { %1273 = vst.msk [vmem:[#allocation3 + $0xb8] sm:$0xff] %vm1121_vm3, %v1201_v27  ;;  %v5652_v27 = vld [vmem:[%s4303_s30 + $0xe2] sm:$0xff] }
 0x279   : > { %1445 = vst.msk [vmem:[#allocation2 + $0x10] sm:$0xff] %vm1442_vm4, %v1351_v48 }
 0x27c   : > { %1485 = vrot.lane.b32.xlu1 %v5288_v35, %s4216_s7  ;;  %1483 = vrot.lane.b32.xlu0 %v5277_v25, %s4216_s7 }
 0x27d   : > { %1487 = vrot.lane.b32.xlu2 %v5298_v41, %s4216_s7 }
 0x27e   : > { %v1209_v57 = vpop.permute.xlu1 %1208  ;;  %v1207_v54 = vpop.permute.xlu0 %1206 }
 0x27f   : > { %1277 = vst.msk [vmem:[#allocation3 + $0xd8] sm:$0xff] %vm1121_vm3, %v1209_v57  ;;  %v1357_v24 = vpop.permute.xlu2 %1356  ;;  %v5660_v57 = vld [vmem:[%s4303_s30 + $0xfa] sm:$0xff] }
 0x280   : > { %1276 = vst.msk [vmem:[#allocation3 + $0xd0] sm:$0xff] %vm1121_vm3, %v1207_v54 }
 0x281   : > { %1448 = vst.msk [vmem:[#allocation2 + $0x28] sm:$0xff] %vm1442_vm4, %v1357_v24 }
 0x284   : > { %1491 = vrot.lane.b32.xlu1 %v5306_v44, %s4216_s7  ;;  %1489 = vrot.lane.b32.xlu0 %v5295_v36, %s4216_s7 }
 0x285   : > { %1493 = vrot.lane.b32.xlu2 %v5316_v63, %s4216_s7 }
 0x286   : > { %v1215_v35 = vpop.permute.xlu1 %1214  ;;  %v1213_v25 = vpop.permute.xlu0 %1212 }
 0x287   : > { %1280 = vst.msk [vmem:[#allocation3 + $0xf0] sm:$0xff] %vm1121_vm3, %v1215_v35  ;;  %v1363_v34 = vpop.permute.xlu2 %1362  ;;  %v5667_v35 = vld [vmem:[%s4303_s30 + $0x112] sm:$0xff] }
 0x288   : > { %1279 = vst.msk [vmem:[#allocation3 + $0xe8] sm:$0xff] %vm1121_vm3, %v1213_v25  ;;  %v5670_v25 = vld [vmem:[%s4303_s30 + $0x10a] sm:$0xff] }
 0x289   : > { %1451 = vst.msk [vmem:[#allocation2 + $0x40] sm:$0xff] %vm1442_vm4, %v1363_v34 }
 0x28c   : > { %1497 = vrot.lane.b32.xlu1 %v5324_v46, %s4216_s7  ;;  %1495 = vrot.lane.b32.xlu0 %v5313_v56, %s4216_s7 }
 0x28d   : > { %1499 = vrot.lane.b32.xlu2 %v5334_v28, %s4216_s7 }
 0x28e   : > { %v1349_v33 = vpop.permute.xlu1 %1348  ;;  %v1347_v36 = vpop.permute.xlu0 %1346 }
 0x28f   : > { %1444 = vst.msk [vmem:[#allocation2 + $0x8] sm:$0xff] %vm1442_vm4, %v1349_v33  ;;  %v1369_v41 = vpop.permute.xlu2 %1368  ;;  %v5678_v33 = vld [vmem:[%s4303_s30 + $0x122] sm:$0xff] }
 0x290   : > { %1443 = vst.msk [vmem:[#allocation2] sm:$0xff] %vm1442_vm4, %v1347_v36 }
 0x291   : > { %1454 = vst.msk [vmem:[#allocation2 + $0x58] sm:$0xff] %vm1442_vm4, %v1369_v41 }
 0x294   : > { %1503 = vrot.lane.b32.xlu1 %v5342_v32, %s4216_s7  ;;  %1501 = vrot.lane.b32.xlu0 %v5331_v49, %s4216_s7 }
 0x295   : > { %1505 = vrot.lane.b32.xlu2 %v5352_v3, %s4216_s7  ;;  %v5544_v3 = vld [vmem:[%s4303_s30 + $0x1a] sm:$0xff] }
 0x296   : > { %v1355_v40 = vpop.permute.xlu1 %1354  ;;  %v1353_v44 = vpop.permute.xlu0 %1352 }
 0x297   : > { %1447 = vst.msk [vmem:[#allocation2 + $0x20] sm:$0xff] %vm1442_vm4, %v1355_v40  ;;  %v1375_v51 = vpop.permute.xlu2 %1374  ;;  %v5685_v40 = vld [vmem:[%s4303_s30 + $0x13a] sm:$0xff] }
 0x298   : > { %1446 = vst.msk [vmem:[#allocation2 + $0x18] sm:$0xff] %vm1442_vm4, %v1353_v44  ;;  %v5688_v44 = vld [vmem:[%s4303_s30 + $0x12a] sm:$0xff] }
 0x299   : > { %1457 = vst.msk [vmem:[#allocation2 + $0x70] sm:$0xff] %vm1442_vm4, %v1375_v51 }
 0x29c   : > { %1509 = vrot.lane.b32.xlu1 %v5360_v52, %s4216_s7  ;;  %1507 = vrot.lane.b32.xlu0 %v5349_v47, %s4216_s7  ;;  %v5552_v52 = vld [vmem:[%s4303_s30 + $0x22] sm:$0xff] }
 0x29d   : > { %1511 = vrot.lane.b32.xlu2 %v5370_v2, %s4216_s7  ;;  %v5562_v2 = vld [vmem:[%s4303_s30 + $0x32] sm:$0xff] }
 0x29e   : > { %v1361_v50 = vpop.permute.xlu1 %1360  ;;  %v1359_v56 = vpop.permute.xlu0 %1358 }
 0x29f   : > { %1450 = vst.msk [vmem:[#allocation2 + $0x38] sm:$0xff] %vm1442_vm4, %v1361_v50  ;;  %v1381_v63 = vpop.permute.xlu2 %1380  ;;  %v5696_v50 = vld [vmem:[%s4303_s30 + $0x142] sm:$0xff] }
 0x2a0   : > { %1449 = vst.msk [vmem:[#allocation2 + $0x30] sm:$0xff] %vm1442_vm4, %v1359_v56 }
 0x2a1   : > { %1460 = vst.msk [vmem:[#allocation2 + $0x88] sm:$0xff] %vm1442_vm4, %v1381_v63 }
 0x2a4   : > { %1515 = vrot.lane.b32.xlu1 %v5378_v4, %s4216_s7  ;;  %1513 = vrot.lane.b32.xlu0 %v5367_v31, %s4216_s7  ;;  %v5559_v31 = vld [vmem:[%s4303_s30 + $0x3a] sm:$0xff]  ;;  %v5570_v4 = vld [vmem:[%s4303_s30 + $0x4a] sm:$0xff] }
 0x2a5   : > { %1517 = vrot.lane.b32.xlu2 %v5388_v14, %s4216_s7  ;;  %v5580_v14 = vld [vmem:[%s4303_s30 + $0x52] sm:$0xff] }
 0x2a6   : > { %v1367_v62 = vpop.permute.xlu1 %1366  ;;  %v1365_v46 = vpop.permute.xlu0 %1364 }
 0x2a7   : > { %1453 = vst.msk [vmem:[#allocation2 + $0x50] sm:$0xff] %vm1442_vm4, %v1367_v62  ;;  %v1387_v60 = vpop.permute.xlu2 %1386  ;;  %v5703_v62 = vld [vmem:[%s4303_s30 + $0x15a] sm:$0xff] }
 0x2a8   : > { %1452 = vst.msk [vmem:[#allocation2 + $0x48] sm:$0xff] %vm1442_vm4, %v1365_v46  ;;  %v5706_v46 = vld [vmem:[%s4303_s30 + $0x152] sm:$0xff] }
 0x2a9   : > { %1463 = vst.msk [vmem:[#allocation2 + $0xa0] sm:$0xff] %vm1442_vm4, %v1387_v60 }
 0x2ac   : > { %1521 = vrot.lane.b32.xlu1 %v5396_v7, %s4216_s7  ;;  %1519 = vrot.lane.b32.xlu0 %v5385_v5, %s4216_s7  ;;  %v5577_v5 = vld [vmem:[%s4303_s30 + $0x62] sm:$0xff]  ;;  %v5588_v7 = vld [vmem:[%s4303_s30 + $0x6a] sm:$0xff] }
 0x2ad   : > { %1523 = vrot.lane.b32.xlu2 %v5406_v20, %s4216_s7  ;;  %v5598_v20 = vld [vmem:[%s4303_s30 + $0x7a] sm:$0xff] }
 0x2ae   : > { %v1373_v58 = vpop.permute.xlu1 %1372  ;;  %v1371_v49 = vpop.permute.xlu0 %1370 }
 0x2af   : > { %1456 = vst.msk [vmem:[#allocation2 + $0x68] sm:$0xff] %vm1442_vm4, %v1373_v58  ;;  %v1393_v28 = vpop.permute.xlu2 %1392  ;;  %v5714_v58 = vld [vmem:[%s4303_s30 + $0x16a] sm:$0xff] }
 0x2b0   : > { %1455 = vst.msk [vmem:[#allocation2 + $0x60] sm:$0xff] %vm1442_vm4, %v1371_v49 }
 0x2b1   : > { %1466 = vst.msk [vmem:[#allocation2 + $0xb8] sm:$0xff] %vm1442_vm4, %v1393_v28 }
 0x2b4   : > { %1527 = vrot.lane.b32.xlu1 %v5414_v12, %s4216_s7  ;;  %1525 = vrot.lane.b32.xlu0 %v5403_v9, %s4216_s7  ;;  %v5595_v9 = vld [vmem:[%s4303_s30 + $0x82] sm:$0xff]  ;;  %v5606_v12 = vld [vmem:[%s4303_s30 + $0x92] sm:$0xff] }
 0x2b5   : > { %1529 = vrot.lane.b32.xlu2 %v5424_v26, %s4216_s7  ;;  %v5616_v26 = vld [vmem:[%s4303_s30 + $0x9a] sm:$0xff] }
 0x2b6   : > { %v1379_v55 = vpop.permute.xlu1 %1378  ;;  %v1377_v32 = vpop.permute.xlu0 %1376 }
 0x2b7   : > { %1459 = vst.msk [vmem:[#allocation2 + $0x80] sm:$0xff] %vm1442_vm4, %v1379_v55  ;;  %v1399_v43 = vpop.permute.xlu2 %1398  ;;  %v5721_v55 = vld [vmem:[%s4303_s30 + $0x182] sm:$0xff] }
 0x2b8   : > { %1458 = vst.msk [vmem:[#allocation2 + $0x78] sm:$0xff] %vm1442_vm4, %v1377_v32  ;;  %v5724_v32 = vld [vmem:[%s4303_s30 + $0x172] sm:$0xff] }
 0x2b9   : > { %1469 = vst.msk [vmem:[#allocation2 + $0xd0] sm:$0xff] %vm1442_vm4, %v1399_v43 }
 0x2bc   : > { %1533 = vrot.lane.b32.xlu1 %v5432_v18, %s4216_s7  ;;  %1531 = vrot.lane.b32.xlu0 %v5421_v15, %s4216_s7  ;;  %v5613_v15 = vld [vmem:[%s4303_s30 + $0xaa] sm:$0xff]  ;;  %v5624_v18 = vld [vmem:[%s4303_s30 + $0xb2] sm:$0xff] }
 0x2bd   : > { %1535 = vrot.lane.b32.xlu2 %v5442_v30, %s4216_s7  ;;  %v5634_v30 = vld [vmem:[%s4303_s30 + $0xc2] sm:$0xff] }
 0x2be   : > { %v1385_v39 = vpop.permute.xlu1 %1384  ;;  %v1383_v47 = vpop.permute.xlu0 %1382 }
 0x2bf   : > { %1462 = vst.msk [vmem:[#allocation2 + $0x98] sm:$0xff] %vm1442_vm4, %v1385_v39  ;;  %v1405_v59 = vpop.permute.xlu2 %1404  ;;  %v5732_v39 = vld [vmem:[%s4303_s30 + $0x18a] sm:$0xff] }
 0x2c0   : > { %1461 = vst.msk [vmem:[#allocation2 + $0x90] sm:$0xff] %vm1442_vm4, %v1383_v47 }
 0x2c1   : > { %1472 = vst.msk [vmem:[#allocation2 + $0xe8] sm:$0xff] %vm1442_vm4, %v1405_v59 }
 0x2c4   : > { %1667 = vrot.lane.b32.xlu1 %v5544_v3, %s4218_s9  ;;  %1537 = vrot.lane.b32.xlu0 %v5439_v22, %s4216_s7  ;;  %v5631_v22 = vld [vmem:[%s4303_s30 + $0xca] sm:$0xff] }
 0x2c5   : > { %1669 = vrot.lane.b32.xlu2 %v5552_v52, %s4218_s9 }
 0x2c6   : > { %v1391_v61 = vpop.permute.xlu1 %1390  ;;  %v1389_v0 = vpop.permute.xlu0 %1388 }
 0x2c7   : > { %1465 = vst.msk [vmem:[#allocation2 + $0xb0] sm:$0xff] %vm1442_vm4, %v1391_v61  ;;  %v1476_v10 = vpop.permute.xlu2 %1475 }
 0x2c8   : > { %1464 = vst.msk [vmem:[#allocation2 + $0xa8] sm:$0xff] %vm1442_vm4, %v1389_v0 }
 0x2c9   : > { %1571 = vst.msk [vmem:[#allocation3] sm:$0xff] %vm1442_vm4, %v1476_v10 }
 0x2cc   : > { %1673 = vrot.lane.b32.xlu1 %v5559_v31, %s4218_s9  ;;  %1671 = vrot.lane.b32.xlu0 %v5562_v2, %s4218_s9 }
 0x2cd   : > { %1675 = vrot.lane.b32.xlu2 %v5570_v4, %s4218_s9 }
 0x2ce   : > { %v1397_v37 = vpop.permute.xlu1 %1396  ;;  %v1395_v6 = vpop.permute.xlu0 %1394 }
 0x2cf   : > { %1468 = vst.msk [vmem:[#allocation2 + $0xc8] sm:$0xff] %vm1442_vm4, %v1397_v37  ;;  %v1482_v8 = vpop.permute.xlu2 %1481 }
 0x2d0   : > { %1467 = vst.msk [vmem:[#allocation2 + $0xc0] sm:$0xff] %vm1442_vm4, %v1395_v6 }
 0x2d1   : > { %1574 = vst.msk [vmem:[#allocation3 + $0x18] sm:$0xff] %vm1442_vm4, %v1482_v8 }
 0x2d4   : > { %1679 = vrot.lane.b32.xlu1 %v5577_v5, %s4218_s9  ;;  %1677 = vrot.lane.b32.xlu0 %v5580_v14, %s4218_s9 }
 0x2d5   : > { %1681 = vrot.lane.b32.xlu2 %v5588_v7, %s4218_s9 }
 0x2d6   : > { %v1403_v17 = vpop.permute.xlu1 %1402  ;;  %v1401_v11 = vpop.permute.xlu0 %1400 }
 0x2d7   : > { %1471 = vst.msk [vmem:[#allocation2 + $0xe0] sm:$0xff] %vm1442_vm4, %v1403_v17  ;;  %v1488_v13 = vpop.permute.xlu2 %1487 }
 0x2d8   : > { %1470 = vst.msk [vmem:[#allocation2 + $0xd8] sm:$0xff] %vm1442_vm4, %v1401_v11 }
 0x2d9   : > { %1577 = vst.msk [vmem:[#allocation3 + $0x30] sm:$0xff] %vm1442_vm4, %v1488_v13 }
 0x2dc   : > { %1685 = vrot.lane.b32.xlu1 %v5595_v9, %s4218_s9  ;;  %1683 = vrot.lane.b32.xlu0 %v5598_v20, %s4218_s9 }
 0x2dd   : > { %1687 = vrot.lane.b32.xlu2 %v5606_v12, %s4218_s9 }
 0x2de   : > { %v1409_v23 = vpop.permute.xlu1 %1408  ;;  %v1407_v16 = vpop.permute.xlu0 %1406 }
 0x2df   : > { %1474 = vst.msk [vmem:[#allocation2 + $0xf8] sm:$0xff] %vm1442_vm4, %v1409_v23  ;;  %v1494_v19 = vpop.permute.xlu2 %1493 }
 0x2e0   : > { %1473 = vst.msk [vmem:[#allocation2 + $0xf0] sm:$0xff] %vm1442_vm4, %v1407_v16 }
 0x2e1   : > { %1580 = vst.msk [vmem:[#allocation3 + $0x48] sm:$0xff] %vm1442_vm4, %v1494_v19 }
 0x2e4   : > { %1691 = vrot.lane.b32.xlu1 %v5613_v15, %s4218_s9  ;;  %1689 = vrot.lane.b32.xlu0 %v5616_v26, %s4218_s9 }
 0x2e5   : > { %1693 = vrot.lane.b32.xlu2 %v5624_v18, %s4218_s9 }
 0x2e6   : > { %v1480_v29 = vpop.permute.xlu1 %1479  ;;  %v1478_v21 = vpop.permute.xlu0 %1477 }
 0x2e7   : > { %1573 = vst.msk [vmem:[#allocation3 + $0x10] sm:$0xff] %vm1442_vm4, %v1480_v29  ;;  %v1500_v45 = vpop.permute.xlu2 %1499 }
 0x2e8   : > { %1572 = vst.msk [vmem:[#allocation3 + $0x8] sm:$0xff] %vm1442_vm4, %v1478_v21 }
 0x2e9   : > { %1583 = vst.msk [vmem:[#allocation3 + $0x60] sm:$0xff] %vm1442_vm4, %v1500_v45 }
 0x2ec   : > { %1697 = vrot.lane.b32.xlu1 %v5631_v22, %s4218_s9  ;;  %1695 = vrot.lane.b32.xlu0 %v5634_v30, %s4218_s9 }
 0x2ed   : > { %1699 = vrot.lane.b32.xlu2 %v5642_v53, %s4218_s9 }
 0x2ee   : > { %v1486_v1 = vpop.permute.xlu1 %1485  ;;  %v1484_v42 = vpop.permute.xlu0 %1483 }
 0x2ef   : > { %1576 = vst.msk [vmem:[#allocation3 + $0x28] sm:$0xff] %vm1442_vm4, %v1486_v1  ;;  %v1506_v48 = vpop.permute.xlu2 %1505 }
 0x2f0   : > { %1575 = vst.msk [vmem:[#allocation3 + $0x20] sm:$0xff] %vm1442_vm4, %v1484_v42 }
 0x2f1   : > { %1586 = vst.msk [vmem:[#allocation3 + $0x78] sm:$0xff] %vm1442_vm4, %v1506_v48 }
 0x2f4   : > { %1703 = vrot.lane.b32.xlu1 %v5649_v38, %s4218_s9  ;;  %1701 = vrot.lane.b32.xlu0 %v5652_v27, %s4218_s9 }
 0x2f5   : > { %1705 = vrot.lane.b32.xlu2 %v5660_v57, %s4218_s9 }
 0x2f6   : > { %v1492_v54 = vpop.permute.xlu1 %1491  ;;  %v1490_v24 = vpop.permute.xlu0 %1489 }
 0x2f7   : > { %1579 = vst.msk [vmem:[#allocation3 + $0x40] sm:$0xff] %vm1442_vm4, %v1492_v54  ;;  %v1512_v34 = vpop.permute.xlu2 %1511 }
 0x2f8   : > { %1578 = vst.msk [vmem:[#allocation3 + $0x38] sm:$0xff] %vm1442_vm4, %v1490_v24 }
 0x2f9   : > { %1589 = vst.msk [vmem:[#allocation3 + $0x90] sm:$0xff] %vm1442_vm4, %v1512_v34 }
 0x2fc   : > { %1709 = vrot.lane.b32.xlu1 %v5667_v35, %s4218_s9  ;;  %1707 = vrot.lane.b32.xlu0 %v5670_v25, %s4218_s9 }
 0x2fd   : > { %1711 = vrot.lane.b32.xlu2 %v5678_v33, %s4218_s9 }
 0x2fe   : > { %v1498_v36 = vpop.permute.xlu1 %1497  ;;  %v1496_v41 = vpop.permute.xlu0 %1495 }
 0x2ff   : > { %1582 = vst.msk [vmem:[#allocation3 + $0x58] sm:$0xff] %vm1442_vm4, %v1498_v36  ;;  %v1518_v51 = vpop.permute.xlu2 %1517 }
 0x300   : > { %1581 = vst.msk [vmem:[#allocation3 + $0x50] sm:$0xff] %vm1442_vm4, %v1496_v41 }
 0x301   : > { %1592 = vst.msk [vmem:[#allocation3 + $0xa8] sm:$0xff] %vm1442_vm4, %v1518_v51 }
 0x304   : > { %1715 = vrot.lane.b32.xlu1 %v5685_v40, %s4218_s9  ;;  %1713 = vrot.lane.b32.xlu0 %v5688_v44, %s4218_s9 }
 0x305   : > { %1717 = vrot.lane.b32.xlu2 %v5696_v50, %s4218_s9 }
 0x306   : > { %v1504_v56 = vpop.permute.xlu1 %1503  ;;  %v1502_v63 = vpop.permute.xlu0 %1501 }
 0x307   : > { %1585 = vst.msk [vmem:[#allocation3 + $0x70] sm:$0xff] %vm1442_vm4, %v1504_v56  ;;  %v1524_v60 = vpop.permute.xlu2 %1523 }
 0x308   : > { %1584 = vst.msk [vmem:[#allocation3 + $0x68] sm:$0xff] %vm1442_vm4, %v1502_v63 }
 0x309   : > { %1595 = vst.msk [vmem:[#allocation3 + $0xc0] sm:$0xff] %vm1442_vm4, %v1524_v60 }
 0x30c   : > { %1721 = vrot.lane.b32.xlu1 %v5703_v62, %s4218_s9  ;;  %1719 = vrot.lane.b32.xlu0 %v5706_v46, %s4218_s9 }
 0x30d   : > { %1723 = vrot.lane.b32.xlu2 %v5714_v58, %s4218_s9 }
 0x30e   : > { %v1510_v49 = vpop.permute.xlu1 %1509  ;;  %v1508_v28 = vpop.permute.xlu0 %1507 }
 0x30f   : > { %1588 = vst.msk [vmem:[#allocation3 + $0x88] sm:$0xff] %vm1442_vm4, %v1510_v49  ;;  %v1530_v43 = vpop.permute.xlu2 %1529 }
 0x310   : > { %1587 = vst.msk [vmem:[#allocation3 + $0x80] sm:$0xff] %vm1442_vm4, %v1508_v28 }
 0x311   : > { %1598 = vst.msk [vmem:[#allocation3 + $0xd8] sm:$0xff] %vm1442_vm4, %v1530_v43 }
 0x314   : > { %1727 = vrot.lane.b32.xlu1 %v5721_v55, %s4218_s9  ;;  %1725 = vrot.lane.b32.xlu0 %v5724_v32, %s4218_s9 }
 0x315   : > { %1729 = vrot.lane.b32.xlu2 %v5732_v39, %s4218_s9 }
 0x316   : > { %v1516_v47 = vpop.permute.xlu1 %1515  ;;  %v1514_v59 = vpop.permute.xlu0 %1513 }
 0x317   : > { %1591 = vst.msk [vmem:[#allocation3 + $0xa0] sm:$0xff] %vm1442_vm4, %v1516_v47  ;;  %v1536_v61 = vpop.permute.xlu2 %1535 }
 0x318   : > { %1590 = vst.msk [vmem:[#allocation3 + $0x98] sm:$0xff] %vm1442_vm4, %v1514_v59 }
 0x319   : > { %1601 = vst.msk [vmem:[#allocation3 + $0xf0] sm:$0xff] %vm1442_vm4, %v1536_v61  ;;  %v5931_v61 = vld [vmem:[%s4303_s30 + $0xf8] sm:$0xff] }
 0x31c   : > { %1798 = vrot.lane.b32.xlu1 %v5552_v52, %s4217_s8  ;;  %1796 = vrot.lane.b32.xlu0 %v5544_v3, %s4217_s8 }
 0x31d   : > { %1800 = vrot.lane.b32.xlu2 %v5562_v2, %s4217_s8 }
 0x31e   : > { %v1522_v0 = vpop.permute.xlu1 %1521  ;;  %v1520_v10 = vpop.permute.xlu0 %1519 }
 0x31f   : > { %1594 = vst.msk [vmem:[#allocation3 + $0xb8] sm:$0xff] %vm1442_vm4, %v1522_v0  ;;  %v1670_v37 = vpop.permute.xlu2 %1669  ;;  %v5934_v0 = vld [vmem:[%s4303_s30 + $0xf0] sm:$0xff] }
 0x320   : > { %1593 = vst.msk [vmem:[#allocation3 + $0xb0] sm:$0xff] %vm1442_vm4, %v1520_v10 }
 0x321   : > { %1765 = vst.msk [vmem:[#allocation2 + $0x8] sm:$0xff] %vm1763_vm5, %v1670_v37  ;;  %v5942_v37 = vld [vmem:[%s4303_s30 + $0x108] sm:$0xff] }
 0x324   : > { %1804 = vrot.lane.b32.xlu1 %v5570_v4, %s4217_s8  ;;  %1802 = vrot.lane.b32.xlu0 %v5559_v31, %s4217_s8 }
 0x325   : > { %1806 = vrot.lane.b32.xlu2 %v5580_v14, %s4217_s8 }
 0x326   : > { %v1528_v3 = vpop.permute.xlu1 %1527  ;;  %v1526_v52 = vpop.permute.xlu0 %1525 }
 0x327   : > { %1597 = vst.msk [vmem:[#allocation3 + $0xd0] sm:$0xff] %vm1442_vm4, %v1528_v3  ;;  %v1676_v2 = vpop.permute.xlu2 %1675 }
 0x328   : > { %1596 = vst.msk [vmem:[#allocation3 + $0xc8] sm:$0xff] %vm1442_vm4, %v1526_v52 }
 0x329   : > { %1768 = vst.msk [vmem:[#allocation2 + $0x20] sm:$0xff] %vm1763_vm5, %v1676_v2  ;;  %v5949_v2 = vld [vmem:[%s4303_s30 + $0x120] sm:$0xff] }
 0x32c   : > { %1810 = vrot.lane.b32.xlu1 %v5588_v7, %s4217_s8  ;;  %1808 = vrot.lane.b32.xlu0 %v5577_v5, %s4217_s8 }
 0x32d   : > { %1812 = vrot.lane.b32.xlu2 %v5598_v20, %s4217_s8 }
 0x32e   : > { %v1534_v4 = vpop.permute.xlu1 %1533  ;;  %v1532_v31 = vpop.permute.xlu0 %1531 }
 0x32f   : > { %1600 = vst.msk [vmem:[#allocation3 + $0xe8] sm:$0xff] %vm1442_vm4, %v1534_v4  ;;  %v1682_v6 = vpop.permute.xlu2 %1681  ;;  %v5952_v4 = vld [vmem:[%s4303_s30 + $0x110] sm:$0xff] }
 0x330   : > { %1599 = vst.msk [vmem:[#allocation3 + $0xe0] sm:$0xff] %vm1442_vm4, %v1532_v31 }
 0x331   : > { %1771 = vst.msk [vmem:[#allocation2 + $0x38] sm:$0xff] %vm1763_vm5, %v1682_v6  ;;  %v5960_v6 = vld [vmem:[%s4303_s30 + $0x128] sm:$0xff] }
 0x334   : > { %1816 = vrot.lane.b32.xlu1 %v5606_v12, %s4217_s8  ;;  %1814 = vrot.lane.b32.xlu0 %v5595_v9, %s4217_s8 }
 0x335   : > { %1818 = vrot.lane.b32.xlu2 %v5616_v26, %s4217_s8 }
 0x336   : > { %v1668_v14 = vpop.permute.xlu1 %1667  ;;  %v1538_v5 = vpop.permute.xlu0 %1537 }
 0x337   : > { %1764 = vst.msk [vmem:[#allocation2] sm:$0xff] %vm1763_vm5, %v1668_v14  ;;  %v1688_v8 = vpop.permute.xlu2 %1687 }
 0x338   : > { %1602 = vst.msk [vmem:[#allocation3 + $0xf8] sm:$0xff] %vm1442_vm4, %v1538_v5 }
 0x339   : > { %1774 = vst.msk [vmem:[#allocation2 + $0x50] sm:$0xff] %vm1763_vm5, %v1688_v8  ;;  %v5967_v8 = vld [vmem:[%s4303_s30 + $0x140] sm:$0xff] }
 0x33c   : > { %1822 = vrot.lane.b32.xlu1 %v5624_v18, %s4217_s8  ;;  %1820 = vrot.lane.b32.xlu0 %v5613_v15, %s4217_s8 }
 0x33d   : > { %1824 = vrot.lane.b32.xlu2 %v5634_v30, %s4217_s8 }
 0x33e   : > { %v1674_v7 = vpop.permute.xlu1 %1673  ;;  %v1672_v17 = vpop.permute.xlu0 %1671 }
 0x33f   : > { %1767 = vst.msk [vmem:[#allocation2 + $0x18] sm:$0xff] %vm1763_vm5, %v1674_v7  ;;  %v1694_v11 = vpop.permute.xlu2 %1693  ;;  %v5970_v7 = vld [vmem:[%s4303_s30 + $0x138] sm:$0xff] }
 0x340   : > { %1766 = vst.msk [vmem:[#allocation2 + $0x10] sm:$0xff] %vm1763_vm5, %v1672_v17 }
 0x341   : > { %1777 = vst.msk [vmem:[#allocation2 + $0x68] sm:$0xff] %vm1763_vm5, %v1694_v11  ;;  %v5978_v11 = vld [vmem:[%s4303_s30 + $0x150] sm:$0xff] }
 0x344   : > { %1828 = vrot.lane.b32.xlu1 %v5642_v53, %s4217_s8  ;;  %1826 = vrot.lane.b32.xlu0 %v5631_v22, %s4217_s8  ;;  %v5834_v53 = vld [vmem:[%s4303_s30 + $0x30] sm:$0xff] }
 0x345   : > { %1830 = vrot.lane.b32.xlu2 %v5652_v27, %s4217_s8  ;;  %v5844_v27 = vld [vmem:[%s4303_s30 + $0x38] sm:$0xff] }
 0x346   : > { %v1680_v9 = vpop.permute.xlu1 %1679  ;;  %v1678_v20 = vpop.permute.xlu0 %1677 }
 0x347   : > { %1770 = vst.msk [vmem:[#allocation2 + $0x30] sm:$0xff] %vm1763_vm5, %v1680_v9  ;;  %v1700_v13 = vpop.permute.xlu2 %1699 }
 0x348   : > { %1769 = vst.msk [vmem:[#allocation2 + $0x28] sm:$0xff] %vm1763_vm5, %v1678_v20 }
 0x349   : > { %1780 = vst.msk [vmem:[#allocation2 + $0x80] sm:$0xff] %vm1763_vm5, %v1700_v13  ;;  %v5985_v13 = vld [vmem:[%s4303_s30 + $0x168] sm:$0xff] }
 0x34c   : > { %1834 = vrot.lane.b32.xlu1 %v5660_v57, %s4217_s8  ;;  %1832 = vrot.lane.b32.xlu0 %v5649_v38, %s4217_s8  ;;  %v5841_v38 = vld [vmem:[%s4303_s30 + $0x48] sm:$0xff]  ;;  %v5852_v57 = vld [vmem:[%s4303_s30 + $0x50] sm:$0xff] }
 0x34d   : > { %1836 = vrot.lane.b32.xlu2 %v5670_v25, %s4217_s8  ;;  %v5862_v25 = vld [vmem:[%s4303_s30 + $0x60] sm:$0xff] }
 0x34e   : > { %v1686_v12 = vpop.permute.xlu1 %1685  ;;  %v1684_v23 = vpop.permute.xlu0 %1683 }
 0x34f   : > { %1773 = vst.msk [vmem:[#allocation2 + $0x48] sm:$0xff] %vm1763_vm5, %v1686_v12  ;;  %v1706_v16 = vpop.permute.xlu2 %1705  ;;  %v5988_v12 = vld [vmem:[%s4303_s30 + $0x158] sm:$0xff] }
 0x350   : > { %1772 = vst.msk [vmem:[#allocation2 + $0x40] sm:$0xff] %vm1763_vm5, %v1684_v23 }
 0x351   : > { %1783 = vst.msk [vmem:[#allocation2 + $0x98] sm:$0xff] %vm1763_vm5, %v1706_v16  ;;  %v5996_v16 = vld [vmem:[%s4303_s30 + $0x170] sm:$0xff] }
 0x354   : > { %1840 = vrot.lane.b32.xlu1 %v5678_v33, %s4217_s8  ;;  %1838 = vrot.lane.b32.xlu0 %v5667_v35, %s4217_s8  ;;  %v5859_v35 = vld [vmem:[%s4303_s30 + $0x68] sm:$0xff]  ;;  %v5870_v33 = vld [vmem:[%s4303_s30 + $0x78] sm:$0xff] }
 0x355   : > { %1842 = vrot.lane.b32.xlu2 %v5688_v44, %s4217_s8  ;;  %v5880_v44 = vld [vmem:[%s4303_s30 + $0x80] sm:$0xff] }
 0x356   : > { %v1692_v15 = vpop.permute.xlu1 %1691  ;;  %v1690_v26 = vpop.permute.xlu0 %1689 }
 0x357   : > { %1776 = vst.msk [vmem:[#allocation2 + $0x60] sm:$0xff] %vm1763_vm5, %v1692_v15  ;;  %v1712_v19 = vpop.permute.xlu2 %1711 }
 0x358   : > { %1775 = vst.msk [vmem:[#allocation2 + $0x58] sm:$0xff] %vm1763_vm5, %v1690_v26 }
 0x359   : > { %1786 = vst.msk [vmem:[#allocation2 + $0xb0] sm:$0xff] %vm1763_vm5, %v1712_v19  ;;  %v6003_v19 = vld [vmem:[%s4303_s30 + $0x188] sm:$0xff] }
 0x35c   : > { %1846 = vrot.lane.b32.xlu1 %v5696_v50, %s4217_s8  ;;  %1844 = vrot.lane.b32.xlu0 %v5685_v40, %s4217_s8  ;;  %v5877_v40 = vld [vmem:[%s4303_s30 + $0x90] sm:$0xff]  ;;  %v5888_v50 = vld [vmem:[%s4303_s30 + $0x98] sm:$0xff] }
 0x35d   : > { %1848 = vrot.lane.b32.xlu2 %v5706_v46, %s4217_s8  ;;  %v5898_v46 = vld [vmem:[%s4303_s30 + $0xa8] sm:$0xff] }
 0x35e   : > { %v1698_v18 = vpop.permute.xlu1 %1697  ;;  %v1696_v29 = vpop.permute.xlu0 %1695 }
 0x35f   : > { %1779 = vst.msk [vmem:[#allocation2 + $0x78] sm:$0xff] %vm1763_vm5, %v1698_v18  ;;  %v1718_v21 = vpop.permute.xlu2 %1717  ;;  %v6006_v18 = vld [vmem:[%s4303_s30 + $0x180] sm:$0xff] }
 0x360   : > { %1778 = vst.msk [vmem:[#allocation2 + $0x70] sm:$0xff] %vm1763_vm5, %v1696_v29 }
 0x361   : > { %1789 = vst.msk [vmem:[#allocation2 + $0xc8] sm:$0xff] %vm1763_vm5, %v1718_v21  ;;  %v6014_v21 = vld [vmem:[%s4303_s30 + $0x198] sm:$0xff] }
 0x364   : > { %1852 = vrot.lane.b32.xlu1 %v5714_v58, %s4217_s8  ;;  %1850 = vrot.lane.b32.xlu0 %v5703_v62, %s4217_s8  ;;  %v5895_v62 = vld [vmem:[%s4303_s30 + $0xb0] sm:$0xff]  ;;  %v5906_v58 = vld [vmem:[%s4303_s30 + $0xc0] sm:$0xff] }
 0x365   : > { %1854 = vrot.lane.b32.xlu2 %v5724_v32, %s4217_s8  ;;  %v5916_v32 = vld [vmem:[%s4303_s30 + $0xc8] sm:$0xff] }
 0x366   : > { %v1704_v22 = vpop.permute.xlu1 %1703  ;;  %v1702_v30 = vpop.permute.xlu0 %1701 }
 0x367   : > { %1782 = vst.msk [vmem:[#allocation2 + $0x90] sm:$0xff] %vm1763_vm5, %v1704_v22  ;;  %v1724_v45 = vpop.permute.xlu2 %1723 }
 0x368   : > { %1781 = vst.msk [vmem:[#allocation2 + $0x88] sm:$0xff] %vm1763_vm5, %v1702_v30 }
 0x369   : > { %1792 = vst.msk [vmem:[#allocation2 + $0xe0] sm:$0xff] %vm1763_vm5, %v1724_v45  ;;  %v6021_v45 = vld [vmem:[%s4303_s30 + $0x1a0] sm:$0xff] }
 0x36c   : > { %1858 = vrot.lane.b32.xlu1 %v5732_v39, %s4217_s8  ;;  %1856 = vrot.lane.b32.xlu0 %v5721_v55, %s4217_s8  ;;  %v5913_v55 = vld [vmem:[%s4303_s30 + $0xd8] sm:$0xff]  ;;  %v5924_v39 = vld [vmem:[%s4303_s30 + $0xe0] sm:$0xff] }
 0x36d   : > { %1991 = vrot.lane.b32.xlu2 %v5834_v53, %s4219_s10 }
 0x36e   : > { %v1710_v1 = vpop.permute.xlu1 %1709  ;;  %v1708_v42 = vpop.permute.xlu0 %1707 }
 0x36f   : > { %1785 = vst.msk [vmem:[#allocation2 + $0xa8] sm:$0xff] %vm1763_vm5, %v1710_v1  ;;  %v1730_v48 = vpop.permute.xlu2 %1729 }
 0x370   : > { %1784 = vst.msk [vmem:[#allocation2 + $0xa0] sm:$0xff] %vm1763_vm5, %v1708_v42 }
 0x371   : > { %1795 = vst.msk [vmem:[#allocation2 + $0xf8] sm:$0xff] %vm1763_vm5, %v1730_v48 }
 0x374   : > { %1995 = vrot.lane.b32.xlu1 %v5841_v38, %s4219_s10  ;;  %1993 = vrot.lane.b32.xlu0 %v5844_v27, %s4219_s10 }
 0x375   : > { %1997 = vrot.lane.b32.xlu2 %v5852_v57, %s4219_s10 }
 0x376   : > { %v1716_v54 = vpop.permute.xlu1 %1715  ;;  %v1714_v24 = vpop.permute.xlu0 %1713 }
 0x377   : > { %1788 = vst.msk [vmem:[#allocation2 + $0xc0] sm:$0xff] %vm1763_vm5, %v1716_v54  ;;  %v1801_v34 = vpop.permute.xlu2 %1800 }
 0x378   : > { %1787 = vst.msk [vmem:[#allocation2 + $0xb8] sm:$0xff] %vm1763_vm5, %v1714_v24 }
 0x379   : > { %1894 = vst.msk [vmem:[#allocation3 + $0x10] sm:$0xff] %vm1763_vm5, %v1801_v34 }
 0x37c   : > { %2001 = vrot.lane.b32.xlu1 %v5859_v35, %s4219_s10  ;;  %1999 = vrot.lane.b32.xlu0 %v5862_v25, %s4219_s10 }
 0x37d   : > { %2003 = vrot.lane.b32.xlu2 %v5870_v33, %s4219_s10 }
 0x37e   : > { %v1722_v36 = vpop.permute.xlu1 %1721  ;;  %v1720_v41 = vpop.permute.xlu0 %1719 }
 0x37f   : > { %1791 = vst.msk [vmem:[#allocation2 + $0xd8] sm:$0xff] %vm1763_vm5, %v1722_v36  ;;  %v1807_v51 = vpop.permute.xlu2 %1806 }
 0x380   : > { %1790 = vst.msk [vmem:[#allocation2 + $0xd0] sm:$0xff] %vm1763_vm5, %v1720_v41 }
 0x381   : > { %1897 = vst.msk [vmem:[#allocation3 + $0x28] sm:$0xff] %vm1763_vm5, %v1807_v51 }
 0x384   : > { %2007 = vrot.lane.b32.xlu1 %v5877_v40, %s4219_s10  ;;  %2005 = vrot.lane.b32.xlu0 %v5880_v44, %s4219_s10 }
 0x385   : > { %2009 = vrot.lane.b32.xlu2 %v5888_v50, %s4219_s10 }
 0x386   : > { %v1728_v56 = vpop.permute.xlu1 %1727  ;;  %v1726_v63 = vpop.permute.xlu0 %1725 }
 0x387   : > { %1794 = vst.msk [vmem:[#allocation2 + $0xf0] sm:$0xff] %vm1763_vm5, %v1728_v56  ;;  %v1813_v60 = vpop.permute.xlu2 %1812 }
 0x388   : > { %1793 = vst.msk [vmem:[#allocation2 + $0xe8] sm:$0xff] %vm1763_vm5, %v1726_v63 }
 0x389   : > { %1900 = vst.msk [vmem:[#allocation3 + $0x40] sm:$0xff] %vm1763_vm5, %v1813_v60 }
 0x38c   : > { %2013 = vrot.lane.b32.xlu1 %v5895_v62, %s4219_s10  ;;  %2011 = vrot.lane.b32.xlu0 %v5898_v46, %s4219_s10 }
 0x38d   : > { %2015 = vrot.lane.b32.xlu2 %v5906_v58, %s4219_s10 }
 0x38e   : > { %v1799_v49 = vpop.permute.xlu1 %1798  ;;  %v1797_v28 = vpop.permute.xlu0 %1796 }
 0x38f   : > { %1893 = vst.msk [vmem:[#allocation3 + $0x8] sm:$0xff] %vm1763_vm5, %v1799_v49  ;;  %v1819_v43 = vpop.permute.xlu2 %1818 }
 0x390   : > { %1892 = vst.msk [vmem:[#allocation3] sm:$0xff] %vm1763_vm5, %v1797_v28 }
 0x391   : > { %1903 = vst.msk [vmem:[#allocation3 + $0x58] sm:$0xff] %vm1763_vm5, %v1819_v43 }
 0x394   : > { %2019 = vrot.lane.b32.xlu1 %v5913_v55, %s4219_s10  ;;  %2017 = vrot.lane.b32.xlu0 %v5916_v32, %s4219_s10 }
 0x395   : > { %2021 = vrot.lane.b32.xlu2 %v5924_v39, %s4219_s10 }
 0x396   : > { %v1805_v47 = vpop.permute.xlu1 %1804  ;;  %v1803_v59 = vpop.permute.xlu0 %1802 }
 0x397   : > { %1896 = vst.msk [vmem:[#allocation3 + $0x20] sm:$0xff] %vm1763_vm5, %v1805_v47  ;;  %v1825_v10 = vpop.permute.xlu2 %1824 }
 0x398   : > { %1895 = vst.msk [vmem:[#allocation3 + $0x18] sm:$0xff] %vm1763_vm5, %v1803_v59 }
 0x399   : > { %1906 = vst.msk [vmem:[#allocation3 + $0x70] sm:$0xff] %vm1763_vm5, %v1825_v10 }
 0x39c   : > { %2025 = vrot.lane.b32.xlu1 %v5931_v61, %s4219_s10  ;;  %2023 = vrot.lane.b32.xlu0 %v5934_v0, %s4219_s10 }
 0x39d   : > { %2027 = vrot.lane.b32.xlu2 %v5942_v37, %s4219_s10 }
 0x39e   : > { %v1811_v3 = vpop.permute.xlu1 %1810  ;;  %v1809_v52 = vpop.permute.xlu0 %1808 }
 0x39f   : > { %1899 = vst.msk [vmem:[#allocation3 + $0x38] sm:$0xff] %vm1763_vm5, %v1811_v3  ;;  %v1831_v31 = vpop.permute.xlu2 %1830 }
 0x3a0   : > { %1898 = vst.msk [vmem:[#allocation3 + $0x30] sm:$0xff] %vm1763_vm5, %v1809_v52 }
 0x3a1   : > { %1909 = vst.msk [vmem:[#allocation3 + $0x88] sm:$0xff] %vm1763_vm5, %v1831_v31 }
 0x3a4   : > { %2031 = vrot.lane.b32.xlu1 %v5949_v2, %s4219_s10  ;;  %2029 = vrot.lane.b32.xlu0 %v5952_v4, %s4219_s10 }
 0x3a5   : > { %2033 = vrot.lane.b32.xlu2 %v5960_v6, %s4219_s10 }
 0x3a6   : > { %v1817_v14 = vpop.permute.xlu1 %1816  ;;  %v1815_v5 = vpop.permute.xlu0 %1814 }
 0x3a7   : > { %1902 = vst.msk [vmem:[#allocation3 + $0x50] sm:$0xff] %vm1763_vm5, %v1817_v14  ;;  %v1837_v17 = vpop.permute.xlu2 %1836 }
 0x3a8   : > { %1901 = vst.msk [vmem:[#allocation3 + $0x48] sm:$0xff] %vm1763_vm5, %v1815_v5 }
 0x3a9   : > { %1912 = vst.msk [vmem:[#allocation3 + $0xa0] sm:$0xff] %vm1763_vm5, %v1837_v17 }
 0x3ac   : > { %2037 = vrot.lane.b32.xlu1 %v5967_v8, %s4219_s10  ;;  %2035 = vrot.lane.b32.xlu0 %v5970_v7, %s4219_s10 }
 0x3ad   : > { %2039 = vrot.lane.b32.xlu2 %v5978_v11, %s4219_s10 }
 0x3ae   : > { %v1823_v9 = vpop.permute.xlu1 %1822  ;;  %v1821_v20 = vpop.permute.xlu0 %1820 }
 0x3af   : > { %1905 = vst.msk [vmem:[#allocation3 + $0x68] sm:$0xff] %vm1763_vm5, %v1823_v9  ;;  %v1843_v23 = vpop.permute.xlu2 %1842 }
 0x3b0   : > { %1904 = vst.msk [vmem:[#allocation3 + $0x60] sm:$0xff] %vm1763_vm5, %v1821_v20 }
 0x3b1   : > { %1915 = vst.msk [vmem:[#allocation3 + $0xb8] sm:$0xff] %vm1763_vm5, %v1843_v23 }
 0x3b4   : > { %2043 = vrot.lane.b32.xlu1 %v5985_v13, %s4219_s10  ;;  %2041 = vrot.lane.b32.xlu0 %v5988_v12, %s4219_s10 }
 0x3b5   : > { %2045 = vrot.lane.b32.xlu2 %v5996_v16, %s4219_s10 }
 0x3b6   : > { %v1829_v15 = vpop.permute.xlu1 %1828  ;;  %v1827_v26 = vpop.permute.xlu0 %1826 }
 0x3b7   : > { %1908 = vst.msk [vmem:[#allocation3 + $0x80] sm:$0xff] %vm1763_vm5, %v1829_v15  ;;  %v1849_v29 = vpop.permute.xlu2 %1848 }
 0x3b8   : > { %1907 = vst.msk [vmem:[#allocation3 + $0x78] sm:$0xff] %vm1763_vm5, %v1827_v26 }
 0x3b9   : > { %1918 = vst.msk [vmem:[#allocation3 + $0xd0] sm:$0xff] %vm1763_vm5, %v1849_v29 }
 0x3bc   : > { %2049 = vrot.lane.b32.xlu1 %v6003_v19, %s4219_s10  ;;  %2047 = vrot.lane.b32.xlu0 %v6006_v18, %s4219_s10 }
 0x3bd   : > { %2051 = vrot.lane.b32.xlu2 %v6014_v21, %s4219_s10 }
 0x3be   : > { %v1835_v22 = vpop.permute.xlu1 %1834  ;;  %v1833_v30 = vpop.permute.xlu0 %1832 }
 0x3bf   : > { %1911 = vst.msk [vmem:[#allocation3 + $0x98] sm:$0xff] %vm1763_vm5, %v1835_v22  ;;  %v1855_v1 = vpop.permute.xlu2 %1854 }
 0x3c0   : > { %1910 = vst.msk [vmem:[#allocation3 + $0x90] sm:$0xff] %vm1763_vm5, %v1833_v30 }
 0x3c1   : > { %1921 = vst.msk [vmem:[#allocation3 + $0xe8] sm:$0xff] %vm1763_vm5, %v1855_v1  ;;  %v6216_v1 = vld [vmem:[%s4303_s30 + $0xe1] sm:$0xff] }
 0x3c4   : > { %2120 = vrot.lane.b32.xlu1 %v5834_v53, %s4218_s9  ;;  %2053 = vrot.lane.b32.xlu0 %v6021_v45, %s4219_s10 }
 0x3c5   : > { %2122 = vrot.lane.b32.xlu2 %v5844_v27, %s4218_s9 }
 0x3c6   : > { %v1841_v42 = vpop.permute.xlu1 %1840  ;;  %v1839_v48 = vpop.permute.xlu0 %1838 }
 0x3c7   : > { %1914 = vst.msk [vmem:[#allocation3 + $0xb0] sm:$0xff] %vm1763_vm5, %v1841_v42  ;;  %v1992_v54 = vpop.permute.xlu2 %1991 }
 0x3c8   : > { %1913 = vst.msk [vmem:[#allocation3 + $0xa8] sm:$0xff] %vm1763_vm5, %v1839_v48  ;;  %v6224_v48 = vld [vmem:[%s4303_s30 + $0xf9] sm:$0xff] }
 0x3c9   : > { %2088 = vst.msk [vmem:[#allocation2] sm:$0xff] %vm2087_vm6, %v1992_v54 }
 0x3cc   : > { %2126 = vrot.lane.b32.xlu1 %v5852_v57, %s4218_s9  ;;  %2124 = vrot.lane.b32.xlu0 %v5841_v38, %s4218_s9 }
 0x3cd   : > { %2128 = vrot.lane.b32.xlu2 %v5862_v25, %s4218_s9 }
 0x3ce   : > { %v1847_v53 = vpop.permute.xlu1 %1846  ;;  %v1845_v24 = vpop.permute.xlu0 %1844 }
 0x3cf   : > { %1917 = vst.msk [vmem:[#allocation3 + $0xc8] sm:$0xff] %vm1763_vm5, %v1847_v53  ;;  %v1998_v27 = vpop.permute.xlu2 %1997 }
 0x3d0   : > { %1916 = vst.msk [vmem:[#allocation3 + $0xc0] sm:$0xff] %vm1763_vm5, %v1845_v24  ;;  %v6231_v24 = vld [vmem:[%s4303_s30 + $0x111] sm:$0xff] }
 0x3d1   : > { %2091 = vst.msk [vmem:[#allocation2 + $0x18] sm:$0xff] %vm2087_vm6, %v1998_v27  ;;  %v6234_v27 = vld [vmem:[%s4303_s30 + $0x109] sm:$0xff] }
 0x3d4   : > { %2132 = vrot.lane.b32.xlu1 %v5870_v33, %s4218_s9  ;;  %2130 = vrot.lane.b32.xlu0 %v5859_v35, %s4218_s9 }
 0x3d5   : > { %2134 = vrot.lane.b32.xlu2 %v5880_v44, %s4218_s9 }
 0x3d6   : > { %v1853_v57 = vpop.permute.xlu1 %1852  ;;  %v1851_v38 = vpop.permute.xlu0 %1850 }
 0x3d7   : > { %1920 = vst.msk [vmem:[#allocation3 + $0xe0] sm:$0xff] %vm1763_vm5, %v1853_v57  ;;  %v2004_v34 = vpop.permute.xlu2 %2003 }
 0x3d8   : > { %1919 = vst.msk [vmem:[#allocation3 + $0xd8] sm:$0xff] %vm1763_vm5, %v1851_v38  ;;  %v6242_v38 = vld [vmem:[%s4303_s30 + $0x121] sm:$0xff] }
 0x3d9   : > { %2094 = vst.msk [vmem:[#allocation2 + $0x30] sm:$0xff] %vm2087_vm6, %v2004_v34 }
 0x3dc   : > { %2138 = vrot.lane.b32.xlu1 %v5888_v50, %s4218_s9  ;;  %2136 = vrot.lane.b32.xlu0 %v5877_v40, %s4218_s9 }
 0x3dd   : > { %2140 = vrot.lane.b32.xlu2 %v5898_v46, %s4218_s9 }
 0x3de   : > { %v1859_v25 = vpop.permute.xlu1 %1858  ;;  %v1857_v35 = vpop.permute.xlu0 %1856 }
 0x3df   : > { %1923 = vst.msk [vmem:[#allocation3 + $0xf8] sm:$0xff] %vm1763_vm5, %v1859_v25  ;;  %v2010_v33 = vpop.permute.xlu2 %2009 }
 0x3e0   : > { %1922 = vst.msk [vmem:[#allocation3 + $0xf0] sm:$0xff] %vm1763_vm5, %v1857_v35  ;;  %v6249_v35 = vld [vmem:[%s4303_s30 + $0x139] sm:$0xff] }
 0x3e1   : > { %2097 = vst.msk [vmem:[#allocation2 + $0x48] sm:$0xff] %vm2087_vm6, %v2010_v33  ;;  %v6252_v33 = vld [vmem:[%s4303_s30 + $0x129] sm:$0xff] }
 0x3e4   : > { %2144 = vrot.lane.b32.xlu1 %v5906_v58, %s4218_s9  ;;  %2142 = vrot.lane.b32.xlu0 %v5895_v62, %s4218_s9 }
 0x3e5   : > { %2146 = vrot.lane.b32.xlu2 %v5916_v32, %s4218_s9 }
 0x3e6   : > { %v1996_v36 = vpop.permute.xlu1 %1995  ;;  %v1994_v41 = vpop.permute.xlu0 %1993 }
 0x3e7   : > { %2090 = vst.msk [vmem:[#allocation2 + $0x10] sm:$0xff] %vm2087_vm6, %v1996_v36  ;;  %v2016_v40 = vpop.permute.xlu2 %2015 }
 0x3e8   : > { %2089 = vst.msk [vmem:[#allocation2 + $0x8] sm:$0xff] %vm2087_vm6, %v1994_v41  ;;  %v6260_v41 = vld [vmem:[%s4303_s30 + $0x141] sm:$0xff] }
 0x3e9   : > { %2100 = vst.msk [vmem:[#allocation2 + $0x60] sm:$0xff] %vm2087_vm6, %v2016_v40 }
 0x3ec   : > { %2150 = vrot.lane.b32.xlu1 %v5924_v39, %s4218_s9  ;;  %2148 = vrot.lane.b32.xlu0 %v5913_v55, %s4218_s9 }
 0x3ed   : > { %2152 = vrot.lane.b32.xlu2 %v5934_v0, %s4218_s9  ;;  %v6126_v0 = vld [vmem:[%s4303_s30 + $0x31] sm:$0xff] }
 0x3ee   : > { %v2002_v44 = vpop.permute.xlu1 %2001  ;;  %v2000_v51 = vpop.permute.xlu0 %1999 }
 0x3ef   : > { %2093 = vst.msk [vmem:[#allocation2 + $0x28] sm:$0xff] %vm2087_vm6, %v2002_v44  ;;  %v2022_v50 = vpop.permute.xlu2 %2021 }
 0x3f0   : > { %2092 = vst.msk [vmem:[#allocation2 + $0x20] sm:$0xff] %vm2087_vm6, %v2000_v51  ;;  %v6267_v51 = vld [vmem:[%s4303_s30 + $0x159] sm:$0xff] }
 0x3f1   : > { %2103 = vst.msk [vmem:[#allocation2 + $0x78] sm:$0xff] %vm2087_vm6, %v2022_v50  ;;  %v6270_v50 = vld [vmem:[%s4303_s30 + $0x151] sm:$0xff] }
 0x3f4   : > { %2156 = vrot.lane.b32.xlu1 %v5942_v37, %s4218_s9  ;;  %2154 = vrot.lane.b32.xlu0 %v5931_v61, %s4218_s9  ;;  %v6123_v61 = vld [vmem:[%s4303_s30 + $0x39] sm:$0xff]  ;;  %v6134_v37 = vld [vmem:[%s4303_s30 + $0x49] sm:$0xff] }
 0x3f5   : > { %2158 = vrot.lane.b32.xlu2 %v5952_v4, %s4218_s9  ;;  %v6144_v4 = vld [vmem:[%s4303_s30 + $0x51] sm:$0xff] }
 0x3f6   : > { %v2008_v56 = vpop.permute.xlu1 %2007  ;;  %v2006_v63 = vpop.permute.xlu0 %2005 }
 0x3f7   : > { %2096 = vst.msk [vmem:[#allocation2 + $0x40] sm:$0xff] %vm2087_vm6, %v2008_v56  ;;  %v2028_v62 = vpop.permute.xlu2 %2027 }
 0x3f8   : > { %2095 = vst.msk [vmem:[#allocation2 + $0x38] sm:$0xff] %vm2087_vm6, %v2006_v63  ;;  %v6278_v63 = vld [vmem:[%s4303_s30 + $0x169] sm:$0xff] }
 0x3f9   : > { %2106 = vst.msk [vmem:[#allocation2 + $0x90] sm:$0xff] %vm2087_vm6, %v2028_v62 }
 0x3fc   : > { %2162 = vrot.lane.b32.xlu1 %v5960_v6, %s4218_s9  ;;  %2160 = vrot.lane.b32.xlu0 %v5949_v2, %s4218_s9  ;;  %v6141_v2 = vld [vmem:[%s4303_s30 + $0x61] sm:$0xff]  ;;  %v6152_v6 = vld [vmem:[%s4303_s30 + $0x69] sm:$0xff] }
 0x3fd   : > { %2164 = vrot.lane.b32.xlu2 %v5970_v7, %s4218_s9  ;;  %v6162_v7 = vld [vmem:[%s4303_s30 + $0x79] sm:$0xff] }
 0x3fe   : > { %v2014_v46 = vpop.permute.xlu1 %2013  ;;  %v2012_v60 = vpop.permute.xlu0 %2011 }
 0x3ff   : > { %2099 = vst.msk [vmem:[#allocation2 + $0x58] sm:$0xff] %vm2087_vm6, %v2014_v46  ;;  %v2034_v58 = vpop.permute.xlu2 %2033 }
 0x400   : > { %2098 = vst.msk [vmem:[#allocation2 + $0x50] sm:$0xff] %vm2087_vm6, %v2012_v60  ;;  %v6285_v60 = vld [vmem:[%s4303_s30 + $0x181] sm:$0xff] }
 0x401   : > { %2109 = vst.msk [vmem:[#allocation2 + $0xa8] sm:$0xff] %vm2087_vm6, %v2034_v58  ;;  %v6288_v58 = vld [vmem:[%s4303_s30 + $0x171] sm:$0xff] }
 0x404   : > { %2168 = vrot.lane.b32.xlu1 %v5978_v11, %s4218_s9  ;;  %2166 = vrot.lane.b32.xlu0 %v5967_v8, %s4218_s9  ;;  %v6159_v8 = vld [vmem:[%s4303_s30 + $0x81] sm:$0xff]  ;;  %v6170_v11 = vld [vmem:[%s4303_s30 + $0x91] sm:$0xff] }
 0x405   : > { %2170 = vrot.lane.b32.xlu2 %v5988_v12, %s4218_s9  ;;  %v6180_v12 = vld [vmem:[%s4303_s30 + $0x99] sm:$0xff] }
 0x406   : > { %v2020_v49 = vpop.permute.xlu1 %2019  ;;  %v2018_v28 = vpop.permute.xlu0 %2017 }
 0x407   : > { %2102 = vst.msk [vmem:[#allocation2 + $0x70] sm:$0xff] %vm2087_vm6, %v2020_v49  ;;  %v2040_v55 = vpop.permute.xlu2 %2039 }
 0x408   : > { %2101 = vst.msk [vmem:[#allocation2 + $0x68] sm:$0xff] %vm2087_vm6, %v2018_v28  ;;  %v6296_v28 = vld [vmem:[%s4303_s30 + $0x189] sm:$0xff] }
 0x409   : > { %2112 = vst.msk [vmem:[#allocation2 + $0xc0] sm:$0xff] %vm2087_vm6, %v2040_v55 }
 0x40c   : > { %2174 = vrot.lane.b32.xlu1 %v5996_v16, %s4218_s9  ;;  %2172 = vrot.lane.b32.xlu0 %v5985_v13, %s4218_s9  ;;  %v6177_v13 = vld [vmem:[%s4303_s30 + $0xa9] sm:$0xff]  ;;  %v6188_v16 = vld [vmem:[%s4303_s30 + $0xb1] sm:$0xff] }
 0x40d   : > { %2176 = vrot.lane.b32.xlu2 %v6006_v18, %s4218_s9  ;;  %v6198_v18 = vld [vmem:[%s4303_s30 + $0xc1] sm:$0xff] }
 0x40e   : > { %v2026_v32 = vpop.permute.xlu1 %2025  ;;  %v2024_v43 = vpop.permute.xlu0 %2023 }
 0x40f   : > { %2105 = vst.msk [vmem:[#allocation2 + $0x88] sm:$0xff] %vm2087_vm6, %v2026_v32  ;;  %v2046_v39 = vpop.permute.xlu2 %2045 }
 0x410   : > { %2104 = vst.msk [vmem:[#allocation2 + $0x80] sm:$0xff] %vm2087_vm6, %v2024_v43  ;;  %v6303_v43 = vld [vmem:[%s4303_s30 + $0x1a1] sm:$0xff] }
 0x411   : > { %2115 = vst.msk [vmem:[#allocation2 + $0xd8] sm:$0xff] %vm2087_vm6, %v2046_v39  ;;  %v6306_v39 = vld [vmem:[%s4303_s30 + $0x199] sm:$0xff] }
 0x414   : > { %2180 = vrot.lane.b32.xlu1 %v6014_v21, %s4218_s9  ;;  %2178 = vrot.lane.b32.xlu0 %v6003_v19, %s4218_s9  ;;  %v6195_v19 = vld [vmem:[%s4303_s30 + $0xc9] sm:$0xff]  ;;  %v6206_v21 = vld [vmem:[%s4303_s30 + $0xd9] sm:$0xff] }
 0x415   : > { %2182 = vrot.lane.b32.xlu2 %v6021_v45, %s4218_s9  ;;  %v6213_v45 = vld [vmem:[%s4303_s30 + $0xf1] sm:$0xff]  ;;  %s3692_s9 = scalar_lea.hbm %s6923_s3, %s4047_s4 }
 0x416   : > { %v2032_v47 = vpop.permute.xlu1 %2031  ;;  %v2030_v59 = vpop.permute.xlu0 %2029  ;;  %s3695_s19 = sshll.u32 %s3692_s9, 4  ;;  %s3696_s19 = int_to_ptr.hbm [resolvable:$true] %s3695_s19 }
 0x417   : > { %2108 = vst.msk [vmem:[#allocation2 + $0xa0] sm:$0xff] %vm2087_vm6, %v2032_v47  ;;  %v2052_v10 = vpop.permute.xlu2 %2051  ;;  %s4147_s23 = sshra.s32 %s3696_s19, 4  ;;  %s4148_s23 = int_to_ptr.hbm [resolvable:$true] %s4147_s23 }
 0x418   : > { %2107 = vst.msk [vmem:[#allocation2 + $0x98] sm:$0xff] %vm2087_vm6, %v2030_v59  ;;  %s4149_s26 = scalar_lea.hbm %s4148_s23, 32  ;;  %p4154_p1 = scmp.lt.s32.totalorder %s4148_s23, %s6923_s3 }
 0x419   : > { %2118 = vst.msk [vmem:[#allocation2 + $0xf0] sm:$0xff] %vm2087_vm6, %v2052_v10  ;;  %p4150_p12 = scmp.ne.s32.totalorder %s4148_s23, %s4149_s26  ;;  %p4155_p2 = scmp.lt.s32.totalorder %s4153_s28, %s4149_s26 }
 0x41b   : > { %p4151_p13 = pnand %p4150_p12, %p4283_p4  ;;  %p4156_p3 = por %p4155_p2, %p4154_p1 }
 0x41c   : > { %2314 = vrot.lane.b32.xlu1 %v6123_v61, %s4220_s11  ;;  %2312 = vrot.lane.b32.xlu0 %v6126_v0, %s4220_s11 }
 0x41d   : > { %2316 = vrot.lane.b32.xlu2 %v6134_v37, %s4220_s11  ;;  %p4152_p0 = pneg %p4151_p13 }
 0x41e   : > { %v2038_v3 = vpop.permute.xlu1 %2037  ;;  %v2036_v52 = vpop.permute.xlu0 %2035 }
 0x41f   : > { %2111 = vst.msk [vmem:[#allocation2 + $0xb8] sm:$0xff] %vm2087_vm6, %v2038_v3  ;;  %v2123_v31 = vpop.permute.xlu2 %2122  ;;  %p4157_p5 = pnand %p4156_p3, %p4152_p0 }
 0x420   : > { %2110 = vst.msk [vmem:[#allocation2 + $0xb0] sm:$0xff] %vm2087_vm6, %v2036_v52 }
 0x421   : > { %2217 = vst.msk [vmem:[#allocation3 + $0x8] sm:$0xff] %vm2087_vm6, %v2123_v31 }
 0x424   : > { %2320 = vrot.lane.b32.xlu1 %v6141_v2, %s4220_s11  ;;  %2318 = vrot.lane.b32.xlu0 %v6144_v4, %s4220_s11 }
 0x425   : > { %2322 = vrot.lane.b32.xlu2 %v6152_v6, %s4220_s11 }
 0x426   : > { %v2044_v14 = vpop.permute.xlu1 %2043  ;;  %v2042_v5 = vpop.permute.xlu0 %2041 }
 0x427   : > { %2114 = vst.msk [vmem:[#allocation2 + $0xd0] sm:$0xff] %vm2087_vm6, %v2044_v14  ;;  %v2129_v17 = vpop.permute.xlu2 %2128 }
 0x428   : > { %2113 = vst.msk [vmem:[#allocation2 + $0xc8] sm:$0xff] %vm2087_vm6, %v2042_v5 }
 0x429   : > { %2220 = vst.msk [vmem:[#allocation3 + $0x20] sm:$0xff] %vm2087_vm6, %v2129_v17 }
 0x42c   : > { %2326 = vrot.lane.b32.xlu1 %v6159_v8, %s4220_s11  ;;  %2324 = vrot.lane.b32.xlu0 %v6162_v7, %s4220_s11 }
 0x42d   : > { %2328 = vrot.lane.b32.xlu2 %v6170_v11, %s4220_s11 }
 0x42e   : > { %v2050_v9 = vpop.permute.xlu1 %2049  ;;  %v2048_v20 = vpop.permute.xlu0 %2047 }
 0x42f   : > { %2117 = vst.msk [vmem:[#allocation2 + $0xe8] sm:$0xff] %vm2087_vm6, %v2050_v9  ;;  %v2135_v23 = vpop.permute.xlu2 %2134 }
 0x430   : > { %2116 = vst.msk [vmem:[#allocation2 + $0xe0] sm:$0xff] %vm2087_vm6, %v2048_v20 }
 0x431   : > { %2223 = vst.msk [vmem:[#allocation3 + $0x38] sm:$0xff] %vm2087_vm6, %v2135_v23 }
 0x434   : > { %2332 = vrot.lane.b32.xlu1 %v6177_v13, %s4220_s11  ;;  %2330 = vrot.lane.b32.xlu0 %v6180_v12, %s4220_s11 }
 0x435   : > { %2334 = vrot.lane.b32.xlu2 %v6188_v16, %s4220_s11 }
 0x436   : > { %v2121_v15 = vpop.permute.xlu1 %2120  ;;  %v2054_v26 = vpop.permute.xlu0 %2053 }
 0x437   : > { %2216 = vst.msk [vmem:[#allocation3] sm:$0xff] %vm2087_vm6, %v2121_v15  ;;  %v2141_v29 = vpop.permute.xlu2 %2140 }
 0x438   : > { %2119 = vst.msk [vmem:[#allocation2 + $0xf8] sm:$0xff] %vm2087_vm6, %v2054_v26 }
 0x439   : > { %2226 = vst.msk [vmem:[#allocation3 + $0x50] sm:$0xff] %vm2087_vm6, %v2141_v29 }
 0x43c   : > { %2338 = vrot.lane.b32.xlu1 %v6195_v19, %s4220_s11  ;;  %2336 = vrot.lane.b32.xlu0 %v6198_v18, %s4220_s11 }
 0x43d   : > { %2340 = vrot.lane.b32.xlu2 %v6206_v21, %s4220_s11 }
 0x43e   : > { %v2127_v22 = vpop.permute.xlu1 %2126  ;;  %v2125_v30 = vpop.permute.xlu0 %2124 }
 0x43f   : > { %2219 = vst.msk [vmem:[#allocation3 + $0x18] sm:$0xff] %vm2087_vm6, %v2127_v22  ;;  %v2147_v42 = vpop.permute.xlu2 %2146 }
 0x440   : > { %2218 = vst.msk [vmem:[#allocation3 + $0x10] sm:$0xff] %vm2087_vm6, %v2125_v30 }
 0x441   : > { %2229 = vst.msk [vmem:[#allocation3 + $0x68] sm:$0xff] %vm2087_vm6, %v2147_v42 }
 0x444   : > { %2344 = vrot.lane.b32.xlu1 %v6213_v45, %s4220_s11  ;;  %2342 = vrot.lane.b32.xlu0 %v6216_v1, %s4220_s11 }
 0x445   : > { %2346 = vrot.lane.b32.xlu2 %v6224_v48, %s4220_s11 }
 0x446   : > { %v2133_v54 = vpop.permute.xlu1 %2132  ;;  %v2131_v53 = vpop.permute.xlu0 %2130 }
 0x447   : > { %2222 = vst.msk [vmem:[#allocation3 + $0x30] sm:$0xff] %vm2087_vm6, %v2133_v54  ;;  %v2153_v57 = vpop.permute.xlu2 %2152 }
 0x448   : > { %2221 = vst.msk [vmem:[#allocation3 + $0x28] sm:$0xff] %vm2087_vm6, %v2131_v53 }
 0x449   : > { %2232 = vst.msk [vmem:[#allocation3 + $0x80] sm:$0xff] %vm2087_vm6, %v2153_v57 }
 0x44c   : > { %2350 = vrot.lane.b32.xlu1 %v6231_v24, %s4220_s11  ;;  %2348 = vrot.lane.b32.xlu0 %v6234_v27, %s4220_s11 }
 0x44d   : > { %2352 = vrot.lane.b32.xlu2 %v6242_v38, %s4220_s11 }
 0x44e   : > { %v2139_v34 = vpop.permute.xlu1 %2138  ;;  %v2137_v25 = vpop.permute.xlu0 %2136 }
 0x44f   : > { %2225 = vst.msk [vmem:[#allocation3 + $0x48] sm:$0xff] %vm2087_vm6, %v2139_v34  ;;  %v2159_v36 = vpop.permute.xlu2 %2158 }
 0x450   : > { %2224 = vst.msk [vmem:[#allocation3 + $0x40] sm:$0xff] %vm2087_vm6, %v2137_v25  ;;  %v6427_v25 = vld [vmem:[%s4303_s30 + $0x7a] sm:$0xff] }
 0x451   : > { %2235 = vst.msk [vmem:[#allocation3 + $0x98] sm:$0xff] %vm2087_vm6, %v2159_v36 }
 0x454   : > { %2356 = vrot.lane.b32.xlu1 %v6249_v35, %s4220_s11  ;;  %2354 = vrot.lane.b32.xlu0 %v6252_v33, %s4220_s11 }
 0x455   : > { %2358 = vrot.lane.b32.xlu2 %v6260_v41, %s4220_s11 }
 0x456   : > { %v2145_v40 = vpop.permute.xlu1 %2144  ;;  %v2143_v44 = vpop.permute.xlu0 %2142 }
 0x457   : > { %2228 = vst.msk [vmem:[#allocation3 + $0x60] sm:$0xff] %vm2087_vm6, %v2145_v40  ;;  %v2165_v56 = vpop.permute.xlu2 %2164  ;;  %v3950_v40 = vld [vmem:[%s4303_s30 + $0x62] sm:$0xff] }
 0x458   : > { %2227 = vst.msk [vmem:[#allocation3 + $0x58] sm:$0xff] %vm2087_vm6, %v2143_v44  ;;  %v6441_v44 = vld [vmem:[%s4303_s30 + $0x9a] sm:$0xff] }
 0x459   : > { %2238 = vst.msk [vmem:[#allocation3 + $0xb0] sm:$0xff] %vm2087_vm6, %v2165_v56 }
 0x45c   : > { %2362 = vrot.lane.b32.xlu1 %v6267_v51, %s4220_s11  ;;  %2360 = vrot.lane.b32.xlu0 %v6270_v50, %s4220_s11 }
 0x45d   : > { %2364 = vrot.lane.b32.xlu2 %v6278_v63, %s4220_s11 }
 0x45e   : > { %v2151_v62 = vpop.permute.xlu1 %2150  ;;  %v2149_v46 = vpop.permute.xlu0 %2148 }
 0x45f   : > { %2231 = vst.msk [vmem:[#allocation3 + $0x78] sm:$0xff] %vm2087_vm6, %v2151_v62  ;;  %v2171_v49 = vpop.permute.xlu2 %2170  ;;  %v6455_v62 = vld [vmem:[%s4303_s30 + $0xaa] sm:$0xff] }
 0x460   : > { %2230 = vst.msk [vmem:[#allocation3 + $0x70] sm:$0xff] %vm2087_vm6, %v2149_v46 }
 0x461   : > { %2241 = vst.msk [vmem:[#allocation3 + $0xc8] sm:$0xff] %vm2087_vm6, %v2171_v49  ;;  %v6464_v49 = vld [vmem:[%s4303_s30 + $0xb2] sm:$0xff] }
 0x464   : > { %2368 = vrot.lane.b32.xlu1 %v6285_v60, %s4220_s11  ;;  %2366 = vrot.lane.b32.xlu0 %v6288_v58, %s4220_s11 }
 0x465   : > { %2370 = vrot.lane.b32.xlu2 %v6296_v28, %s4220_s11 }
 0x466   : > { %v2157_v55 = vpop.permute.xlu1 %2156  ;;  %v2155_v32 = vpop.permute.xlu0 %2154 }
 0x467   : > { %2234 = vst.msk [vmem:[#allocation3 + $0x90] sm:$0xff] %vm2087_vm6, %v2157_v55  ;;  %v2177_v47 = vpop.permute.xlu2 %2176 }
 0x468   : > { %2233 = vst.msk [vmem:[#allocation3 + $0x88] sm:$0xff] %vm2087_vm6, %v2155_v32 }
 0x469   : > { %2244 = vst.msk [vmem:[#allocation3 + $0xe0] sm:$0xff] %vm2087_vm6, %v2177_v47 }
 0x46c   : > { %2374 = vrot.lane.b32.xlu1 %v6303_v43, %s4220_s11  ;;  %2372 = vrot.lane.b32.xlu0 %v6306_v39, %s4220_s11 }
 0x46d   : > { %2441 = vrot.lane.b32.xlu2 %v6126_v0, %s4219_s10 }
 0x46e   : > { %v2163_v59 = vpop.permute.xlu1 %2162  ;;  %v2161_v10 = vpop.permute.xlu0 %2160 }
 0x46f   : > { %2237 = vst.msk [vmem:[#allocation3 + $0xa8] sm:$0xff] %vm2087_vm6, %v2163_v59  ;;  %v2183_v3 = vpop.permute.xlu2 %2182 }
 0x470   : > { %2236 = vst.msk [vmem:[#allocation3 + $0xa0] sm:$0xff] %vm2087_vm6, %v2161_v10 }
 0x471   : > { %2247 = vst.msk [vmem:[#allocation3 + $0xf8] sm:$0xff] %vm2087_vm6, %v2183_v3 }
 0x474   : > { %2445 = vrot.lane.b32.xlu1 %v6134_v37, %s4219_s10  ;;  %2443 = vrot.lane.b32.xlu0 %v6123_v61, %s4219_s10 }
 0x475   : > { %2447 = vrot.lane.b32.xlu2 %v6144_v4, %s4219_s10 }
 0x476   : > { %v2169_v52 = vpop.permute.xlu1 %2168  ;;  %v2167_v31 = vpop.permute.xlu0 %2166 }
 0x477   : > { %2240 = vst.msk [vmem:[#allocation3 + $0xc0] sm:$0xff] %vm2087_vm6, %v2169_v52  ;;  %v2317_v0 = vpop.permute.xlu2 %2316 }
 0x478   : > { %2239 = vst.msk [vmem:[#allocation3 + $0xb8] sm:$0xff] %vm2087_vm6, %v2167_v31 }
 0x479   : > { %2411 = vst.msk [vmem:[#allocation2 + $0x10] sm:$0xff] %vm2408_vm7, %v2317_v0 }
 0x47c   : > { %2451 = vrot.lane.b32.xlu1 %v6152_v6, %s4219_s10  ;;  %2449 = vrot.lane.b32.xlu0 %v6141_v2, %s4219_s10 }
 0x47d   : > { %2453 = vrot.lane.b32.xlu2 %v6162_v7, %s4219_s10 }
 0x47e   : > { %v2175_v61 = vpop.permute.xlu1 %2174  ;;  %v2173_v37 = vpop.permute.xlu0 %2172 }
 0x47f   : > { %2243 = vst.msk [vmem:[#allocation3 + $0xd8] sm:$0xff] %vm2087_vm6, %v2175_v61  ;;  %v2323_v4 = vpop.permute.xlu2 %2322  ;;  %v3962_v61 = vld [vmem:[%s4303_s30 + $0xf2] sm:$0xff] }
 0x480   : > { %2242 = vst.msk [vmem:[#allocation3 + $0xd0] sm:$0xff] %vm2087_vm6, %v2173_v37 }
 0x481   : > { %2414 = vst.msk [vmem:[#allocation2 + $0x28] sm:$0xff] %vm2408_vm7, %v2323_v4 }
 0x484   : > { %2457 = vrot.lane.b32.xlu1 %v6170_v11, %s4219_s10  ;;  %2455 = vrot.lane.b32.xlu0 %v6159_v8, %s4219_s10 }
 0x485   : > { %2459 = vrot.lane.b32.xlu2 %v6180_v12, %s4219_s10 }
 0x486   : > { %v2181_v6 = vpop.permute.xlu1 %2180  ;;  %v2179_v2 = vpop.permute.xlu0 %2178 }
 0x487   : > { %2246 = vst.msk [vmem:[#allocation3 + $0xf0] sm:$0xff] %vm2087_vm6, %v2181_v6  ;;  %v2329_v14 = vpop.permute.xlu2 %2328 }
 0x488   : > { %2245 = vst.msk [vmem:[#allocation3 + $0xe8] sm:$0xff] %vm2087_vm6, %v2179_v2  ;;  %v2962_v2 = vld [vmem:[%s6921_s1 + $0x40] sm:$0xff] }
 0x489   : > { %2417 = vst.msk [vmem:[#allocation2 + $0x40] sm:$0xff] %vm2408_vm7, %v2329_v14  ;;  %v3963_v14 = vld [vmem:[%s4303_s30 + $0xfa] sm:$0xff]  ;;  %3067 = vmatpush.msra.mxu0 %v2962_v2  ;;  %3276 = vmatpush.msra.mxu1 %v2962_v2 }
 0x48a   : > { %4057 = vmatpush.msra.mxu3 %v2962_v2  ;;  %4048 = vmatpush.msra.mxu2 %v2962_v2 }
 0x48c   : > { %2463 = vrot.lane.b32.xlu1 %v6188_v16, %s4219_s10  ;;  %2461 = vrot.lane.b32.xlu0 %v6177_v13, %s4219_s10 }
 0x48d   : > { %2465 = vrot.lane.b32.xlu2 %v6198_v18, %s4219_s10 }
 0x48e   : > { %v2315_v5 = vpop.permute.xlu1 %2314  ;;  %v2313_v8 = vpop.permute.xlu0 %2312 }
 0x48f   : > { %2410 = vst.msk [vmem:[#allocation2 + $0x8] sm:$0xff] %vm2408_vm7, %v2315_v5  ;;  %v2335_v7 = vpop.permute.xlu2 %2334  ;;  %v6505_v5 = vld [vmem:[%s4303_s30 + $0x122] sm:$0xff] }
 0x490   : > { %2409 = vst.msk [vmem:[#allocation2] sm:$0xff] %vm2408_vm7, %v2313_v8 }
 0x491   : > { %2420 = vst.msk [vmem:[#allocation2 + $0x58] sm:$0xff] %vm2408_vm7, %v2335_v7 }
 0x494   : > { %2469 = vrot.lane.b32.xlu1 %v6206_v21, %s4219_s10  ;;  %2467 = vrot.lane.b32.xlu0 %v6195_v19, %s4219_s10 }
 0x495   : > { %2471 = vrot.lane.b32.xlu2 %v6216_v1, %s4219_s10  ;;  %v3946_v1 = vld [vmem:[%s4303_s30 + $0x32] sm:$0xff] }
 0x496   : > { %v2321_v17 = vpop.permute.xlu1 %2320  ;;  %v2319_v11 = vpop.permute.xlu0 %2318 }
 0x497   : > { %2413 = vst.msk [vmem:[#allocation2 + $0x20] sm:$0xff] %vm2408_vm7, %v2321_v17  ;;  %v2341_v9 = vpop.permute.xlu2 %2340  ;;  %v2961_v17 = vld [vmem:[%s6921_s1 + $0x38] sm:$0xff] }
 0x498   : > { %2412 = vst.msk [vmem:[#allocation2 + $0x18] sm:$0xff] %vm2408_vm7, %v2319_v11  ;;  %v2960_v11 = vld [vmem:[%s6921_s1 + $0x30] sm:$0xff]  ;;  %3068 = vmatpush.msra.mxu0 %v2961_v17  ;;  %3277 = vmatpush.msra.mxu1 %v2961_v17 }
 0x499   : > { %2423 = vst.msk [vmem:[#allocation2 + $0x70] sm:$0xff] %vm2408_vm7, %v2341_v9  ;;  %4058 = vmatpush.msra.mxu3 %v2961_v17  ;;  %4049 = vmatpush.msra.mxu2 %v2961_v17 }
 0x49a   : > { %3069 = vmatpush.msra.mxu0 %v2960_v11  ;;  %3278 = vmatpush.msra.mxu1 %v2960_v11 }
 0x49b   : > { %4059 = vmatpush.msra.mxu3 %v2960_v11  ;;  %4050 = vmatpush.msra.mxu2 %v2960_v11 }
 0x49c   : > { %2475 = vrot.lane.b32.xlu1 %v6224_v48, %s4219_s10  ;;  %2473 = vrot.lane.b32.xlu0 %v6213_v45, %s4219_s10  ;;  %v3947_v48 = vld [vmem:[%s4303_s30 + $0x3a] sm:$0xff] }
 0x49d   : > { %2477 = vrot.lane.b32.xlu2 %v6234_v27, %s4219_s10  ;;  %v3948_v27 = vld [vmem:[%s4303_s30 + $0x4a] sm:$0xff] }
 0x49e   : > { %v2327_v20 = vpop.permute.xlu1 %2326  ;;  %v2325_v13 = vpop.permute.xlu0 %2324 }
 0x49f   : > { %2416 = vst.msk [vmem:[#allocation2 + $0x38] sm:$0xff] %vm2408_vm7, %v2327_v20  ;;  %v2347_v12 = vpop.permute.xlu2 %2346  ;;  %v2959_v20 = vld [vmem:[%s6921_s1 + $0x28] sm:$0xff] }
 0x4a0   : > { %2415 = vst.msk [vmem:[#allocation2 + $0x30] sm:$0xff] %vm2408_vm7, %v2325_v13  ;;  %v2958_v13 = vld [vmem:[%s6921_s1 + $0x20] sm:$0xff]  ;;  %3070 = vmatpush.msra.mxu0 %v2959_v20  ;;  %3279 = vmatpush.msra.mxu1 %v2959_v20 }
 0x4a1   : > { %2426 = vst.msk [vmem:[#allocation2 + $0x88] sm:$0xff] %vm2408_vm7, %v2347_v12  ;;  %v3964_v12 = vld [vmem:[%s4303_s30 + $0x10a] sm:$0xff]  ;;  %4060 = vmatpush.msra.mxu3 %v2959_v20  ;;  %4051 = vmatpush.msra.mxu2 %v2959_v20 }
 0x4a2   : > { %3071 = vmatpush.msra.mxu0 %v2958_v13  ;;  %3280 = vmatpush.msra.mxu1 %v2958_v13 }
 0x4a3   : > { %4061 = vmatpush.msra.mxu3 %v2958_v13  ;;  %4052 = vmatpush.msra.mxu2 %v2958_v13 }
 0x4a4   : > { %2481 = vrot.lane.b32.xlu1 %v6242_v38, %s4219_s10  ;;  %2479 = vrot.lane.b32.xlu0 %v6231_v24, %s4219_s10  ;;  %v6417_v24 = vld [vmem:[%s4303_s30 + $0x52] sm:$0xff] }
 0x4a5   : > { %2483 = vrot.lane.b32.xlu2 %v6252_v33, %s4219_s10 }
 0x4a6   : > { %v2333_v23 = vpop.permute.xlu1 %2332  ;;  %v2331_v16 = vpop.permute.xlu0 %2330 }
 0x4a7   : > { %2419 = vst.msk [vmem:[#allocation2 + $0x50] sm:$0xff] %vm2408_vm7, %v2333_v23  ;;  %v2353_v15 = vpop.permute.xlu2 %2352 }
 0x4a8   : > { %2418 = vst.msk [vmem:[#allocation2 + $0x48] sm:$0xff] %vm2408_vm7, %v2331_v16 }
 0x4a9   : > { %2429 = vst.msk [vmem:[#allocation2 + $0xa0] sm:$0xff] %vm2408_vm7, %v2353_v15  ;;  %v2957_v15 = vld [vmem:[%s6921_s1 + $0x18] sm:$0xff] }
 0x4aa   : > { %3072 = vmatpush.msra.mxu0 %v2957_v15  ;;  %3281 = vmatpush.msra.mxu1 %v2957_v15 }
 0x4ab   : > { %4062 = vmatpush.msra.mxu3 %v2957_v15  ;;  %4053 = vmatpush.msra.mxu2 %v2957_v15 }
 0x4ac   : > { %2487 = vrot.lane.b32.xlu1 %v6260_v41, %s4219_s10  ;;  %2485 = vrot.lane.b32.xlu0 %v6249_v35, %s4219_s10  ;;  %v6430_v35 = vld [vmem:[%s4303_s30 + $0x6a] sm:$0xff] }
 0x4ad   : > { %2489 = vrot.lane.b32.xlu2 %v6270_v50, %s4219_s10 }
 0x4ae   : > { %v2339_v26 = vpop.permute.xlu1 %2338  ;;  %v2337_v19 = vpop.permute.xlu0 %2336 }
 0x4af   : > { %2422 = vst.msk [vmem:[#allocation2 + $0x68] sm:$0xff] %vm2408_vm7, %v2339_v26  ;;  %v2359_v18 = vpop.permute.xlu2 %2358  ;;  %v2956_v26 = vld [vmem:[%s6921_s1 + $0x10] sm:$0xff] }
 0x4b0   : > { %2421 = vst.msk [vmem:[#allocation2 + $0x60] sm:$0xff] %vm2408_vm7, %v2337_v19  ;;  %3073 = vmatpush.msra.mxu0 %v2956_v26  ;;  %3282 = vmatpush.msra.mxu1 %v2956_v26 }
 0x4b1   : > { %2432 = vst.msk [vmem:[#allocation2 + $0xb8] sm:$0xff] %vm2408_vm7, %v2359_v18  ;;  %v2955_v18 = vld [vmem:[%s6921_s1 + $0x8] sm:$0xff]  ;;  %4063 = vmatpush.msra.mxu3 %v2956_v26  ;;  %4054 = vmatpush.msra.mxu2 %v2956_v26 }
 0x4b2   : > { %3074 = vmatpush.msra.mxu0 %v2955_v18  ;;  %3283 = vmatpush.msra.mxu1 %v2955_v18 }
 0x4b3   : > { %4064 = vmatpush.msra.mxu3 %v2955_v18  ;;  %4055 = vmatpush.msra.mxu2 %v2955_v18 }
 0x4b4   : > { %2493 = vrot.lane.b32.xlu1 %v6278_v63, %s4219_s10  ;;  %2491 = vrot.lane.b32.xlu0 %v6267_v51, %s4219_s10  ;;  %v6444_v51 = vld [vmem:[%s4303_s30 + $0x92] sm:$0xff] }
 0x4b5   : > { %2495 = vrot.lane.b32.xlu2 %v6288_v58, %s4219_s10 }
 0x4b6   : > { %v2345_v29 = vpop.permute.xlu1 %2344  ;;  %v2343_v21 = vpop.permute.xlu0 %2342 }
 0x4b7   : > { %2425 = vst.msk [vmem:[#allocation2 + $0x80] sm:$0xff] %vm2408_vm7, %v2345_v29  ;;  %v2365_v22 = vpop.permute.xlu2 %2364  ;;  %v2954_v29 = vld [vmem:[%s6921_s1] sm:$0xff] }
 0x4b8   : > { %2424 = vst.msk [vmem:[#allocation2 + $0x78] sm:$0xff] %vm2408_vm7, %v2343_v21  ;;  %v3965_v21 = vld [vmem:[%s4303_s30 + $0x112] sm:$0xff]  ;;  %3075 = vmatpush.msra.mxu0 %v2954_v29  ;;  %3284 = vmatpush.msra.mxu1 %v2954_v29 }
 0x4b9   : > { %2435 = vst.msk [vmem:[#allocation2 + $0xd0] sm:$0xff] %vm2408_vm7, %v2365_v22  ;;  %4065 = vmatpush.msra.mxu3 %v2954_v29  ;;  %4056 = vmatpush.msra.mxu2 %v2954_v29 }
 0x4bc   : > { %2499 = vrot.lane.b32.xlu1 %v6296_v28, %s4219_s10  ;;  %2497 = vrot.lane.b32.xlu0 %v6285_v60, %s4219_s10 }
 0x4bd   : > { %2501 = vrot.lane.b32.xlu2 %v6306_v39, %s4219_s10  ;;  %v6476_v39 = vld [vmem:[%s4303_s30 + $0xc2] sm:$0xff] }
 0x4be   : > { %v2351_v30 = vpop.permute.xlu1 %2350  ;;  %v2349_v45 = vpop.permute.xlu0 %2348 }
 0x4bf   : > { %2428 = vst.msk [vmem:[#allocation2 + $0x98] sm:$0xff] %vm2408_vm7, %v2351_v30  ;;  %v2371_v42 = vpop.permute.xlu2 %2370 }
 0x4c0   : > { %2427 = vst.msk [vmem:[#allocation2 + $0x90] sm:$0xff] %vm2408_vm7, %v2349_v45 }
 0x4c1   : > { %2438 = vst.msk [vmem:[#allocation2 + $0xe8] sm:$0xff] %vm2408_vm7, %v2371_v42 }
 0x4c4   : > { %2633 = vrot.lane.b32.xlu1 %v3946_v1, %s4221_s18  ;;  %2503 = vrot.lane.b32.xlu0 %v6303_v43, %s4219_s10  ;;  %v6473_v43 = vld [vmem:[%s4303_s30 + $0x82] sm:$0xff] }
 0x4c5   : > { %2635 = vrot.lane.b32.xlu2 %v3947_v48, %s4221_s18 }
 0x4c6   : > { %v2357_v54 = vpop.permute.xlu1 %2356  ;;  %v2355_v53 = vpop.permute.xlu0 %2354 }
 0x4c7   : > { %2431 = vst.msk [vmem:[#allocation2 + $0xb0] sm:$0xff] %vm2408_vm7, %v2357_v54  ;;  %v2442_v57 = vpop.permute.xlu2 %2441  ;;  %v3967_v54 = vld [vmem:[%s4303_s30 + $0x12a] sm:$0xff] }
 0x4c8   : > { %2430 = vst.msk [vmem:[#allocation2 + $0xa8] sm:$0xff] %vm2408_vm7, %v2355_v53 }
 0x4c9   : > { %2537 = vst.msk [vmem:[#allocation3] sm:$0xff] %vm2408_vm7, %v2442_v57 }
 0x4cc   : > { %2639 = vrot.lane.b32.xlu1 %v6417_v24, %s4221_s18  ;;  %2637 = vrot.lane.b32.xlu0 %v3948_v27, %s4221_s18 }
 0x4cd   : > { %2641 = vrot.lane.b32.xlu2 %v3950_v40, %s4221_s18 }
 0x4ce   : > { %v2363_v38 = vpop.permute.xlu1 %2362  ;;  %v2361_v34 = vpop.permute.xlu0 %2360 }
 0x4cf   : > { %2434 = vst.msk [vmem:[#allocation2 + $0xc8] sm:$0xff] %vm2408_vm7, %v2363_v38  ;;  %v2448_v33 = vpop.permute.xlu2 %2447 }
 0x4d0   : > { %2433 = vst.msk [vmem:[#allocation2 + $0xc0] sm:$0xff] %vm2408_vm7, %v2361_v34 }
 0x4d1   : > { %2540 = vst.msk [vmem:[#allocation3 + $0x18] sm:$0xff] %vm2408_vm7, %v2448_v33 }
 0x4d4   : > { %2645 = vrot.lane.b32.xlu1 %v6427_v25, %s4221_s18  ;;  %2643 = vrot.lane.b32.xlu0 %v6430_v35, %s4221_s18 }
 0x4d5   : > { %2647 = vrot.lane.b32.xlu2 %v6473_v43, %s4221_s18 }
 0x4d6   : > { %v2369_v36 = vpop.permute.xlu1 %2368  ;;  %v2367_v41 = vpop.permute.xlu0 %2366 }
 0x4d7   : > { %2437 = vst.msk [vmem:[#allocation2 + $0xe0] sm:$0xff] %vm2408_vm7, %v2369_v36  ;;  %v2454_v50 = vpop.permute.xlu2 %2453 }
 0x4d8   : > { %2436 = vst.msk [vmem:[#allocation2 + $0xd8] sm:$0xff] %vm2408_vm7, %v2367_v41  ;;  %v3970_v41 = vld [vmem:[%s4303_s30 + $0x152] sm:$0xff] }
 0x4d9   : > { %2543 = vst.msk [vmem:[#allocation3 + $0x30] sm:$0xff] %vm2408_vm7, %v2454_v50  ;;  %v3971_v50 = vld [vmem:[%s4303_s30 + $0x15a] sm:$0xff] }
 0x4dc   : > { %2651 = vrot.lane.b32.xlu1 %v6441_v44, %s4221_s18  ;;  %2649 = vrot.lane.b32.xlu0 %v6444_v51, %s4221_s18 }
 0x4dd   : > { %2794 = vrot.lane.b32.xlu2 %v3962_v61, %s4220_s11 }
 0x4de   : > { %v2375_v56 = vpop.permute.xlu1 %2374  ;;  %v2373_v63 = vpop.permute.xlu0 %2372 }
 0x4df   : > { %2440 = vst.msk [vmem:[#allocation2 + $0xf8] sm:$0xff] %vm2408_vm7, %v2375_v56  ;;  %v2460_v46 = vpop.permute.xlu2 %2459 }
 0x4e0   : > { %2439 = vst.msk [vmem:[#allocation2 + $0xf0] sm:$0xff] %vm2408_vm7, %v2373_v63 }
 0x4e1   : > { %2546 = vst.msk [vmem:[#allocation3 + $0x48] sm:$0xff] %vm2408_vm7, %v2460_v46 }
 0x4e4   : > { %2762 = vrot.lane.b32.xlu1 %v3946_v1, %s4220_s11  ;;  %2653 = vrot.lane.b32.xlu0 %v6455_v62, %s4221_s18  ;;  %v3959_v1 = vld [vmem:[%s4303_s30 + $0xca] sm:$0xff] }
 0x4e5   : > { %2796 = vrot.lane.b32.xlu2 %v3963_v14, %s4220_s11 }
 0x4e6   : > { %v2446_v60 = vpop.permute.xlu1 %2445  ;;  %v2444_v58 = vpop.permute.xlu0 %2443 }
 0x4e7   : > { %2539 = vst.msk [vmem:[#allocation3 + $0x10] sm:$0xff] %vm2408_vm7, %v2446_v60  ;;  %v2466_v28 = vpop.permute.xlu2 %2465  ;;  %v3960_v60 = vld [vmem:[%s4303_s30 + $0xda] sm:$0xff] }
 0x4e8   : > { %2538 = vst.msk [vmem:[#allocation3 + $0x8] sm:$0xff] %vm2408_vm7, %v2444_v58  ;;  %v3972_v58 = vld [vmem:[%s4303_s30 + $0x16a] sm:$0xff] }
 0x4e9   : > { %2549 = vst.msk [vmem:[#allocation3 + $0x60] sm:$0xff] %vm2408_vm7, %v2466_v28 }
 0x4ec   : > { %2764 = vrot.lane.b32.xlu1 %v3947_v48, %s4220_s11  ;;  %2655 = vrot.lane.b32.xlu0 %v6464_v49, %s4221_s18 }
 0x4ed   : > { %2798 = vrot.lane.b32.xlu2 %v3964_v12, %s4220_s11 }
 0x4ee   : > { %v2452_v55 = vpop.permute.xlu1 %2451  ;;  %v2450_v32 = vpop.permute.xlu0 %2449 }
 0x4ef   : > { %2542 = vst.msk [vmem:[#allocation3 + $0x28] sm:$0xff] %vm2408_vm7, %v2452_v55  ;;  %v2472_v47 = vpop.permute.xlu2 %2471 }
 0x4f0   : > { %2541 = vst.msk [vmem:[#allocation3 + $0x20] sm:$0xff] %vm2408_vm7, %v2450_v32  ;;  %v3961_v32 = vld [vmem:[%s4303_s30 + $0xe2] sm:$0xff] }
 0x4f1   : > { %2552 = vst.msk [vmem:[#allocation3 + $0x78] sm:$0xff] %vm2408_vm7, %v2472_v47 }
 0x4f4   : > { %2766 = vrot.lane.b32.xlu1 %v3948_v27, %s4220_s11  ;;  %2657 = vrot.lane.b32.xlu0 %v6476_v39, %s4221_s18  ;;  %v3968_v27 = vld [vmem:[%s4303_s30 + $0x13a] sm:$0xff] }
 0x4f5   : > { %2800 = vrot.lane.b32.xlu2 %v3965_v21, %s4220_s11 }
 0x4f6   : > { %v2458_v59 = vpop.permute.xlu1 %2457  ;;  %v2456_v10 = vpop.permute.xlu0 %2455 }
 0x4f7   : > { %2545 = vst.msk [vmem:[#allocation3 + $0x40] sm:$0xff] %vm2408_vm7, %v2458_v59  ;;  %v2478_v3 = vpop.permute.xlu2 %2477 }
 0x4f8   : > { %2544 = vst.msk [vmem:[#allocation3 + $0x38] sm:$0xff] %vm2408_vm7, %v2456_v10 }
 0x4f9   : > { %2555 = vst.msk [vmem:[#allocation3 + $0x90] sm:$0xff] %vm2408_vm7, %v2478_v3 }
 0x4fc   : > { %2768 = vrot.lane.b32.xlu0 %v6417_v24, %s4220_s11  ;;  %2802 = vrot.lane.b32.xlu1 %v6505_v5, %s4220_s11 }
 0x4fd   : > { %2659 = vrot.lane.b32.xlu2 %v3959_v1, %s4221_s18 }
 0x4fe   : > { %v2464_v52 = vpop.permute.xlu1 %2463  ;;  %v2462_v31 = vpop.permute.xlu0 %2461 }
 0x4ff   : > { %2548 = vst.msk [vmem:[#allocation3 + $0x58] sm:$0xff] %vm2408_vm7, %v2464_v52  ;;  %v2484_v0 = vpop.permute.xlu2 %2483  ;;  %v6619_v52 = vld [vmem:[%s4303_s30 + $0x182] sm:$0xff] }
 0x500   : > { %2547 = vst.msk [vmem:[#allocation3 + $0x50] sm:$0xff] %vm2408_vm7, %v2462_v31 }
 0x501   : > { %2558 = vst.msk [vmem:[#allocation3 + $0xa8] sm:$0xff] %vm2408_vm7, %v2484_v0 }
 0x504   : > { %2770 = vrot.lane.b32.xlu0 %v3950_v40, %s4220_s11  ;;  %2665 = vrot.lane.b32.xlu1 %v3962_v61, %s4221_s18 }
 0x505   : > { %2804 = vrot.lane.b32.xlu2 %v3967_v54, %s4220_s11 }
 0x506   : > { %v2470_v37 = vpop.permute.xlu1 %2469  ;;  %v2468_v4 = vpop.permute.xlu0 %2467 }
 0x507   : > { %2551 = vst.msk [vmem:[#allocation3 + $0x70] sm:$0xff] %vm2408_vm7, %v2470_v37  ;;  %v2490_v6 = vpop.permute.xlu2 %2489 }
 0x508   : > { %2550 = vst.msk [vmem:[#allocation3 + $0x68] sm:$0xff] %vm2408_vm7, %v2468_v4 }
 0x509   : > { %2561 = vst.msk [vmem:[#allocation3 + $0xc0] sm:$0xff] %vm2408_vm7, %v2490_v6  ;;  %v3975_v6 = vld [vmem:[%s4303_s30 + $0x18a] sm:$0xff] }
 0x50c   : > { %2772 = vrot.lane.b32.xlu0 %v6430_v35, %s4220_s11  ;;  %2667 = vrot.lane.b32.xlu1 %v3963_v14, %s4221_s18 }
 0x50d   : > { %2806 = vrot.lane.b32.xlu2 %v3968_v27, %s4220_s11 }
 0x50e   : > { %v2476_v8 = vpop.permute.xlu1 %2475  ;;  %v2474_v7 = vpop.permute.xlu0 %2473 }
 0x50f   : > { %2554 = vst.msk [vmem:[#allocation3 + $0x88] sm:$0xff] %vm2408_vm7, %v2476_v8  ;;  %v2496_v9 = vpop.permute.xlu2 %2495 }
 0x510   : > { %2553 = vst.msk [vmem:[#allocation3 + $0x80] sm:$0xff] %vm2408_vm7, %v2474_v7 }
 0x511   : > { %2564 = vst.msk [vmem:[#allocation3 + $0xd8] sm:$0xff] %vm2408_vm7, %v2496_v9 }
 0x514   : > { %2774 = vrot.lane.b32.xlu0 %v6427_v25, %s4220_s11  ;;  %2669 = vrot.lane.b32.xlu1 %v3964_v12, %s4221_s18  ;;  %v3969_v25 = vld [vmem:[%s4303_s30 + $0x142] sm:$0xff] }
 0x515   : > { %2808 = vrot.lane.b32.xlu2 %v3969_v25, %s4220_s11 }
 0x516   : > { %v2482_v23 = vpop.permute.xlu1 %2481  ;;  %v2480_v16 = vpop.permute.xlu0 %2479 }
 0x517   : > { %2557 = vst.msk [vmem:[#allocation3 + $0xa0] sm:$0xff] %vm2408_vm7, %v2482_v23  ;;  %v2502_v19 = vpop.permute.xlu2 %2501 }
 0x518   : > { %2556 = vst.msk [vmem:[#allocation3 + $0x98] sm:$0xff] %vm2408_vm7, %v2480_v16 }
 0x519   : > { %2567 = vst.msk [vmem:[#allocation3 + $0xf0] sm:$0xff] %vm2408_vm7, %v2502_v19 }
 0x51c   : > { %2776 = vrot.lane.b32.xlu0 %v6473_v43, %s4220_s11  ;;  %2671 = vrot.lane.b32.xlu1 %v3965_v21, %s4221_s18  ;;  %v3973_v43 = vld [vmem:[%s4303_s30 + $0x172] sm:$0xff] }
 0x51d   : > { %2810 = vrot.lane.b32.xlu2 %v3970_v41, %s4220_s11 }
 0x51e   : > { %v2488_v22 = vpop.permute.xlu1 %2487  ;;  %v2486_v30 = vpop.permute.xlu0 %2485 }
 0x51f   : > { %2560 = vst.msk [vmem:[#allocation3 + $0xb8] sm:$0xff] %vm2408_vm7, %v2488_v22  ;;  %v2636_v45 = vpop.permute.xlu2 %2635 }
 0x520   : > { %2559 = vst.msk [vmem:[#allocation3 + $0xb0] sm:$0xff] %vm2408_vm7, %v2486_v30 }
 0x521   : > { %2731 = vst.msk [vmem:[#allocation2 + $0x8] sm:$0xff] %vm2729_vm8, %v2636_v45 }
 0x524   : > { %2778 = vrot.lane.b32.xlu0 %v6444_v51, %s4220_s11  ;;  %2673 = vrot.lane.b32.xlu1 %v6505_v5, %s4221_s18 }
 0x525   : > { %2812 = vrot.lane.b32.xlu2 %v3971_v50, %s4220_s11 }
 0x526   : > { %v2494_v42 = vpop.permute.xlu1 %2493  ;;  %v2492_v48 = vpop.permute.xlu0 %2491 }
 0x527   : > { %2563 = vst.msk [vmem:[#allocation3 + $0xd0] sm:$0xff] %vm2408_vm7, %v2494_v42  ;;  %v2642_v57 = vpop.permute.xlu2 %2641 }
 0x528   : > { %2562 = vst.msk [vmem:[#allocation3 + $0xc8] sm:$0xff] %vm2408_vm7, %v2492_v48  ;;  %v2891_v40 = vld [vmem:[#allocation2 + $0x8] sm:$0xff] }
 0x529   : > { %2734 = vst.msk [vmem:[#allocation2 + $0x20] sm:$0xff] %vm2729_vm8, %v2642_v57 }
 0x52c   : > { %2780 = vrot.lane.b32.xlu0 %v6441_v44, %s4220_s11  ;;  %2675 = vrot.lane.b32.xlu1 %v3967_v54, %s4221_s18 }
 0x52d   : > { %2814 = vrot.lane.b32.xlu2 %v3972_v58, %s4220_s11 }
 0x52e   : > { %v2500_v53 = vpop.permute.xlu1 %2499  ;;  %v2498_v24 = vpop.permute.xlu0 %2497 }
 0x52f   : > { %2566 = vst.msk [vmem:[#allocation3 + $0xe8] sm:$0xff] %vm2408_vm7, %v2500_v53  ;;  %v2648_v56 = vpop.permute.xlu2 %2647 }
 0x530   : > { %2565 = vst.msk [vmem:[#allocation3 + $0xe0] sm:$0xff] %vm2408_vm7, %v2498_v24 }
 0x531   : > { %2737 = vst.msk [vmem:[#allocation2 + $0x38] sm:$0xff] %vm2729_vm8, %v2648_v56 }
 0x534   : > { %2782 = vrot.lane.b32.xlu0 %v6455_v62, %s4220_s11  ;;  %2677 = vrot.lane.b32.xlu1 %v3968_v27, %s4221_s18 }
 0x535   : > { %2816 = vrot.lane.b32.xlu2 %v3973_v43, %s4220_s11 }
 0x536   : > { %v2634_v38 = vpop.permute.xlu1 %2633  ;;  %v2504_v34 = vpop.permute.xlu0 %2503 }
 0x537   : > { %2730 = vst.msk [vmem:[#allocation2] sm:$0xff] %vm2729_vm8, %v2634_v38  ;;  %v2795_v3 = vpop.permute.xlu2 %2794  ;;  %v3976_v38 = vld [vmem:[%s4303_s30 + $0x19a] sm:$0xff] }
 0x538   : > { %2568 = vst.msk [vmem:[#allocation3 + $0xf8] sm:$0xff] %vm2408_vm7, %v2504_v34  ;;  %v2897_v11 = vld [vmem:[#allocation2 + $0x38] sm:$0xff] }
 0x539   : > { %2874 = vst.msk [vmem:[#allocation3 + $0x80] sm:$0xff] %vm2729_vm8, %v2795_v3 }
 0x53c   : > { %2784 = vrot.lane.b32.xlu0 %v6464_v49, %s4220_s11  ;;  %2679 = vrot.lane.b32.xlu1 %v3969_v25, %s4221_s18 }
 0x53d   : > { %2818 = vrot.lane.b32.xlu2 %v6619_v52, %s4220_s11 }
 0x53e   : > { %v2640_v35 = vpop.permute.xlu1 %2639  ;;  %v2638_v33 = vpop.permute.xlu0 %2637  ;;  %v2890_v36 = vld [vmem:[#allocation2] sm:$0xff] }
 0x53f   : > { %2733 = vst.msk [vmem:[#allocation2 + $0x18] sm:$0xff] %vm2729_vm8, %v2640_v35  ;;  %3978 = vmatmul.msk.f32.vlgmr.msra.gmra.mxu0 %vm2963_vm9, %v2890_v36  ;;  %v2797_v4 = vpop.permute.xlu2 %2796 }
 0x540   : > { %2732 = vst.msk [vmem:[#allocation2 + $0x10] sm:$0xff] %vm2729_vm8, %v2638_v33  ;;  %v2938_v2 = vld [vmem:[#allocation3 + $0x80] sm:$0xff] }
 0x541   : > { %2875 = vst.msk [vmem:[#allocation3 + $0x88] sm:$0xff] %vm2729_vm8, %v2797_v4  ;;  %4026 = vmatmul.msk.f32.vlgmr.msra.gmra.mxu3 %vm2963_vm9, %v2938_v2 }
 0x544   : > { %2786 = vrot.lane.b32.xlu0 %v6476_v39, %s4220_s11  ;;  %2681 = vrot.lane.b32.xlu1 %v3970_v41, %s4221_s18  ;;  %v2894_v39 = vld [vmem:[#allocation2 + $0x20] sm:$0xff] }
 0x545   : > { %2820 = vrot.lane.b32.xlu2 %v3975_v6, %s4220_s11 }
 0x546   : > { %v2646_v44 = vpop.permute.xlu1 %2645  ;;  %v2644_v51 = vpop.permute.xlu0 %2643  ;;  %v2893_v55 = vld [vmem:[#allocation2 + $0x18] sm:$0xff] }
 0x547   : > { %2736 = vst.msk [vmem:[#allocation2 + $0x30] sm:$0xff] %vm2729_vm8, %v2646_v44  ;;  %3979 = vmatmul.msk.f32.gmra.mxu0 %vm2963_vm9, %v2891_v40  ;;  %v2892_v46 = vld [vmem:[#allocation2 + $0x10] sm:$0xff]  ;;  %v2799_v7 = vpop.permute.xlu2 %2798 }
 0x548   : > { %2735 = vst.msk [vmem:[#allocation2 + $0x28] sm:$0xff] %vm2729_vm8, %v2644_v51  ;;  %v2939_v17 = vld [vmem:[#allocation3 + $0x88] sm:$0xff] }
 0x549   : > { %2876 = vst.msk [vmem:[#allocation3 + $0x90] sm:$0xff] %vm2729_vm8, %v2799_v7  ;;  %4027 = vmatmul.msk.f32.gmra.mxu3 %vm2963_vm9, %v2939_v17  ;;  %v3977_v51 = vld [vmem:[%s4303_s30 + $0x1a2] sm:$0xff] }
 0x54c   : > { %2788 = vrot.lane.b32.xlu0 %v3959_v1, %s4220_s11  ;;  %2683 = vrot.lane.b32.xlu1 %v3971_v50, %s4221_s18 }
 0x54d   : > { %2822 = vrot.lane.b32.xlu2 %v3976_v38, %s4220_s11 }
 0x54e   : > { %v2652_v63 = vpop.permute.xlu1 %2651  ;;  %v2650_v62 = vpop.permute.xlu0 %2649  ;;  %v2896_v5 = vld [vmem:[#allocation2 + $0x30] sm:$0xff] }
 0x54f   : > { %2739 = vst.msk [vmem:[#allocation2 + $0x48] sm:$0xff] %vm2729_vm8, %v2652_v63  ;;  %3980 = vmatmul.msk.f32.gmra.mxu0 %vm2963_vm9, %v2892_v46  ;;  %v2895_v61 = vld [vmem:[#allocation2 + $0x28] sm:$0xff]  ;;  %v2801_v13 = vpop.permute.xlu2 %2800 }
 0x550   : > { %2738 = vst.msk [vmem:[#allocation2 + $0x40] sm:$0xff] %vm2729_vm8, %v2650_v62  ;;  %v2940_v12 = vld [vmem:[#allocation3 + $0x90] sm:$0xff] }
 0x551   : > { %2877 = vst.msk [vmem:[#allocation3 + $0x98] sm:$0xff] %vm2729_vm8, %v2801_v13  ;;  %4028 = vmatmul.msk.f32.gmra.mxu3 %vm2963_vm9, %v2940_v12 }
 0x554   : > { %2790 = vrot.lane.b32.xlu0 %v3960_v60, %s4220_s11  ;;  %2685 = vrot.lane.b32.xlu1 %v3972_v58, %s4221_s18 }
 0x555   : > { %2824 = vrot.lane.b32.xlu2 %v3977_v51, %s4220_s11 }
 0x556   : > { %v2763_v49 = vpop.permute.xlu1 %2762  ;;  %v2654_v28 = vpop.permute.xlu0 %2653  ;;  %v2899_v21 = vld [vmem:[#allocation2 + $0x48] sm:$0xff] }
 0x557   : > { %2858 = vst.msk [vmem:[#allocation3] sm:$0xff] %vm2729_vm8, %v2763_v49  ;;  %3981 = vmatmul.msk.f32.gmra.mxu0 %vm2963_vm9, %v2893_v55  ;;  %v2898_v16 = vld [vmem:[#allocation2 + $0x40] sm:$0xff]  ;;  %v2660_v26 = vpop.permute.xlu2 %2659 }
 0x558   : > { %2740 = vst.msk [vmem:[#allocation2 + $0x50] sm:$0xff] %vm2729_vm8, %v2654_v28  ;;  %v2941_v19 = vld [vmem:[#allocation3 + $0x98] sm:$0xff] }
 0x559   : > { %2743 = vst.msk [vmem:[#allocation2 + $0x68] sm:$0xff] %vm2729_vm8, %v2660_v26  ;;  %4029 = vmatmul.msk.f32.gmra.mxu3 %vm2963_vm9, %v2941_v19 }
 0x55c   : > { %2792 = vrot.lane.b32.xlu0 %v3961_v32, %s4220_s11  ;;  %2687 = vrot.lane.b32.xlu1 %v3973_v43, %s4221_s18 }
 0x55d   : > { %2689 = vrot.lane.b32.xlu2 %v6619_v52, %s4221_s18 }
 0x55e   : > { %v2765_v47 = vpop.permute.xlu1 %2764  ;;  %v2656_v59 = vpop.permute.xlu0 %2655  ;;  %v2922_v10 = vld [vmem:[#allocation3] sm:$0xff] }
 0x55f   : > { %2859 = vst.msk [vmem:[#allocation3 + $0x8] sm:$0xff] %vm2729_vm8, %v2765_v47  ;;  %3982 = vmatmul.msk.f32.gmra.mxu0 %vm2963_vm9, %v2894_v39  ;;  %4010 = vmatmul.msk.f32.vlgmr.msra.gmra.mxu1 %vm2963_vm9, %v2922_v10  ;;  %v2805_v30 = vpop.permute.xlu2 %2804  ;;  %v2900_v42 = vld [vmem:[#allocation2 + $0x50] sm:$0xff] }
 0x560   : > { %2741 = vst.msk [vmem:[#allocation2 + $0x58] sm:$0xff] %vm2729_vm8, %v2656_v59  ;;  %v2903_v44 = vld [vmem:[#allocation2 + $0x68] sm:$0xff] }
 0x561   : > { %2879 = vst.msk [vmem:[#allocation3 + $0xa8] sm:$0xff] %vm2729_vm8, %v2805_v30 }
 0x564   : > { %2691 = vrot.lane.b32.xlu0 %v3975_v6, %s4221_s18  ;;  %2661 = vrot.lane.b32.xlu1 %v3960_v60, %s4221_s18 }
 0x565   : > { %2693 = vrot.lane.b32.xlu2 %v3976_v38, %s4221_s18 }
 0x566   : > { %v2767_v31 = vpop.permute.xlu1 %2766  ;;  %v2658_v0 = vpop.permute.xlu0 %2657  ;;  %v2923_v37 = vld [vmem:[#allocation3 + $0x8] sm:$0xff] }
 0x567   : > { %2860 = vst.msk [vmem:[#allocation3 + $0x10] sm:$0xff] %vm2729_vm8, %v2767_v31  ;;  %3983 = vmatmul.msk.f32.gmra.mxu0 %vm2963_vm9, %v2895_v61  ;;  %4011 = vmatmul.msk.f32.gmra.mxu1 %vm2963_vm9, %v2923_v37  ;;  %v2807_v54 = vpop.permute.xlu2 %2806  ;;  %v2901_v27 = vld [vmem:[#allocation2 + $0x58] sm:$0xff] }
 0x568   : > { %2742 = vst.msk [vmem:[#allocation2 + $0x60] sm:$0xff] %vm2729_vm8, %v2658_v0  ;;  %v2943_v53 = vld [vmem:[#allocation3 + $0xa8] sm:$0xff] }
 0x569   : > { %2880 = vst.msk [vmem:[#allocation3 + $0xb0] sm:$0xff] %vm2729_vm8, %v2807_v54 }
 0x56c   : > { %2663 = vrot.lane.b32.xlu0 %v3961_v32, %s4221_s18  ;;  %2695 = vrot.lane.b32.xlu1 %v3977_v51, %s4221_s18 }
 0x56e   : > { %v2769_v14 = vpop.permute.xlu0 %2768  ;;  %v2924_v8 = vld [vmem:[#allocation3 + $0x10] sm:$0xff]  ;;  %v2803_v18 = vpop.permute.xlu1 %2802 }
 0x56f   : > { %2861 = vst.msk [vmem:[#allocation3 + $0x18] sm:$0xff] %vm2729_vm8, %v2769_v14  ;;  %3984 = vmatmul.msk.f32.gmra.mxu0 %vm2963_vm9, %v2896_v5  ;;  %4012 = vmatmul.msk.f32.gmra.mxu1 %vm2963_vm9, %v2924_v8  ;;  %v2809_v34 = vpop.permute.xlu2 %2808  ;;  %v2902_v33 = vld [vmem:[#allocation2 + $0x60] sm:$0xff] }
 0x570   : > { %2878 = vst.msk [vmem:[#allocation3 + $0xa0] sm:$0xff] %vm2729_vm8, %v2803_v18  ;;  %v2944_v25 = vld [vmem:[#allocation3 + $0xb0] sm:$0xff] }
 0x571   : > { %2881 = vst.msk [vmem:[#allocation3 + $0xb8] sm:$0xff] %vm2729_vm8, %v2809_v34 }
 0x576   : > { %v2771_v9 = vpop.permute.xlu0 %2770  ;;  %v2925_v20 = vld [vmem:[#allocation3 + $0x18] sm:$0xff]  ;;  %v2666_v43 = vpop.permute.xlu1 %2665 }
 0x577   : > { %2862 = vst.msk [vmem:[#allocation3 + $0x20] sm:$0xff] %vm2729_vm8, %v2771_v9  ;;  %3985 = vmatmul.msk.f32.gmra.mxu0 %vm2963_vm9, %v2897_v11  ;;  %4013 = vmatmul.msk.f32.gmra.mxu1 %vm2963_vm9, %v2925_v20  ;;  %v2942_v45 = vld [vmem:[#allocation3 + $0xa0] sm:$0xff]  ;;  %v2811_v41 = vpop.permute.xlu2 %2810 }
 0x578   : > { %4030 = vmatmul.msk.f32.gmra.mxu3 %vm2963_vm9, %v2942_v45  ;;  %v2945_v40 = vld [vmem:[#allocation3 + $0xb8] sm:$0xff]  ;;  %2882 = vst.msk [vmem:[#allocation3 + $0xc0] sm:$0xff] %vm2729_vm8, %v2811_v41 }
 0x579   : > { %2746 = vst.msk [vmem:[#allocation2 + $0x80] sm:$0xff] %vm2729_vm8, %v2666_v43 }
 0x57e   : > { %v2773_v23 = vpop.permute.xlu0 %2772  ;;  %v2926_v15 = vld [vmem:[#allocation3 + $0x20] sm:$0xff]  ;;  %v2668_v3 = vpop.permute.xlu1 %2667 }
 0x57f   : > { %2863 = vst.msk [vmem:[#allocation3 + $0x28] sm:$0xff] %vm2729_vm8, %v2773_v23  ;;  %3986 = vmatmul.msk.f32.gmra.mxu0 %vm2963_vm9, %v2898_v16  ;;  %4014 = vmatmul.msk.f32.gmra.mxu1 %vm2963_vm9, %v2926_v15  ;;  %v2813_v63 = vpop.permute.xlu2 %2812  ;;  %v2946_v62 = vld [vmem:[#allocation3 + $0xc0] sm:$0xff] }
 0x580   : > { %4031 = vmatmul.msk.f32.gmra.mxu3 %vm2963_vm9, %v2943_v53  ;;  %2883 = vst.msk [vmem:[#allocation3 + $0xc8] sm:$0xff] %vm2729_vm8, %v2813_v63  ;;  %v2906_v8 = vld [vmem:[#allocation2 + $0x80] sm:$0xff] }
 0x581   : > { %2747 = vst.msk [vmem:[#allocation2 + $0x88] sm:$0xff] %vm2729_vm8, %v2668_v3  ;;  %3994 = vmatmul.msk.f32.vlgmr.msra.gmra.mxu2 %vm2963_vm9, %v2906_v8 }
 0x586   : > { %v2775_v29 = vpop.permute.xlu0 %2774  ;;  %v2927_v22 = vld [vmem:[#allocation3 + $0x28] sm:$0xff]  ;;  %v2670_v37 = vpop.permute.xlu1 %2669 }
 0x587   : > { %2864 = vst.msk [vmem:[#allocation3 + $0x30] sm:$0xff] %vm2729_vm8, %v2775_v29  ;;  %3987 = vmatmul.msk.f32.gmra.mxu0 %vm2963_vm9, %v2899_v21  ;;  %4015 = vmatmul.msk.f32.gmra.mxu1 %vm2963_vm9, %v2927_v22  ;;  %v2815_v58 = vpop.permute.xlu2 %2814  ;;  %v2947_v49 = vld [vmem:[#allocation3 + $0xc8] sm:$0xff] }
 0x588   : > { %4032 = vmatmul.msk.f32.gmra.mxu3 %vm2963_vm9, %v2944_v25  ;;  %2884 = vst.msk [vmem:[#allocation3 + $0xd0] sm:$0xff] %vm2729_vm8, %v2815_v58  ;;  %v2907_v9 = vld [vmem:[#allocation2 + $0x88] sm:$0xff] }
 0x589   : > { %2748 = vst.msk [vmem:[#allocation2 + $0x90] sm:$0xff] %vm2729_vm8, %v2670_v37  ;;  %3995 = vmatmul.msk.f32.gmra.mxu2 %vm2963_vm9, %v2907_v9 }
 0x58e   : > { %v2777_v1 = vpop.permute.xlu0 %2776  ;;  %v2928_v48 = vld [vmem:[#allocation3 + $0x30] sm:$0xff]  ;;  %v2672_v14 = vpop.permute.xlu1 %2671 }
 0x58f   : > { %2865 = vst.msk [vmem:[#allocation3 + $0x38] sm:$0xff] %vm2729_vm8, %v2777_v1  ;;  %3988 = vmatmul.msk.f32.gmra.mxu0 %vm2963_vm9, %v2900_v42  ;;  %4016 = vmatmul.msk.f32.gmra.mxu1 %vm2963_vm9, %v2928_v48  ;;  %v2817_v32 = vpop.permute.xlu2 %2816  ;;  %v2948_v39 = vld [vmem:[#allocation3 + $0xd0] sm:$0xff] }
 0x590   : > { %4033 = vmatmul.msk.f32.gmra.mxu3 %vm2963_vm9, %v2945_v40  ;;  %2885 = vst.msk [vmem:[#allocation3 + $0xd8] sm:$0xff] %vm2729_vm8, %v2817_v32  ;;  %v2908_v12 = vld [vmem:[#allocation2 + $0x90] sm:$0xff] }
 0x591   : > { %2749 = vst.msk [vmem:[#allocation2 + $0x98] sm:$0xff] %vm2729_vm8, %v2672_v14  ;;  %3996 = vmatmul.msk.f32.gmra.mxu2 %vm2963_vm9, %v2908_v12 }
 0x596   : > { %v2779_v24 = vpop.permute.xlu0 %2778  ;;  %v2929_v57 = vld [vmem:[#allocation3 + $0x38] sm:$0xff]  ;;  %v2674_v17 = vpop.permute.xlu1 %2673 }
 0x597   : > { %2866 = vst.msk [vmem:[#allocation3 + $0x40] sm:$0xff] %vm2729_vm8, %v2779_v24  ;;  %3989 = vmatmul.msk.f32.gmra.mxu0 %vm2963_vm9, %v2901_v27  ;;  %4017 = vmatmul.msk.f32.gmra.mxu1 %vm2963_vm9, %v2929_v57  ;;  %v2819_v10 = vpop.permute.xlu2 %2818  ;;  %v2949_v52 = vld [vmem:[#allocation3 + $0xd8] sm:$0xff] }
 0x598   : > { %4034 = vmatmul.msk.f32.gmra.mxu3 %vm2963_vm9, %v2946_v62  ;;  %2886 = vst.msk [vmem:[#allocation3 + $0xe0] sm:$0xff] %vm2729_vm8, %v2819_v10  ;;  %v2909_v15 = vld [vmem:[#allocation2 + $0x98] sm:$0xff] }
 0x599   : > { %2750 = vst.msk [vmem:[#allocation2 + $0xa0] sm:$0xff] %vm2729_vm8, %v2674_v17  ;;  %3997 = vmatmul.msk.f32.gmra.mxu2 %vm2963_vm9, %v2909_v15 }
 0x59e   : > { %v2781_v35 = vpop.permute.xlu0 %2780  ;;  %v2930_v36 = vld [vmem:[#allocation3 + $0x40] sm:$0xff]  ;;  %v2676_v20 = vpop.permute.xlu1 %2675 }
 0x59f   : > { %2867 = vst.msk [vmem:[#allocation3 + $0x48] sm:$0xff] %vm2729_vm8, %v2781_v35  ;;  %3990 = vmatmul.msk.f32.gmra.mxu0 %vm2963_vm9, %v2902_v33  ;;  %4018 = vmatmul.msk.f32.gmra.mxu1 %vm2963_vm9, %v2930_v36  ;;  %v2821_v61 = vpop.permute.xlu2 %2820  ;;  %v2950_v4 = vld [vmem:[#allocation3 + $0xe0] sm:$0xff] }
 0x5a0   : > { %4035 = vmatmul.msk.f32.gmra.mxu3 %vm2963_vm9, %v2947_v49  ;;  %2887 = vst.msk [vmem:[#allocation3 + $0xe8] sm:$0xff] %vm2729_vm8, %v2821_v61  ;;  %v2910_v21 = vld [vmem:[#allocation2 + $0xa0] sm:$0xff] }
 0x5a1   : > { %2751 = vst.msk [vmem:[#allocation2 + $0xa8] sm:$0xff] %vm2729_vm8, %v2676_v20  ;;  %3998 = vmatmul.msk.f32.gmra.mxu2 %vm2963_vm9, %v2910_v21 }
 0x5a6   : > { %v2783_v50 = vpop.permute.xlu0 %2782  ;;  %v2931_v56 = vld [vmem:[#allocation3 + $0x48] sm:$0xff]  ;;  %v2678_v23 = vpop.permute.xlu1 %2677 }
 0x5a7   : > { %2868 = vst.msk [vmem:[#allocation3 + $0x50] sm:$0xff] %vm2729_vm8, %v2783_v50  ;;  %4019 = vmatmul.msk.f32.gmra.mxu1 %vm2963_vm9, %v2931_v56  ;;  %3991 = vmatmul.msk.f32.gmra.mxu0 %vm2963_vm9, %v2903_v44  ;;  %v2951_v5 = vld [vmem:[#allocation3 + $0xe8] sm:$0xff]  ;;  %v2823_v18 = vpop.permute.xlu2 %2822 }
 0x5a8   : > { %4036 = vmatmul.msk.f32.gmra.mxu3 %vm2963_vm9, %v2948_v39  ;;  %2752 = vst.msk [vmem:[#allocation2 + $0xb0] sm:$0xff] %vm2729_vm8, %v2678_v23  ;;  %v2911_v42 = vld [vmem:[#allocation2 + $0xa8] sm:$0xff] }
 0x5a9   : > { %2888 = vst.msk [vmem:[#allocation3 + $0xf0] sm:$0xff] %vm2729_vm8, %v2823_v18  ;;  %3999 = vmatmul.msk.f32.gmra.mxu2 %vm2963_vm9, %v2911_v42 }
 0x5ae   : > { %v2785_v46 = vpop.permute.xlu0 %2784  ;;  %v2932_v60 = vld [vmem:[#allocation3 + $0x50] sm:$0xff]  ;;  %v2680_v19 = vpop.permute.xlu1 %2679 }
 0x5af   : > { %2869 = vst.msk [vmem:[#allocation3 + $0x58] sm:$0xff] %vm2729_vm8, %v2785_v46  ;;  %4020 = vmatmul.msk.f32.gmra.mxu1 %vm2963_vm9, %v2932_v60  ;;  %v2825_v48 = vpop.permute.xlu2 %2824  ;;  %v2912_v53 = vld [vmem:[#allocation2 + $0xb0] sm:$0xff] }
 0x5b0   : > { %4037 = vmatmul.msk.f32.gmra.mxu3 %vm2963_vm9, %v2949_v52  ;;  %2753 = vst.msk [vmem:[#allocation2 + $0xb8] sm:$0xff] %vm2729_vm8, %v2680_v19  ;;  %v2952_v45 = vld [vmem:[#allocation3 + $0xf0] sm:$0xff] }
 0x5b1   : > { %2889 = vst.msk [vmem:[#allocation3 + $0xf8] sm:$0xff] %vm2729_vm8, %v2825_v48  ;;  %4000 = vmatmul.msk.f32.gmra.mxu2 %vm2963_vm9, %v2912_v53 }
 0x5b6   : > { %v2787_v28 = vpop.permute.xlu0 %2786  ;;  %v2933_v55 = vld [vmem:[#allocation3 + $0x58] sm:$0xff]  ;;  %v2682_v22 = vpop.permute.xlu1 %2681 }
 0x5b7   : > { %2870 = vst.msk [vmem:[#allocation3 + $0x60] sm:$0xff] %vm2729_vm8, %v2787_v28  ;;  %4021 = vmatmul.msk.f32.gmra.mxu1 %vm2963_vm9, %v2933_v55  ;;  %v2690_v57 = vpop.permute.xlu2 %2689  ;;  %v2913_v25 = vld [vmem:[#allocation2 + $0xb8] sm:$0xff] }
 0x5b8   : > { %4038 = vmatmul.msk.f32.gmra.mxu3 %vm2963_vm9, %v2950_v4  ;;  %2754 = vst.msk [vmem:[#allocation2 + $0xc0] sm:$0xff] %vm2729_vm8, %v2682_v22  ;;  %v2953_v34 = vld [vmem:[#allocation3 + $0xf8] sm:$0xff]  ;;  %v6789_v22 = vld [vmem:[%s6922_s2] ss:$0 sm:$0xff] }
 0x5b9   : > { %2758 = vst.msk [vmem:[#allocation2 + $0xe0] sm:$0xff] %vm2729_vm8, %v2690_v57  ;;  %4001 = vmatmul.msk.f32.gmra.mxu2 %vm2963_vm9, %v2913_v25 }
 0x5bc   : > { %v3077_v9 = vpop.f32.mrf.mxu0 }
 0x5be   : > { %v2789_v47 = vpop.permute.xlu0 %2788  ;;  %v2934_v59 = vld [vmem:[#allocation3 + $0x60] sm:$0xff]  ;;  %v2684_v54 = vpop.permute.xlu1 %2683 }
 0x5bf   : > { %2871 = vst.msk [vmem:[#allocation3 + $0x68] sm:$0xff] %vm2729_vm8, %v2789_v47  ;;  %4022 = vmatmul.msk.f32.gmra.mxu1 %vm2963_vm9, %v2934_v59  ;;  %v2694_v36 = vpop.permute.xlu2 %2693  ;;  %v2914_v40 = vld [vmem:[#allocation2 + $0xc0] sm:$0xff] }
 0x5c0   : > { %4039 = vmatmul.msk.f32.gmra.mxu3 %vm2963_vm9, %v2951_v5  ;;  %2755 = vst.msk [vmem:[#allocation2 + $0xc8] sm:$0xff] %vm2729_vm8, %v2684_v54 }
 0x5c1   : > { %2760 = vst.msk [vmem:[#allocation2 + $0xf0] sm:$0xff] %vm2729_vm8, %v2694_v36  ;;  %4002 = vmatmul.msk.f32.gmra.mxu2 %vm2963_vm9, %v2914_v40 }
 0x5c4   : > { %v6719_v26 = vpop.f32.mrf.mxu3 }
 0x5c6   : > { %v2791_v31 = vpop.permute.xlu0 %2790  ;;  %v2935_v0 = vld [vmem:[#allocation3 + $0x68] sm:$0xff]  ;;  %v2686_v38 = vpop.permute.xlu1 %2685 }
 0x5c7   : > { %2872 = vst.msk [vmem:[#allocation3 + $0x70] sm:$0xff] %vm2729_vm8, %v2791_v31  ;;  %4023 = vmatmul.msk.f32.gmra.mxu1 %vm2963_vm9, %v2935_v0  ;;  %v2915_v63 = vld [vmem:[#allocation2 + $0xc8] sm:$0xff]  ;;  %v2918_v0 = vld [vmem:[#allocation2 + $0xe0] sm:$0xff] }
 0x5c8   : > { %4040 = vmatmul.msk.f32.gmra.mxu3 %vm2963_vm9, %v2952_v45  ;;  %2756 = vst.msk [vmem:[#allocation2 + $0xd0] sm:$0xff] %vm2729_vm8, %v2686_v38  ;;  %v2920_v14 = vld [vmem:[#allocation2 + $0xf0] sm:$0xff] }
 0x5c9   : > { %4003 = vmatmul.msk.f32.gmra.mxu2 %vm2963_vm9, %v2915_v63 }
 0x5cc   : > { %v6726_v30 = vpop.f32.mrf.mxu3 }
 0x5ce   : > { %v2793_v6 = vpop.permute.xlu0 %2792  ;;  %v2936_v2 = vld [vmem:[#allocation3 + $0x70] sm:$0xff]  ;;  %v2688_v41 = vpop.permute.xlu1 %2687 }
 0x5cf   : > { %2873 = vst.msk [vmem:[#allocation3 + $0x78] sm:$0xff] %vm2729_vm8, %v2793_v6  ;;  %4024 = vmatmul.msk.f32.gmra.mxu1 %vm2963_vm9, %v2936_v2  ;;  %v2916_v49 = vld [vmem:[#allocation2 + $0xd0] sm:$0xff] }
 0x5d0   : > { %4041 = vmatmul.msk.f32.gmra.mxu3 %vm2963_vm9, %v2953_v34  ;;  %2757 = vst.msk [vmem:[#allocation2 + $0xd8] sm:$0xff] %vm2729_vm8, %v2688_v41 }
 0x5d1   : > { %4004 = vmatmul.msk.f32.gmra.mxu2 %vm2963_vm9, %v2916_v49 }
 0x5d4   : > { %v6733_v24 = vpop.f32.mrf.mxu3 }
 0x5d6   : > { %v2937_v7 = vld [vmem:[#allocation3 + $0x78] sm:$0xff]  ;;  %v2662_v50 = vpop.permute.xlu1 %2661  ;;  %v2692_v56 = vpop.permute.xlu0 %2691 }
 0x5d7   : > { %4025 = vmatmul.msk.f32.gmra.mxu1 %vm2963_vm9, %v2937_v7  ;;  %2744 = vst.msk [vmem:[#allocation2 + $0x70] sm:$0xff] %vm2729_vm8, %v2662_v50  ;;  %v2917_v32 = vld [vmem:[#allocation2 + $0xd8] sm:$0xff] }
 0x5d8   : > { %2759 = vst.msk [vmem:[#allocation2 + $0xe8] sm:$0xff] %vm2729_vm8, %v2692_v56 }
 0x5d9   : > { %4005 = vmatmul.msk.f32.gmra.mxu2 %vm2963_vm9, %v2917_v32 }
 0x5dc   : > { %v3286_v11 = vpop.f32.mrf.mxu1  ;;  %v3343_v33 = vpop.f32.mrf.mxu3 }
 0x5dd   : > { %3414 = vrot.lane.b32.xlu2 %v3286_v11, %s4214_s5 }
 0x5de   : > { %v2664_v46 = vpop.permute.xlu0 %2663  ;;  %v2904_v60 = vld [vmem:[#allocation2 + $0x70] sm:$0xff]  ;;  %v2696_v10 = vpop.permute.xlu1 %2695 }
 0x5df   : > { %2745 = vst.msk [vmem:[#allocation2 + $0x78] sm:$0xff] %vm2729_vm8, %v2664_v46  ;;  %3992 = vmatmul.msk.f32.gmra.mxu0 %vm2963_vm9, %v2904_v60  ;;  %v2919_v4 = vld [vmem:[#allocation2 + $0xe8] sm:$0xff] }
 0x5e0   : > { %2761 = vst.msk [vmem:[#allocation2 + $0xf8] sm:$0xff] %vm2729_vm8, %v2696_v10 }
 0x5e1   : > { %4006 = vmatmul.msk.f32.gmra.mxu2 %vm2963_vm9, %v2918_v0 }
 0x5e4   : > { %v3289_v13 = vpop.f32.mrf.mxu1 }
 0x5e5   : > { %3416 = vrot.lane.b32.xlu0 %v3289_v13, %s4214_s5  ;;  %v3080_v13 = vpop.f32.mrf.mxu0 }
 0x5e6   : > { %v2905_v55 = vld [vmem:[#allocation2 + $0x78] sm:$0xff] }
 0x5e7   : > { %3993 = vmatmul.msk.f32.gmra.mxu0 %vm2963_vm9, %v2905_v55  ;;  %v2921_v17 = vld [vmem:[#allocation2 + $0xf8] sm:$0xff] }
 0x5e9   : > { %4007 = vmatmul.msk.f32.gmra.mxu2 %vm2963_vm9, %v2919_v4 }
 0x5ec   : > { %v3292_v16 = vpop.f32.mrf.mxu1 }
 0x5ed   : > { %3418 = vrot.lane.b32.xlu1 %v3292_v16, %s4214_s5  ;;  %v3083_v16 = vpop.f32.mrf.mxu0 }
 0x5f1   : > { %4008 = vmatmul.msk.f32.gmra.mxu2 %vm2963_vm9, %v2920_v14 }
 0x5f4   : > { %v3295_v29 = vpop.f32.mrf.mxu1 }
 0x5f5   : > { %3420 = vrot.lane.b32.xlu2 %v3295_v29, %s4214_s5  ;;  %v3086_v21 = vpop.f32.mrf.mxu0 }
 0x5f9   : > { %4009 = vmatmul.msk.f32.gmra.mxu2 %vm2963_vm9, %v2921_v17 }
 0x5fb   : > { %v3346_v51 = vpop.f32.mrf.mxu3 }
 0x5fc   : > { %v3298_v1 = vpop.f32.mrf.mxu1 }
 0x5fd   : > { %3422 = vrot.lane.b32.xlu0 %v3298_v1, %s4214_s5 }
 0x603   : > { %v3349_v58 = vpop.f32.mrf.mxu3 }
 0x604   : > { %v3301_v27 = vpop.f32.mrf.mxu1 }
 0x605   : > { %3424 = vrot.lane.b32.xlu1 %v3301_v27, %s4214_s5 }
 0x60b   : > { %v3352_v39 = vpop.f32.mrf.mxu3 }
 0x60c   : > { %v3304_v35 = vpop.f32.mrf.mxu1 }
 0x60d   : > { %3426 = vrot.lane.b32.xlu2 %v3304_v35, %s4214_s5 }
 0x613   : > { %v3355_v59 = vpop.f32.mrf.mxu3 }
 0x614   : > { %v3307_v44 = vpop.f32.mrf.mxu1 }
 0x615   : > { %3428 = vrot.lane.b32.xlu0 %v3307_v44, %s4214_s5 }
 0x61b   : > { %v3358_v52 = vpop.f32.mrf.mxu3 }
 0x61c   : > { %v3310_v62 = vpop.f32.mrf.mxu1 }
 0x61d   : > { %3430 = vrot.lane.b32.xlu1 %v3310_v62, %s4214_s5 }
 0x623   : > { %v3361_v61 = vpop.f32.mrf.mxu3 }
 0x624   : > { %v3313_v28 = vpop.f32.mrf.mxu1 }
 0x625   : > { %3432 = vrot.lane.b32.xlu2 %v3313_v28, %s4214_s5 }
 0x62b   : > { %v3364_v2 = vpop.f32.mrf.mxu3 }
 0x62c   : > { %v3316_v43 = vpop.f32.mrf.mxu1 }
 0x62d   : > { %3434 = vrot.lane.b32.xlu0 %v3316_v43, %s4214_s5 }
 0x633   : > { %v3367_v5 = vpop.f32.mrf.mxu3 }
 0x634   : > { %v3319_v47 = vpop.f32.mrf.mxu1 }
 0x635   : > { %3436 = vrot.lane.b32.xlu1 %v3319_v47, %s4214_s5 }
 0x637   : > { %v3415_v12 = vpop.permute.xlu2 %3414 }
 0x638   : > { %v3510_v29 = vadd.f32 %v3415_v12, %v3077_v9 }
 0x63b   : > { %v3370_v8 = vpop.f32.mrf.mxu3 }
 0x63c   : > { %v3322_v3 = vpop.f32.mrf.mxu1 }
 0x63d   : > { %3438 = vrot.lane.b32.xlu2 %v3322_v3, %s4214_s5 }
 0x643   : > { %v3373_v7 = vpop.f32.mrf.mxu3 }
 0x644   : > { %v3325_v31 = vpop.f32.mrf.mxu1 }
 0x645   : > { %3440 = vrot.lane.b32.xlu0 %v3325_v31, %s4214_s5 }
 0x64b   : > { %v3376_v11 = vpop.f32.mrf.mxu3 }
 0x64c   : > { %v3328_v37 = vpop.f32.mrf.mxu1 }
 0x64d   : > { %3446 = vrot.lane.b32.xlu0 %v6719_v26, %s4214_s5  ;;  %3442 = vrot.lane.b32.xlu1 %v3328_v37, %s4214_s5  ;;  %v3125_v26 = vpop.f32.mrf.mxu2 }
 0x64f   : > { %v3421_v15 = vpop.permute.xlu2 %3420 }
 0x650   : > { %v3513_v56 = vadd.f32 %v3421_v15, %v3086_v21 }
 0x652   : > { %v3545_v62 = vsel %vm219_vm0, %v3086_v21, %v3513_v56 }
 0x653   : > { %v3379_v20 = vpop.f32.mrf.mxu3  ;;  %v3581_v55 = vadd.f32 %v6789_v22, %v3545_v62 }
 0x654   : > { %v3331_v6 = vpop.f32.mrf.mxu1 }
 0x655   : > { %3452 = vrot.lane.b32.xlu0 %v3343_v33, %s4214_s5  ;;  %3448 = vrot.lane.b32.xlu1 %v6726_v30, %s4214_s5  ;;  %v3542_v30 = vsel %vm219_vm0, %v3077_v9, %v3510_v29  ;;  %v3128_v53 = vpop.f32.mrf.mxu2 }
 0x656   : > { %3444 = vrot.lane.b32.xlu2 %v3331_v6, %s4214_s5  ;;  %v3578_v48 = vadd.f32 %v6789_v22, %v3542_v30 }
 0x657   : > { %v3417_v23 = vpop.permute.xlu0 %3416 }
 0x658   : > { %v3511_v54 = vadd.f32 %v3417_v23, %v3080_v13 }
 0x65a   : > { %v3543_v27 = vsel %vm219_vm0, %v3080_v13, %v3511_v54 }
 0x65b   : > { %v3579_v25 = vadd.f32 %v6789_v22, %v3543_v27 }
 0x65d   : > { %3458 = vrot.lane.b32.xlu0 %v3352_v39, %s4214_s5  ;;  %3454 = vrot.lane.b32.xlu1 %v3346_v51, %s4214_s5  ;;  %v3131_v33 = vpop.f32.mrf.mxu2 }
 0x65e   : > { %3450 = vrot.lane.b32.xlu2 %v6733_v24, %s4214_s5  ;;  %v3089_v24 = vpop.f32.mrf.mxu0 }
 0x65f   : > { %v3419_v19 = vpop.permute.xlu1 %3418 }
 0x660   : > { %v3512_v35 = vadd.f32 %v3419_v19, %v3083_v16 }
 0x662   : > { %v3544_v36 = vsel %vm219_vm0, %v3083_v16, %v3512_v35 }
 0x663   : > { %v3580_v50 = vadd.f32 %v6789_v22, %v3544_v36 }
 0x665   : > { %3464 = vrot.lane.b32.xlu0 %v3361_v61, %s4214_s5  ;;  %3460 = vrot.lane.b32.xlu1 %v3355_v59, %s4214_s5  ;;  %v3134_v63 = vpop.f32.mrf.mxu2 }
 0x666   : > { %3456 = vrot.lane.b32.xlu2 %v3349_v58, %s4214_s5  ;;  %v3092_v41 = vpop.f32.mrf.mxu0 }
 0x667   : > { %v3427_v45 = vpop.permute.xlu2 %3426 }
 0x66d   : > { %3466 = vrot.lane.b32.xlu1 %v3364_v2, %s4214_s5  ;;  %3470 = vrot.lane.b32.xlu0 %v3370_v8, %s4214_s5  ;;  %v3137_v59 = vpop.f32.mrf.mxu2 }
 0x66e   : > { %3462 = vrot.lane.b32.xlu2 %v3358_v52, %s4214_s5  ;;  %v3095_v49 = vpop.f32.mrf.mxu0 }
 0x66f   : > { %v3423_v18 = vpop.permute.xlu0 %3422  ;;  %v3516_v8 = vadd.f32 %v3427_v45, %v3095_v49 }
 0x670   : > { %v3514_v32 = vadd.f32 %v3423_v18, %v3089_v24 }
 0x671   : > { %v3548_v13 = vsel %vm219_vm0, %v3095_v49, %v3516_v8 }
 0x672   : > { %v3546_v47 = vsel %vm219_vm0, %v3089_v24, %v3514_v32  ;;  %v3584_v12 = vadd.f32 %v6789_v22, %v3548_v13 }
 0x673   : > { %v3582_v52 = vadd.f32 %v6789_v22, %v3546_v47 }
 0x675   : > { %3472 = vrot.lane.b32.xlu1 %v3373_v7, %s4214_s5  ;;  %3476 = vrot.lane.b32.xlu0 %v3379_v20, %s4214_s5  ;;  %v3140_v7 = vpop.f32.mrf.mxu2 }
 0x676   : > { %3468 = vrot.lane.b32.xlu2 %v3367_v5, %s4214_s5  ;;  %v3098_v61 = vpop.f32.mrf.mxu0 }
 0x677   : > { %v3425_v1 = vpop.permute.xlu1 %3424 }
 0x678   : > { %v3515_v31 = vadd.f32 %v3425_v1, %v3092_v41 }
 0x67a   : > { %v3547_v2 = vsel %vm219_vm0, %v3092_v41, %v3515_v31 }
 0x67b   : > { %v3583_v14 = vadd.f32 %v6789_v22, %v3547_v2 }
 0x67e   : > { %3474 = vrot.lane.b32.xlu2 %v3376_v11, %s4214_s5  ;;  %v3101_v9 = vpop.f32.mrf.mxu0  ;;  %s175_s5 = sand.u32 1, %s4195_s13  }
 0x67f   : > { %v6796_v57 = vpop.permute.xlu2 %3432  ;;  %s3784_s18 = sshll.u32 %s175_s5, 5  ;;  %s3679_s21 = scalar_lea.sflag [#allocation5], %s175_s5 }
 0x680   : > { %s177_s29 = scalar_lea.vmem [#allocation4], %s3784_s18 }
 0x681   : > { %s3693_s10 = sshll.u32 %s177_s29, 4  ;;  %s3694_s10 = int_to_ptr.vmem [resolvable:$true] %s3693_s10 }
 0x686   : > { %v3104_v21 = vpop.f32.mrf.mxu0 }
 0x687   : > { %v6792_v42 = vpop.permute.xlu0 %3428 }
 0x688   : > { %v3517_v16 = vadd.f32 %v6792_v42, %v3098_v61 }
 0x68a   : > { %v3549_v29 = vsel %vm219_vm0, %v3098_v61, %v3517_v16 }
 0x68b   : > { %v3585_v30 = vadd.f32 %v6789_v22, %v3549_v29 }
 0x68e   : > { %v3107_v27 = vpop.f32.mrf.mxu0 }
 0x68f   : > { %v6798_v38 = vpop.permute.xlu1 %3430 }
 0x690   : > { %v3518_v1 = vadd.f32 %v6798_v38, %v3101_v9 }
 0x692   : > { %v3550_v24 = vsel %vm219_vm0, %v3101_v9, %v3518_v1 }
 0x697   : > { %v6804_v40 = vpop.permute.xlu2 %3438 }
 0x69f   : > { %v6800_v34 = vpop.permute.xlu0 %3434 }
 0x6a7   : > { %v6806_v44 = vpop.permute.xlu1 %3436 }
 0x6aa   : > { %3610 = vxpose.xlu1.b32.start [1/16] (narrow) %v3578_v48, 16 }
 0x6b0   : > { %v6812_v46 = vpop.permute.xlu2 %3444 }
 0x6b2   : > { %3611 = vxpose.xlu1.b32.cont [2/16] (narrow) %v3579_v25, 16  ;;  %v3586_v25 = vadd.f32 %v6789_v22, %v3550_v24 }
 0x6b7   : > { %v6808_v51 = vpop.permute.xlu0 %3440 }
 0x6b8   : > { %v3451_v0 = vpop.permute.xlu2 %3450 }
 0x6b9   : > { %v3528_v6 = vadd.f32 %v3451_v0, %v3131_v33 }
 0x6ba   : > { %3612 = vxpose.xlu1.b32.cont [3/16] (narrow) %v3580_v50, 16 }
 0x6bb   : > { %v3560_v5 = vsel %vm219_vm0, %v3131_v33, %v3528_v6  ;;  %v3519_v33 = vadd.f32 %v6796_v57, %v3104_v21 }
 0x6bc   : > { %v3596_v11 = vadd.f32 %v6789_v22, %v3560_v5 }
 0x6bd   : > { %v3551_v50 = vsel %vm219_vm0, %v3104_v21, %v3519_v33 }
 0x6bf   : > { %v6814_v60 = vpop.permute.xlu1 %3442  ;;  %v3447_v58 = vpop.permute.xlu0 %3446 }
 0x6c0   : > { %v3526_v28 = vadd.f32 %v3447_v58, %v3125_v26  ;;  %v3457_v48 = vpop.permute.xlu2 %3456  ;;  %v3520_v58 = vadd.f32 %v6800_v34, %v3107_v27 }
 0x6c1   : > { %v3531_v54 = vadd.f32 %v3457_v48, %v3140_v7 }
 0x6c2   : > { %3613 = vxpose.xlu1.b32.cont [4/16] (narrow) %v3581_v55, 16  ;;  %v3558_v43 = vsel %vm219_vm0, %v3125_v26, %v3526_v28  ;;  %v3143_v26 = vpop.f32.mrf.mxu2  ;;  %v3110_v28 = vpop.f32.mrf.mxu0  ;;  %v3552_v32 = vsel %vm219_vm0, %v3107_v27, %v3520_v58 }
 0x6c3   : > { %v3594_v39 = vadd.f32 %v6789_v22, %v3558_v43  ;;  %v3563_v35 = vsel %vm219_vm0, %v3140_v7, %v3531_v54  ;;  %v3588_v43 = vadd.f32 %v6789_v22, %v3552_v32  ;;  %v3521_v47 = vadd.f32 %v6806_v44, %v3110_v28 }
 0x6c4   : > { %v3599_v38 = vadd.f32 %v6789_v22, %v3563_v35 }
 0x6c5   : > { %3642 = vxpose.xlu2.b32.start [1/16] (narrow) %v3594_v39, 16  ;;  %v3553_v31 = vsel %vm219_vm0, %v3110_v28, %v3521_v47 }
 0x6c6   : > { %v3589_v0 = vadd.f32 %v6789_v22, %v3553_v31 }
 0x6c7   : > { %v3449_v10 = vpop.permute.xlu1 %3448  ;;  %v3453_v17 = vpop.permute.xlu0 %3452 }
 0x6c8   : > { %v3527_v3 = vadd.f32 %v3449_v10, %v3128_v53  ;;  %v3529_v20 = vadd.f32 %v3453_v17, %v3134_v63  ;;  %v3463_v10 = vpop.permute.xlu2 %3462 }
 0x6ca   : > { %3614 = vxpose.xlu1.b32.cont [5/16] (narrow) %v3582_v52, 16  ;;  %v3559_v37 = vsel %vm219_vm0, %v3128_v53, %v3527_v3  ;;  %v3561_v23 = vsel %vm219_vm0, %v3134_v63, %v3529_v20  ;;  %v3146_v53 = vpop.f32.mrf.mxu2  ;;  %v3587_v63 = vadd.f32 %v6789_v22, %v3551_v50  ;;  %v3113_v3 = vpop.f32.mrf.mxu0 }
 0x6cb   : > { %v3595_v4 = vadd.f32 %v6789_v22, %v3559_v37  ;;  %v3597_v19 = vadd.f32 %v6789_v22, %v3561_v23  ;;  %v3522_v37 = vadd.f32 %v6804_v40, %v3113_v3 }
 0x6cd   : > { %3643 = vxpose.xlu2.b32.cont [2/16] (narrow) %v3595_v4, 16  ;;  %v3554_v5 = vsel %vm219_vm0, %v3113_v3, %v3522_v37 }
 0x6ce   : > { %v3590_v8 = vadd.f32 %v6789_v22, %v3554_v5 }
 0x6cf   : > { %v3455_v15 = vpop.permute.xlu1 %3454  ;;  %v3459_v36 = vpop.permute.xlu0 %3458 }
 0x6d0   : > { %v3530_v18 = vadd.f32 %v3455_v15, %v3137_v59  ;;  %v3532_v41 = vadd.f32 %v3459_v36, %v3143_v26 }
 0x6d2   : > { %3615 = vxpose.xlu1.b32.cont [6/16] (narrow) %v3583_v14, 16  ;;  %v3562_v45 = vsel %vm219_vm0, %v3137_v59, %v3530_v18  ;;  %v3149_v56 = vpop.f32.mrf.mxu2  ;;  %v3564_v62 = vsel %vm219_vm0, %v3143_v26, %v3532_v41  ;;  %v3116_v2 = vpop.f32.mrf.mxu0 }
 0x6d3   : > { %v3598_v42 = vadd.f32 %v6789_v22, %v3562_v45  ;;  %v3600_v57 = vadd.f32 %v6789_v22, %v3564_v62  ;;  %v3534_v52 = vadd.f32 %v3463_v10, %v3149_v56  ;;  %v3523_v17 = vadd.f32 %v6808_v51, %v3116_v2  ;;  %v3469_v26 = vpop.permute.xlu2 %3468 }
 0x6d5   : > { %3644 = vxpose.xlu2.b32.cont [3/16] (narrow) %v3596_v11, 16  ;;  %v3566_v61 = vsel %vm219_vm0, %v3149_v56, %v3534_v52 }
 0x6d6   : > { %v3602_v44 = vadd.f32 %v6789_v22, %v3566_v61 }
 0x6d7   : > { %v3461_v49 = vpop.permute.xlu1 %3460  ;;  %v3465_v4 = vpop.permute.xlu0 %3464 }
 0x6d8   : > { %v3533_v55 = vadd.f32 %v3461_v49, %v3146_v53 }
 0x6da   : > { %3616 = vxpose.xlu1.b32.cont [7/16] (narrow) %v3584_v12, 16  ;;  %v3565_v39 = vsel %vm219_vm0, %v3146_v53, %v3533_v55  ;;  %v3152_v59 = vpop.f32.mrf.mxu2  ;;  %v3119_v9 = vpop.f32.mrf.mxu0  ;;  %v3555_v12 = vsel %vm219_vm0, %v3116_v2, %v3523_v17 }
 0x6db   : > { %v3601_v34 = vadd.f32 %v6789_v22, %v3565_v39  ;;  %v3535_v14 = vadd.f32 %v3465_v4, %v3152_v59  ;;  %v3591_v23 = vadd.f32 %v6789_v22, %v3555_v12  ;;  %v3524_v15 = vadd.f32 %v6814_v60, %v3119_v9  ;;  %v3475_v36 = vpop.permute.xlu2 %3474 }
 0x6dd   : > { %3645 = vxpose.xlu2.b32.cont [4/16] (narrow) %v3597_v19, 16  ;;  %v3567_v7 = vsel %vm219_vm0, %v3152_v59, %v3535_v14  ;;  %v3556_v18 = vsel %vm219_vm0, %v3119_v9, %v3524_v15 }
 0x6de   : > { %v3603_v40 = vadd.f32 %v6789_v22, %v3567_v7 }
 0x6df   : > { %v3467_v11 = vpop.permute.xlu1 %3466  ;;  %v3471_v48 = vpop.permute.xlu0 %3470 }
 0x6e2   : > { %3617 = vxpose.xlu1.b32.cont [8/16] (narrow) %v3585_v30, 16  ;;  %v3155_v6 = vpop.f32.mrf.mxu2  ;;  %v3122_v21 = vpop.f32.mrf.mxu0  ;;  %v3592_v30 = vadd.f32 %v6789_v22, %v3556_v18 }
 0x6e3   : > { %v3536_v20 = vadd.f32 %v3467_v11, %v3155_v6  ;;  %v3525_v1 = vadd.f32 %v6812_v46, %v3122_v21 }
 0x6e5   : > { %3646 = vxpose.xlu2.b32.cont [5/16] (narrow) %v3598_v42, 16  ;;  %v3568_v16 = vsel %vm219_vm0, %v3155_v6, %v3536_v20  ;;  %v3557_v54 = vsel %vm219_vm0, %v3122_v21, %v3525_v1 }
 0x6e6   : > { %v3604_v51 = vadd.f32 %v6789_v22, %v3568_v16  ;;  %v3593_v24 = vadd.f32 %v6789_v22, %v3557_v54 }
 0x6e7   : > { %v3477_v62 = vpop.permute.xlu0 %3476 }
 0x6ea   : > { %3618 = vxpose.xlu1.b32.cont [9/16] (narrow) %v3586_v25, 16  ;;  %v3158_v13 = vpop.f32.mrf.mxu2  ;;  %v3473_v25 = vpop.permute.xlu1 %3472 }
 0x6eb   : > { %v3537_v19 = vadd.f32 %v3469_v26, %v3158_v13 }
 0x6ed   : > { %3647 = vxpose.xlu2.b32.cont [6/16] (narrow) %v3599_v38, 16  ;;  %v3569_v45 = vsel %vm219_vm0, %v3158_v13, %v3537_v19 }
 0x6ee   : > { %v3605_v60 = vadd.f32 %v6789_v22, %v3569_v45 }
 0x6f2   : > { %3619 = vxpose.xlu1.b32.cont [10/16] (narrow) %v3587_v63, 16  ;;  %v3161_v29 = vpop.f32.mrf.mxu2 }
 0x6f3   : > { %v3538_v42 = vadd.f32 %v3471_v48, %v3161_v29 }
 0x6f5   : > { %3648 = vxpose.xlu2.b32.cont [7/16] (narrow) %v3600_v57, 16  ;;  %v3570_v27 = vsel %vm219_vm0, %v3161_v29, %v3538_v42 }
 0x6f6   : > { %v3606_v35 = vadd.f32 %v6789_v22, %v3570_v27 }
 0x6fa   : > { %3620 = vxpose.xlu1.b32.cont [11/16] (narrow) %v3588_v43, 16  ;;  %v3164_v53 = vpop.f32.mrf.mxu2 }
 0x6fb   : > { %v3539_v33 = vadd.f32 %v3473_v25, %v3164_v53 }
 0x6fd   : > { %3649 = vxpose.xlu2.b32.cont [8/16] (narrow) %v3601_v34, 16  ;;  %v3571_v46 = vsel %vm219_vm0, %v3164_v53, %v3539_v33 }
 0x6fe   : > { %v3607_v41 = vadd.f32 %v6789_v22, %v3571_v46 }
 0x702   : > { %3621 = vxpose.xlu1.b32.cont [12/16] (narrow) %v3589_v0, 16  ;;  %v3167_v38 = vpop.f32.mrf.mxu2 }
 0x703   : > { %v3540_v50 = vadd.f32 %v3475_v36, %v3167_v38 }
 0x705   : > { %3650 = vxpose.xlu2.b32.cont [9/16] (narrow) %v3602_v44, 16  ;;  %v3572_v56 = vsel %vm219_vm0, %v3167_v38, %v3540_v50 }
 0x706   : > { %v3608_v58 = vadd.f32 %v6789_v22, %v3572_v56 }
 0x70a   : > { %3622 = vxpose.xlu1.b32.cont [13/16] (narrow) %v3590_v8, 16  ;;  %v3170_v63 = vpop.f32.mrf.mxu2 }
 0x70b   : > { %v3541_v49 = vadd.f32 %v3477_v62, %v3170_v63 }
 0x70d   : > { %3651 = vxpose.xlu2.b32.cont [10/16] (narrow) %v3603_v40, 16  ;;  %v3573_v28 = vsel %vm219_vm0, %v3170_v63, %v3541_v49 }
 0x70e   : > { %v3609_v57 = vadd.f32 %v6789_v22, %v3573_v28 }
 0x712   : > { %3623 = vxpose.xlu1.b32.cont [14/16] (narrow) %v3591_v23, 16 }
 0x715   : > { %3652 = vxpose.xlu2.b32.cont [11/16] (narrow) %v3604_v51, 16 }
 0x71a   : > { %3624 = vxpose.xlu1.b32.cont [15/16] (narrow) %v3592_v30, 16 }
 0x71d   : > { %3653 = vxpose.xlu2.b32.cont [12/16] (narrow) %v3605_v60, 16 }
 0x722   : > { %3625 = vxpose.xlu1.b32.end [16/16] (narrow) %v3593_v24, 16 }
 0x725   : > { %3654 = vxpose.xlu2.b32.cont [13/16] (narrow) %v3606_v35, 16 }
 0x72d   : > { %3655 = vxpose.xlu2.b32.cont [14/16] (narrow) %v3607_v41, 16 }
 0x735   : > { %3656 = vxpose.xlu2.b32.cont [15/16] (narrow) %v3608_v58, 16 }
 0x73d   : > { %3657 = vxpose.xlu2.b32.end [16/16] (narrow) %v3609_v57, 16 }
 0x74e   : > { %v3626_v55 = vpop.trf.xlu1 }
 0x74f   : > { %3674 = vst [vmem:[%s177_s29] sm:$0xff] %v3626_v55 }
 0x756   : > { %v3627_v32 = vpop.trf.xlu1 }
 0x757   : > { %3676 = vst [vmem:[%s177_s29 + $0x10] sm:$0xff] %v3627_v32 }
 0x75e   : > { %v3658_v43 = vpop.trf.xlu2 }
 0x75f   : > { %3675 = vst [vmem:[%s177_s29 + $0x8] sm:$0xff] %v3658_v43 }
 0x766   : > { %v3659_v22 = vpop.trf.xlu2 }
 0x767   : > { %3677 = vst [vmem:[%s177_s29 + $0x18] sm:$0xff] %v3659_v22 }
 0x768   : > { %4160 = shalt.err (!%p4157_p5)
}
 0x769   : > { %s4222_s5 = smov 256  }
 0x76a   : > { %4067 = dma.vmem_to_hbm [thread:$0]  (%p4283_p4), %s3694_s10, 512, %s3696_s19, %s3679_s21, %s4222_s5, %s4222_s5, %s4215_s6  }
 0x76b PF: > { %p4073_p6 = scmp.ge.s32.totalorder %s4211_s17, 2  ;;  %s3710_s18 = sand.u32 1, %s4191_s12  }
 0x76c   : > { %s3711_s29 = scalar_lea.sflag [#allocation5], %s3710_s18 }
 0x76d   : > { %p4070_p7 = pnand %p4073_p6, %p4290_p8 }
 0x76f   : > { %p4071_p9 = pneg %p4070_p7 }
 0x771   : > { %4186 = dma.done.wait (%p4071_p9), %s3711_s29, 512  }
 0x772   : > { %4188 = vsyncadd (%p4071_p9), %s3711_s29, 4294966784  ;;  %s16_s17 = sadd.s32 1, %s4211_s17   ;;  %s6946_s12 = smov %s4195_s13 }
 0x773   : > { %p13_p10 = scmp.ge.s32.totalorder %s16_s17, 4   ;;  %s6947_s13 = smov %s4199_s14 }
 0x774   : > { %s6948_s14 = smov %s4296_s25  ;;  %s6949_s15 = smov %s4207_s16 }
 0x775   : > { %s6950_s16 = smov %s6952_s20  ;;  %15 = sbr.rel (!%p13_p10) target bundleno = 4 (0x4), region = 70 }
 0x77a   :  { %3717 = vsyncpa [#allocation5], 1 }
 0x77b   :  { %3719 = vsyncpa [#allocation5 + $0x1], 1 }

</bundles_post_ra>
